<compile_context>
chip_gen: v5e
topology: v5e:2x2
jax: 0.10.0
libtpu: 0.0.40
codegen_flags: <defaults>
</compile_context>

<pallas_src>
import functools

import jax
import jax.numpy as jnp
import numpy as np
from jax.experimental import pallas as pl
from jax.experimental.pallas import tpu as pltpu


def _round_up(x, m):
    return ((x + m - 1) // m) * m


# ----------------------------------------------------------------------------
# Kernel 1: fused im2col conv (+ per-tile channel statistics)
# ----------------------------------------------------------------------------
def _conv_stats_kernel(x_ref, w_ref, mask_ref, y_ref, stats_ref, *,
                       kh_size, kw_size, th, wp):
    # x_ref:     (1, (TH+KH-1)*WP + KW-1, Cin)   compute dtype (bf16/f32)
    # w_ref:     (KH*KW, Cin, Cout_pad)          compute dtype
    # mask_ref:  (TH*WP, 1)                      f32, 1.0 on valid output cols
    # y_ref:     (1, TH*WP, Cout_pad)            f32 ("wide" rows)
    # stats_ref: (1, 2, Cout_pad)                f32 (row0: sum, row1: sum sq)
    rows = th * wp
    cout_pad = y_ref.shape[-1]
    x = x_ref[0]                                     # (rows_in, Cin)

    acc = jnp.zeros((rows, cout_pad), jnp.float32)
    for kh in range(kh_size):                        # 9 taps, unrolled
        for kw in range(kw_size):
            off = kh * wp + kw                       # static offset
            tap = x[off:off + rows, :]               # contiguous 2-D slice
            acc = acc + jnp.dot(tap, w_ref[kh * kw_size + kw],
                                preferred_element_type=jnp.float32)
    y_ref[0] = acc

    m = mask_ref[...]                                # (rows, 1) -> lane bcast
    s = jnp.sum(acc * m, axis=0, keepdims=True)      # (1, Cout_pad)
    ss = jnp.sum(acc * acc * m, axis=0, keepdims=True)
    stats_ref[0] = jnp.concatenate([s, ss], axis=0)  # (2, Cout_pad)


# ----------------------------------------------------------------------------
# Kernel 2: tiled ActNorm apply  out = (y + bias) * mul
# ----------------------------------------------------------------------------
def _actnorm_apply_kernel(y_ref, bias_ref, mul_ref, o_ref):
    # y_ref/o_ref: (1, TH*WP, Cout_pad) f32; bias/mul: (1, Cout_pad) f32
    o_ref[0] = (y_ref[0] + bias_ref[...]) * mul_ref[...]


# ----------------------------------------------------------------------------
# Wrapper
# ----------------------------------------------------------------------------
def glow_conv2d(x_nchw, weight_oihw, *, scale=1.0,
                compute_dtype=jnp.bfloat16,
                vmem_budget_bytes=20 * 1024 * 1024):
    """Forward of glow Conv2d (3x3 'same' conv, no bias, + ActNorm2d init+apply)."""
    B, Cin, H, W = x_nchw.shape
    Cout, cin_w, KH, KW = weight_oihw.shape
    assert cin_w == Cin
    assert KH % 2 == 1 and KW % 2 == 1, "odd kernel / stride-1 'same' only"
    ph, pw = (KH - 1) // 2, (KW - 1) // 2
    WP = W + 2 * pw                                  # padded width
    cout_pad = _round_up(Cout, 128)                  # lane-dense output
    itemsize = jnp.dtype(compute_dtype).itemsize

    # ---- pick tile height TH: largest divisor of H fitting the VMEM budget --
    def tile_bytes(th_):
        rows_in_ = (th_ + 2 * ph) * WP + (KW - 1)
        rows_out_ = th_ * WP
        in_b = rows_in_ * Cin * itemsize
        out_b = rows_out_ * cout_pad * 4
        w_b = KH * KW * Cin * cout_pad * itemsize
        mask_b = rows_out_ * 4
        stats_b = 2 * cout_pad * 4
        acc_b = rows_out_ * cout_pad * 4
        return 2 * (in_b + out_b + mask_b + stats_b) + 2 * w_b + acc_b

    th = 1
    for cand in range(1, H + 1):
        if H % cand == 0 and tile_bytes(cand) <= vmem_budget_bytes:
            th = cand
    n_h = H // th
    n_tiles = B * n_h
    rows_in = (th + 2 * ph) * WP + (KW - 1)
    rows_out = th * WP

    # ---- wrapper-side layout plumbing (plain JAX / XLA) ---------------------
    x_nhwc = jnp.transpose(x_nchw, (0, 2, 3, 1)).astype(compute_dtype)
    x_pad = jnp.pad(x_nhwc, ((0, 0), (ph, ph), (pw, pw), (0, 0)))
    # per-tile slabs with (KH-1)-row halo; duplicates only the halo rows.
    slabs = jnp.stack(
        [x_pad[:, i * th:i * th + th + 2 * ph] for i in range(n_h)], axis=1)
    slabs = slabs.reshape(n_tiles, (th + 2 * ph) * WP, Cin)
    slabs = jnp.pad(slabs, ((0, 0), (0, KW - 1), (0, 0)))   # (n_tiles, rows_in, Cin)

    # weights: (Cout, Cin, KH, KW) -> (KH*KW, Cin, Cout_pad), zero-pad channels
    w = jnp.transpose(weight_oihw, (2, 3, 1, 0)).astype(compute_dtype)
    w = jnp.pad(w, ((0, 0), (0, 0), (0, 0), (0, cout_pad - Cout)))
    w = w.reshape(KH * KW, Cin, cout_pad)

    # mask of valid output columns within the "wide" row layout
    col = jnp.arange(rows_out, dtype=jnp.int32) % WP
    mask = (col < W).astype(jnp.float32).reshape(rows_out, 1)

    flops = 2 * n_tiles * rows_out * KH * KW * Cin * cout_pad
    bytes_accessed = (n_tiles * rows_in * Cin * itemsize
                      + KH * KW * Cin * cout_pad * itemsize
                      + n_tiles * rows_out * cout_pad * 4
                      + n_tiles * 2 * cout_pad * 4)

    conv_kernel = functools.partial(_conv_stats_kernel,
                                    kh_size=KH, kw_size=KW, th=th, wp=WP)
    y_wide, stats = pl.pallas_call(
        conv_kernel,
        out_shape=(
            jax.ShapeDtypeStruct((n_tiles, rows_out, cout_pad), jnp.float32),
            jax.ShapeDtypeStruct((n_tiles, 2, cout_pad), jnp.float32),
        ),
        grid_spec=pltpu.PrefetchScalarGridSpec(
            num_scalar_prefetch=0,
            grid=(n_tiles,),
            in_specs=[
                pl.BlockSpec((1, rows_in, Cin), lambda i: (i, 0, 0)),
                pl.BlockSpec((KH * KW, Cin, cout_pad), lambda i: (0, 0, 0)),
                pl.BlockSpec((rows_out, 1), lambda i: (0, 0)),
            ],
            out_specs=[
                pl.BlockSpec((1, rows_out, cout_pad), lambda i: (i, 0, 0)),
                pl.BlockSpec((1, 2, cout_pad), lambda i: (i, 0, 0)),
            ],
        ),
        compiler_params=pltpu.CompilerParams(
            dimension_semantics=("parallel",),
            vmem_limit_bytes=48 * 1024 * 1024),
        cost_estimate=pl.CostEstimate(flops=flops, transcendentals=0,
                                      bytes_accessed=bytes_accessed),
    )(slabs, w, mask)

    # ---- ActNorm data-dependent init (tiny per-channel reduce, plain JAX) ---
    n_valid = float(B * H * W)
    csum = jnp.sum(stats[:, 0, :], axis=0)
    csq = jnp.sum(stats[:, 1, :], axis=0)
    mean = csum / n_valid
    var = jnp.maximum(csq / n_valid - mean * mean, 0.0)
    bias = (-mean).reshape(1, cout_pad).astype(jnp.float32)
    # exp(log(scale / (sqrt(var)+1e-6))) == scale / (sqrt(var)+1e-6)
    mul = (scale / (jnp.sqrt(var) + 1e-6)).reshape(1, cout_pad).astype(jnp.float32)

    out_wide = pl.pallas_call(
        _actnorm_apply_kernel,
        out_shape=jax.ShapeDtypeStruct((n_tiles, rows_out, cout_pad), jnp.float32),
        grid_spec=pltpu.PrefetchScalarGridSpec(
            num_scalar_prefetch=0,
            grid=(n_tiles,),
            in_specs=[
                pl.BlockSpec((1, rows_out, cout_pad), lambda i: (i, 0, 0)),
                pl.BlockSpec((1, cout_pad), lambda i: (0, 0)),
                pl.BlockSpec((1, cout_pad), lambda i: (0, 0)),
            ],
            out_specs=pl.BlockSpec((1, rows_out, cout_pad), lambda i: (i, 0, 0)),
        ),
        compiler_params=pltpu.CompilerParams(
            dimension_semantics=("parallel",),
            vmem_limit_bytes=48 * 1024 * 1024),
    )(y_wide, bias, mul)

    # drop junk columns / padded channels, back to NCHW
    out = out_wide.reshape(B, H, WP, cout_pad)[:, :, :W, :Cout]
    return jnp.transpose(out, (0, 3, 1, 2))


# ----------------------------------------------------------------------------
# Pure-JAX reference (sanity check)
# ----------------------------------------------------------------------------
def glow_conv2d_ref(x_nchw, weight_oihw, *, scale=1.0, cast_dtype=None):
    xr = x_nchw if cast_dtype is None else x_nchw.astype(cast_dtype)
    wr = weight_oihw if cast_dtype is None else weight_oihw.astype(cast_dtype)
    y = jax.lax.conv_general_dilated(
        xr, wr, window_strides=(1, 1), padding="SAME",
        dimension_numbers=("NCHW", "OIHW", "NCHW"),
        preferred_element_type=jnp.float32)
    mean = jnp.mean(y, axis=(0, 2, 3), keepdims=True)
    xc = y - mean
    var = jnp.mean(xc * xc, axis=(0, 2, 3), keepdims=True)
    logs = jnp.log(scale / (jnp.sqrt(var) + 1e-6))
    return xc * jnp.exp(logs)


if __name__ == "__main__":
    B, Cin, H, W = 2, 4, 16, 16
    Cout, KH, KW = 8, 3, 3
    weight_std = 0.05

    key = jax.random.PRNGKey(0)
    kx, kw_key = jax.random.split(key)
    x = jax.random.normal(kx, (B, Cin, H, W), dtype=jnp.float32)
    # conv.weight.data.normal_(mean=0.0, std=0.05); no bias (do_actnorm=True)
    weight = weight_std * jax.random.normal(kw_key, (Cout, Cin, KH, KW),
                                            dtype=jnp.float32)

    # exact-semantics check: f32 MXU path vs. f32 lax.conv reference
    out_f32 = jax.block_until_ready(glow_conv2d(x, weight,
                                                compute_dtype=jnp.float32))
    assert out_f32.shape == (B, Cout, H, W)
    ref_f32 = jax.block_until_ready(glow_conv2d_ref(x, weight))
    np.testing.assert_allclose(np.asarray(out_f32), np.asarray(ref_f32),
                               rtol=2e-4, atol=2e-4)

    # default fast path: bf16 MXU inputs, f32 accumulation / statistics
    out_bf16 = jax.block_until_ready(glow_conv2d(x, weight))
    ref_bf16 = jax.block_until_ready(
        glow_conv2d_ref(x, weight, cast_dtype=jnp.bfloat16))
    np.testing.assert_allclose(np.asarray(out_bf16), np.asarray(ref_bf16),
                               rtol=1e-2, atol=1e-2)
    np.testing.assert_allclose(np.asarray(out_bf16), np.asarray(ref_f32),
                               rtol=6e-2, atol=6e-2)

    print("KERNEL_OK")
</pallas_src>

<mosaic_0001>
module attributes {stable_mosaic.version = 11 : i64} {
  func.func @_conv_stats_kernel(%arg0: i32, %arg1: memref<1x326x4xf32, #tpu.memory_space<vmem>>, %arg2: memref<9x4x128xf32, #tpu.memory_space<vmem>>, %arg3: memref<288x1xf32, #tpu.memory_space<vmem>>, %arg4: memref<1x288x128xf32, #tpu.memory_space<vmem>>, %arg5: memref<1x2x128xf32, #tpu.memory_space<vmem>>) attributes {dimension_semantics = [#tpu.dimension_semantics<parallel>], iteration_bounds = array<i64: 2>, scalar_prefetch = 0 : i64, scratch_operands = 0 : i64, tpu.core_type = #tpu.core_type<tc>, window_params = [{transform_indices = @transform_0, window_bounds = array<i64: 1, 326, 4>}, {pipeline_mode = #tpu.pipeline_mode<synchronous>, transform_indices = @transform_1, window_bounds = array<i64: 9, 4, 128>}, {pipeline_mode = #tpu.pipeline_mode<synchronous>, transform_indices = @transform_2, window_bounds = array<i64: 288, 1>}, {transform_indices = @transform_3, window_bounds = array<i64: 1, 288, 128>}, {transform_indices = @transform_4, window_bounds = array<i64: 1, 2, 128>}]} {
    %c0 = arith.constant 0 : index
    %c0_0 = arith.constant 0 : index
    %c0_1 = arith.constant 0 : index
    %0 = vector.load %arg1[%c0, %c0_0, %c0_1] : memref<1x326x4xf32, #tpu.memory_space<vmem>>, vector<1x326x4xf32>
    %1 = vector.shape_cast %0 : vector<1x326x4xf32> to vector<326x4xf32>
    %cst = arith.constant 0.000000e+00 : f32
    %2 = vector.broadcast %cst : f32 to vector<288x128xf32>
    %3 = vector.extract_strided_slice %1 {offsets = [0, 0], sizes = [288, 4], strides = [1, 1]} : vector<326x4xf32> to vector<288x4xf32>
    %c0_2 = arith.constant 0 : index
    %c0_3 = arith.constant 0 : index
    %c0_4 = arith.constant 0 : index
    %4 = vector.load %arg2[%c0_2, %c0_3, %c0_4] : memref<9x4x128xf32, #tpu.memory_space<vmem>>, vector<1x4x128xf32>
    %5 = vector.shape_cast %4 : vector<1x4x128xf32> to vector<4x128xf32>
    %cst_5 = arith.constant dense<0.000000e+00> : vector<288x128xf32>
    %6 = tpu.matmul %3, %5, %cst_5 {dimension_numbers = #tpu.dot_dimension_numbers<[1], [0], [0], [1], [0, 0, 1, 1], [], []>} : vector<288x4xf32>, vector<4x128xf32>, vector<288x128xf32> -> vector<288x128xf32>
    %7 = arith.addf %2, %6 : vector<288x128xf32>
    %8 = vector.extract_strided_slice %1 {offsets = [1, 0], sizes = [288, 4], strides = [1, 1]} : vector<326x4xf32> to vector<288x4xf32>
    %c1 = arith.constant 1 : index
    %c0_6 = arith.constant 0 : index
    %c0_7 = arith.constant 0 : index
    %9 = vector.load %arg2[%c1, %c0_6, %c0_7] : memref<9x4x128xf32, #tpu.memory_space<vmem>>, vector<1x4x128xf32>
    %10 = vector.shape_cast %9 : vector<1x4x128xf32> to vector<4x128xf32>
    %cst_8 = arith.constant dense<0.000000e+00> : vector<288x128xf32>
    %11 = tpu.matmul %8, %10, %cst_8 {dimension_numbers = #tpu.dot_dimension_numbers<[1], [0], [0], [1], [0, 0, 1, 1], [], []>} : vector<288x4xf32>, vector<4x128xf32>, vector<288x128xf32> -> vector<288x128xf32>
    %12 = arith.addf %7, %11 : vector<288x128xf32>
    %13 = vector.extract_strided_slice %1 {offsets = [2, 0], sizes = [288, 4], strides = [1, 1]} : vector<326x4xf32> to vector<288x4xf32>
    %c2 = arith.constant 2 : index
    %c0_9 = arith.constant 0 : index
    %c0_10 = arith.constant 0 : index
    %14 = vector.load %arg2[%c2, %c0_9, %c0_10] : memref<9x4x128xf32, #tpu.memory_space<vmem>>, vector<1x4x128xf32>
    %15 = vector.shape_cast %14 : vector<1x4x128xf32> to vector<4x128xf32>
    %cst_11 = arith.constant dense<0.000000e+00> : vector<288x128xf32>
    %16 = tpu.matmul %13, %15, %cst_11 {dimension_numbers = #tpu.dot_dimension_numbers<[1], [0], [0], [1], [0, 0, 1, 1], [], []>} : vector<288x4xf32>, vector<4x128xf32>, vector<288x128xf32> -> vector<288x128xf32>
    %17 = arith.addf %12, %16 : vector<288x128xf32>
    %18 = vector.extract_strided_slice %1 {offsets = [18, 0], sizes = [288, 4], strides = [1, 1]} : vector<326x4xf32> to vector<288x4xf32>
    %c3 = arith.constant 3 : index
    %c0_12 = arith.constant 0 : index
    %c0_13 = arith.constant 0 : index
    %19 = vector.load %arg2[%c3, %c0_12, %c0_13] : memref<9x4x128xf32, #tpu.memory_space<vmem>>, vector<1x4x128xf32>
    %20 = vector.shape_cast %19 : vector<1x4x128xf32> to vector<4x128xf32>
    %cst_14 = arith.constant dense<0.000000e+00> : vector<288x128xf32>
    %21 = tpu.matmul %18, %20, %cst_14 {dimension_numbers = #tpu.dot_dimension_numbers<[1], [0], [0], [1], [0, 0, 1, 1], [], []>} : vector<288x4xf32>, vector<4x128xf32>, vector<288x128xf32> -> vector<288x128xf32>
    %22 = arith.addf %17, %21 : vector<288x128xf32>
    %23 = vector.extract_strided_slice %1 {offsets = [19, 0], sizes = [288, 4], strides = [1, 1]} : vector<326x4xf32> to vector<288x4xf32>
    %c4 = arith.constant 4 : index
    %c0_15 = arith.constant 0 : index
    %c0_16 = arith.constant 0 : index
    %24 = vector.load %arg2[%c4, %c0_15, %c0_16] : memref<9x4x128xf32, #tpu.memory_space<vmem>>, vector<1x4x128xf32>
    %25 = vector.shape_cast %24 : vector<1x4x128xf32> to vector<4x128xf32>
    %cst_17 = arith.constant dense<0.000000e+00> : vector<288x128xf32>
    %26 = tpu.matmul %23, %25, %cst_17 {dimension_numbers = #tpu.dot_dimension_numbers<[1], [0], [0], [1], [0, 0, 1, 1], [], []>} : vector<288x4xf32>, vector<4x128xf32>, vector<288x128xf32> -> vector<288x128xf32>
    %27 = arith.addf %22, %26 : vector<288x128xf32>
    %28 = vector.extract_strided_slice %1 {offsets = [20, 0], sizes = [288, 4], strides = [1, 1]} : vector<326x4xf32> to vector<288x4xf32>
    %c5 = arith.constant 5 : index
    %c0_18 = arith.constant 0 : index
    %c0_19 = arith.constant 0 : index
    %29 = vector.load %arg2[%c5, %c0_18, %c0_19] : memref<9x4x128xf32, #tpu.memory_space<vmem>>, vector<1x4x128xf32>
    %30 = vector.shape_cast %29 : vector<1x4x128xf32> to vector<4x128xf32>
    %cst_20 = arith.constant dense<0.000000e+00> : vector<288x128xf32>
    %31 = tpu.matmul %28, %30, %cst_20 {dimension_numbers = #tpu.dot_dimension_numbers<[1], [0], [0], [1], [0, 0, 1, 1], [], []>} : vector<288x4xf32>, vector<4x128xf32>, vector<288x128xf32> -> vector<288x128xf32>
    %32 = arith.addf %27, %31 : vector<288x128xf32>
    %33 = vector.extract_strided_slice %1 {offsets = [36, 0], sizes = [288, 4], strides = [1, 1]} : vector<326x4xf32> to vector<288x4xf32>
    %c6 = arith.constant 6 : index
    %c0_21 = arith.constant 0 : index
    %c0_22 = arith.constant 0 : index
    %34 = vector.load %arg2[%c6, %c0_21, %c0_22] : memref<9x4x128xf32, #tpu.memory_space<vmem>>, vector<1x4x128xf32>
    %35 = vector.shape_cast %34 : vector<1x4x128xf32> to vector<4x128xf32>
    %cst_23 = arith.constant dense<0.000000e+00> : vector<288x128xf32>
    %36 = tpu.matmul %33, %35, %cst_23 {dimension_numbers = #tpu.dot_dimension_numbers<[1], [0], [0], [1], [0, 0, 1, 1], [], []>} : vector<288x4xf32>, vector<4x128xf32>, vector<288x128xf32> -> vector<288x128xf32>
    %37 = arith.addf %32, %36 : vector<288x128xf32>
    %38 = vector.extract_strided_slice %1 {offsets = [37, 0], sizes = [288, 4], strides = [1, 1]} : vector<326x4xf32> to vector<288x4xf32>
    %c7 = arith.constant 7 : index
    %c0_24 = arith.constant 0 : index
    %c0_25 = arith.constant 0 : index
    %39 = vector.load %arg2[%c7, %c0_24, %c0_25] : memref<9x4x128xf32, #tpu.memory_space<vmem>>, vector<1x4x128xf32>
    %40 = vector.shape_cast %39 : vector<1x4x128xf32> to vector<4x128xf32>
    %cst_26 = arith.constant dense<0.000000e+00> : vector<288x128xf32>
    %41 = tpu.matmul %38, %40, %cst_26 {dimension_numbers = #tpu.dot_dimension_numbers<[1], [0], [0], [1], [0, 0, 1, 1], [], []>} : vector<288x4xf32>, vector<4x128xf32>, vector<288x128xf32> -> vector<288x128xf32>
    %42 = arith.addf %37, %41 : vector<288x128xf32>
    %43 = vector.extract_strided_slice %1 {offsets = [38, 0], sizes = [288, 4], strides = [1, 1]} : vector<326x4xf32> to vector<288x4xf32>
    %c8 = arith.constant 8 : index
    %c0_27 = arith.constant 0 : index
    %c0_28 = arith.constant 0 : index
    %44 = vector.load %arg2[%c8, %c0_27, %c0_28] : memref<9x4x128xf32, #tpu.memory_space<vmem>>, vector<1x4x128xf32>
    %45 = vector.shape_cast %44 : vector<1x4x128xf32> to vector<4x128xf32>
    %cst_29 = arith.constant dense<0.000000e+00> : vector<288x128xf32>
    %46 = tpu.matmul %43, %45, %cst_29 {dimension_numbers = #tpu.dot_dimension_numbers<[1], [0], [0], [1], [0, 0, 1, 1], [], []>} : vector<288x4xf32>, vector<4x128xf32>, vector<288x128xf32> -> vector<288x128xf32>
    %47 = arith.addf %42, %46 : vector<288x128xf32>
    %c0_30 = arith.constant 0 : index
    %c0_31 = arith.constant 0 : index
    %c0_32 = arith.constant 0 : index
    %48 = vector.load %arg4[%c0_30, %c0_31, %c0_32] : memref<1x288x128xf32, #tpu.memory_space<vmem>>, vector<1x288x128xf32>
    %49 = vector.shape_cast %48 : vector<1x288x128xf32> to vector<288x128xf32>
    %50 = vector.shape_cast %47 : vector<288x128xf32> to vector<1x288x128xf32>
    tpu.vector_store %arg4[%c0_30, %c0_31, %c0_32], %50 {strides = array<i32>} : memref<1x288x128xf32, #tpu.memory_space<vmem>>, vector<1x288x128xf32>,
    %c0_33 = arith.constant 0 : index
    %c0_34 = arith.constant 0 : index
    %51 = vector.load %arg3[%c0_33, %c0_34] : memref<288x1xf32, #tpu.memory_space<vmem>>, vector<288x1xf32>
    %52 = vector.broadcast %51 : vector<288x1xf32> to vector<288x128xf32>
    %53 = arith.mulf %47, %52 : vector<288x128xf32>
    %cst_35 = arith.constant dense<0.000000e+00> : vector<128xf32>
    %54 = vector.multi_reduction <add>, %53, %cst_35 [0] : vector<288x128xf32> to vector<128xf32>
    %55 = vector.shape_cast %54 : vector<128xf32> to vector<1x128xf32>
    %56 = arith.mulf %47, %47 : vector<288x128xf32>
    %57 = vector.broadcast %51 : vector<288x1xf32> to vector<288x128xf32>
    %58 = arith.mulf %56, %57 : vector<288x128xf32>
    %cst_36 = arith.constant dense<0.000000e+00> : vector<128xf32>
    %59 = vector.multi_reduction <add>, %58, %cst_36 [0] : vector<288x128xf32> to vector<128xf32>
    %60 = vector.shape_cast %59 : vector<128xf32> to vector<1x128xf32>
    %61 = tpu.concatenate %55, %60 in 0 : vector<1x128xf32>, vector<1x128xf32> -> vector<2x128xf32>
    %c0_37 = arith.constant 0 : index
    %c0_38 = arith.constant 0 : index
    %c0_39 = arith.constant 0 : index
    %62 = vector.load %arg5[%c0_37, %c0_38, %c0_39] : memref<1x2x128xf32, #tpu.memory_space<vmem>>, vector<1x2x128xf32>
    %63 = vector.shape_cast %62 : vector<1x2x128xf32> to vector<2x128xf32>
    %64 = vector.shape_cast %61 : vector<2x128xf32> to vector<1x2x128xf32>
    tpu.vector_store %arg5[%c0_37, %c0_38, %c0_39], %64 {strides = array<i32>} : memref<1x2x128xf32, #tpu.memory_space<vmem>>, vector<1x2x128xf32>,
    return
  }
  func.func @transform_0(%arg0: i32) -> (i32, i32, i32) {
    %c0_i32 = arith.constant 0 : i32
    %c0_i32_0 = arith.constant 0 : i32
    %c0_i32_1 = arith.constant 0 : i32
    return %arg0, %c0_i32, %c0_i32_0 : i32, i32, i32
  }
  func.func @transform_1(%arg0: i32) -> (i32, i32, i32) {
    %c0_i32 = arith.constant 0 : i32
    %c0_i32_0 = arith.constant 0 : i32
    %c0_i32_1 = arith.constant 0 : i32
    %c0_i32_2 = arith.constant 0 : i32
    return %c0_i32, %c0_i32_0, %c0_i32_1 : i32, i32, i32
  }
  func.func @transform_2(%arg0: i32) -> (i32, i32) {
    %c0_i32 = arith.constant 0 : i32
    %c0_i32_0 = arith.constant 0 : i32
    %c0_i32_1 = arith.constant 0 : i32
    return %c0_i32, %c0_i32_0 : i32, i32
  }
  func.func @transform_3(%arg0: i32) -> (i32, i32, i32) {
    %c0_i32 = arith.constant 0 : i32
    %c0_i32_0 = arith.constant 0 : i32
    %c0_i32_1 = arith.constant 0 : i32
    return %arg0, %c0_i32, %c0_i32_0 : i32, i32, i32
  }
  func.func @transform_4(%arg0: i32) -> (i32, i32, i32) {
    %c0_i32 = arith.constant 0 : i32
    %c0_i32_0 = arith.constant 0 : i32
    %c0_i32_1 = arith.constant 0 : i32
    return %arg0, %c0_i32, %c0_i32_0 : i32, i32, i32
  }
}

</mosaic_0001>

<bundles_post_ra>
// kernel: tpu_custom_call.1
= control target key start
LH: loop header
LB: loop body
LE: loop exit
PB: predicated region body
PF: predicated region fallthrough
CT: control target
= control target key end

     0   :  { %10 = vsyncpa [#allocation3], 0  ;;  %s5222_s0 = inlined_call_operand.vmem [shape: f32[2,326,4], index: 0, kind: input, shape index: {}]   ;;  %s5223_s1 = inlined_call_operand.vmem [shape: f32[9,4,128], index: 1, kind: input, shape index: {}]   ;;  %s5224_s2 = inlined_call_operand.vmem [shape: f32[288,1], index: 2, kind: input, shape index: {}]   ;;  %s5225_s3 = inlined_call_operand.hbm [shape: f32[2,288,128], index: 3, kind: output, shape index: {0}]   ;;  %s5226_s4 = inlined_call_operand.hbm [shape: f32[2,2,128], index: 4, kind: output, shape index: {1}]  }
   0x1   :  { %12 = vsyncpa [#allocation3 + $0x1], 0 }
   0x2   :  { %13 = vsyncpa [#allocation5], 0 }
   0x3   :  { %15 = vsyncpa [#allocation5 + $0x1], 0  ;;  %s3825_s15 = smov 0   ;;  %s3827_s16 = smov 0  }
   0x4   :  { %s3829_s17 = smov 0   ;;  %s3831_s18 = smov 0  }
   0x5 LB: > { %s3846_s19 = sadd.s32 4294967295, %s3795_s18   ;;  %s3250_s20 = sadd.s32 4294967294, %s3795_s18   ;;  %s3795_s18 = sphi %s3831_s18, %s5254_s18   ;;  %s3791_s17 = sphi %s3829_s17, %s5253_s17   ;;  %s3787_s16 = sphi %s3827_s16, %s5252_s16   ;;  %s3783_s15 = sphi %s3825_s15, %s5251_s15  }
   0x6   : > { %s3850_s21 = sadd.s32 1, %s3795_s18   ;;  %s96_s22 = sadd.s32 1, %s3791_s17 }
   0x7   : > { %s93_s23 = ssub.s32 %s3795_s18, %s3850_s21  ;;  %p106_p0 = scmp.ne.s32.totalorder %s3791_s17, %s3787_s16 }
   0x8   : > { %p94_p1 = scmp.eq.s32.totalorder %s93_s23, 0  ;;  %p107_p2 = scmp.eq.s32.totalorder %s3846_s19, 1 }
   0x9   : > { %p112_p3 = scmp.ne.s32.totalorder %s3787_s16, %s3783_s15  ;;  %p113_p4 = scmp.eq.s32.totalorder %s3250_s20, 1 }
   0xa   : > { %s3861_s24 = scalar_select %p94_p1, %s3791_s17, %s96_s22  }
   0xb   : > { %p3863_p5 = por %p107_p2, %p106_p0  ;;  %p3867_p6 = por %p113_p4, %p112_p3 }
   0xc   : > { %p3253_p7 = scmp.ge.s32.totalorder %s3795_s18, 1  ;;  %p171_p8 = scmp.lt.s32.totalorder %s3795_s18, 3 }
   0xe   : > { %p172_p9 = pnand %p3253_p7, %p171_p8 }
  0x10   : > { %175 = sbr.rel (%p172_p9) target bundleno = 833 (0x341), region = 32 }
  0x15   : > { %v3256_v0 = vld [vmem:[%s5223_s1 + $0x4] sm:$0xf]  ;;  %vm435_vm0 = vcmask 1043456   ;;  %p202_p10 = scmp.lt.s32.totalorder %s3846_s19, 1  ;;  %v3331_v1 = vld [vmem:[%s5223_s1 + $0x8] sm:$0xf] }
  0x16   : > { %3602 = vmatpush.msk.msra.mxu1 %vm435_vm0, %v3256_v0  ;;  %3603 = vmatpush.msk.msra.mxu2 %vm435_vm0, %v3256_v0  ;;  %v3369_v2 = vld [vmem:[%s5223_s1 + $0xc] sm:$0xf]  ;;  %v248_v3 = vld [vmem:[%s5223_s1] sm:$0xf]  ;;  %v3407_v4 = vld [vmem:[%s5223_s1 + $0x10] sm:$0xf] }
  0x17   : > { %s203_s9 = scalar_select %p202_p10, %s3846_s19, 1  ;;  %3604 = vmatpush.msk.msra.mxu3 %vm435_vm0, %v3256_v0  ;;  %3257 = vmatpush.msk.msra.mxu0 %vm435_vm0, %v3256_v0  ;;  %vm288_vm1 = vcmask 1046528   ;;  %vm362_vm2 = vcmask 31744   ;;  %vm766_vm3 = vcmask 1045504   ;;  %vm1254_vm4 = vcmask 1044480  }
  0x18   : > { %3332 = vmatpush.msk.msrb.mxu2 %vm435_vm0, %v3331_v1  ;;  %3294 = vmatpush.msk.msrb.mxu1 %vm435_vm0, %v248_v3  ;;  %vm2053_vm5 = vcmask 1042432   ;;  %vm2365_vm6 = vcmask 1041408   ;;  %s3721_s28 = scalar_lea.hbm %s5225_s3, 576 }
  0x19   : > { %3370 = vmatpush.msk.msrb.mxu3 %vm435_vm0, %v3369_v2  ;;  %s3606_s12 = smul.u32 328, %s203_s9  ;;  %3408 = vmatpush.msk.msrb.mxu0 %vm435_vm0, %v3407_v4  ;;  %s4858_s9 = sand.u32 1, %s3787_s16  }
  0x1a   : > { %s3605_s10 = smul.u32 288, %s4858_s9 }
  0x1b   : > { %s3901_s20 = scalar_lea.vmem %s5222_s0, %s3606_s12  ;;  %s3121_s12 = scalar_lea.sflag [#allocation3], %s4858_s9 }
  0x1c   : > { %v3904_v5 = vld [vmem:[%s3901_s20 + $0x48] sm:$0xff]  ;;  %v3907_v6 = vld [vmem:[%s3901_s20 + $0x50] sm:$0xff]  ;;  %v3915_v10 = vld [vmem:[%s3901_s20 + $0x98] sm:$0xff]  ;;  %s4878_s13 = scalar_lea.vmem [#allocation2], %s3605_s10 }
  0x1d   : > { %v3910_v7 = vld [vmem:[%s3901_s20 + $0x90] sm:$0xff]  ;;  %v306_v8 = vrot.slane %v3904_v5, 1  ;;  %v308_v9 = vrot.slane %v3907_v6, 1  ;;  %v3919_v12 = vld [vmem:[%s3901_s20 + $0xd8] sm:$0xff]  ;;  %v3922_v13 = vld [vmem:[%s3901_s20 + $0xe0] sm:$0xff]  ;;  %v326_v14 = vrot.slane %v3915_v10, 1 }
  0x1e   : > { %v324_v11 = vrot.slane %v3910_v7, 1  ;;  %v342_v15 = vrot.slane %v3919_v12, 1  ;;  %v344_v16 = vrot.slane %v3922_v13, 1  ;;  %v3928_v17 = vld [vmem:[%s3901_s20 + $0x58] sm:$0xff]  ;;  %v3931_v18 = vld [vmem:[%s3901_s20] sm:$0xff]  ;;  %v3940_v21 = vld [vmem:[%s3901_s20 + $0x8] sm:$0xff] }
  0x1f   : > { %v309_v19 = vsel %vm288_vm1, %v306_v8, %v308_v9  ;;  %v3937_v20 = vld [vmem:[%s3901_s20 + $0xa0] sm:$0xff]  ;;  %v289_v22 = vrot.slane %v3931_v18, 1  ;;  %v3944_v23 = vld [vmem:[%s3901_s20 + $0xe8] sm:$0xff]  ;;  %v290_v26 = vrot.slane %v3940_v21, 1  ;;  %v310_v27 = vrot.slane %v3928_v17, 1  ;;  %v3958_v28 = vld [vmem:[%s3901_s20 + $0x10] sm:$0xff] }
  0x20   : > { %3267 = vmatmul.msk.f32.vlgmr.msra.gmra.mxu1 %vm362_vm2, %v309_v19  ;;  %v327_v24 = vsel %vm288_vm1, %v324_v11, %v326_v14  ;;  %v345_v25 = vsel %vm288_vm1, %v342_v15, %v344_v16  ;;  %v328_v29 = vrot.slane %v3937_v20, 1  ;;  %v346_v31 = vrot.slane %v3944_v23, 1  ;;  %v3969_v36 = vld [vmem:[%s3901_s20 + $0x60] sm:$0xff]  ;;  %v3972_v37 = vld [vmem:[%s3901_s20 + $0xa8] sm:$0xff]  ;;  %v3975_v38 = vld [vmem:[%s3901_s20 + $0xf0] sm:$0xff]  ;;  %s3138_s10 = sshll.u32 %s4878_s13, 4  ;;  %s3139_s10 = int_to_ptr.vmem [resolvable:$true] %s3138_s10 }
  0x21   : > { %3276 = vmatmul.msk.f32.vlgmr.msra.gmra.mxu2 %vm362_vm2, %v327_v24  ;;  %3285 = vmatmul.msk.f32.vlgmr.msra.gmra.mxu3 %vm362_vm2, %v345_v25  ;;  %v291_v30 = vsel %vm288_vm1, %v289_v22, %v290_v26  ;;  %v292_v32 = vrot.slane %v3958_v28, 1  ;;  %v311_v33 = vsel %vm288_vm1, %v308_v9, %v310_v27  ;;  %v312_v40 = vrot.slane %v3969_v36, 1  ;;  %v3983_v41 = vld [vmem:[%s3901_s20 + $0x18] sm:$0xff]  ;;  %v3993_v48 = vld [vmem:[%s3901_s20 + $0x68] sm:$0xff]  ;;  %v3996_v49 = vld [vmem:[%s3901_s20 + $0xb0] sm:$0xff] }
  0x22   : > { %3258 = vmatmul.msk.f32.vlgmr.msra.gmra.mxu0 %vm362_vm2, %v291_v30  ;;  %v329_v34 = vsel %vm288_vm1, %v326_v14, %v328_v29  ;;  %v347_v35 = vsel %vm288_vm1, %v344_v16, %v346_v31  ;;  %v330_v42 = vrot.slane %v3972_v37, 1  ;;  %v348_v43 = vrot.slane %v3975_v38, 1  ;;  %v3999_v50 = vld [vmem:[%s3901_s20 + $0xf8] sm:$0xff]  ;;  %v4007_v53 = vld [vmem:[%s3901_s20 + $0x20] sm:$0xff]  ;;  %v4014_v57 = vld [vmem:[%s3901_s20 + $0x88] sm:$0xff] }
  0x23   : > { %v293_v39 = vsel %vm288_vm1, %v290_v26, %v292_v32  ;;  %v294_v44 = vrot.slane %v3983_v41, 1  ;;  %v313_v45 = vsel %vm288_vm1, %v310_v27, %v312_v40  ;;  %v314_v52 = vrot.slane %v3993_v48, 1  ;;  %v4020_v61 = vld [vmem:[%s3901_s20 + $0x70] sm:$0xff]  ;;  %v4023_v62 = vld [vmem:[%s3901_s20 + $0xb8] sm:$0xff]  ;;  %v4026_v63 = vld [vmem:[%s3901_s20 + $0x100] sm:$0xff] }
  0x24   : > { %v331_v46 = vsel %vm288_vm1, %v328_v29, %v330_v42  ;;  %v349_v47 = vsel %vm288_vm1, %v346_v31, %v348_v43  ;;  %v332_v54 = vrot.slane %v3996_v49, 1  ;;  %v350_v55 = vrot.slane %v3999_v50, 1  ;;  %v4035_v3 = vld [vmem:[%s3901_s20 + $0x28] sm:$0xff]  ;;  %v4048_v16 = vld [vmem:[%s3901_s20 + $0xd0] sm:$0xff]  ;;  %v4059_v27 = vld [vmem:[%s3901_s20 + $0xc0] sm:$0xff] }
  0x25   : > { %v295_v51 = vsel %vm288_vm1, %v292_v32, %v294_v44  ;;  %v296_v56 = vrot.slane %v4007_v53, 1  ;;  %v315_v58 = vsel %vm288_vm1, %v312_v40, %v314_v52  ;;  %v322_v0 = vrot.slane %v4014_v57, 1  ;;  %v4062_v29 = vld [vmem:[%s3901_s20 + $0x108] sm:$0xff]  ;;  %v4080_v40 = vld [vmem:[%s3901_s20 + $0x40] sm:$0xff] }
  0x26   : > { %v333_v59 = vsel %vm288_vm1, %v330_v42, %v332_v54  ;;  %v351_v60 = vsel %vm288_vm1, %v348_v43, %v350_v55  ;;  %v316_v2 = vrot.slane %v4020_v61, 1  ;;  %v334_v9 = vrot.slane %v4023_v62, 1  ;;  %v4084_v42 = vld [vmem:[%s3901_s20 + $0x80] sm:$0xff] }
  0x27   : > { %v297_v1 = vsel %vm288_vm1, %v294_v44, %v296_v56  ;;  %v4042_v4 = vsel %vm288_vm1, %v322_v0, %v324_v11  ;;  %v352_v14 = vrot.slane %v4026_v63, 1  ;;  %v298_v19 = vrot.slane %v4035_v3, 1  ;;  %v4055_v11 = vld [vmem:[%s3901_s20 + $0x78] sm:$0xff] }
  0x28   : > { %3268 = vmatmul.msk.f32.gmra.mxu1 %vm362_vm2, %v311_v33  ;;  %v317_v22 = vsel %vm288_vm1, %v314_v52, %v316_v2  ;;  %v335_v24 = vsel %vm288_vm1, %v332_v54, %v334_v9  ;;  %v340_v26 = vrot.slane %v4048_v16, 1  ;;  %v318_v32 = vrot.slane %v4055_v11, 1  ;;  %v4073_v33 = vld [vmem:[%s3901_s20 + $0x30] sm:$0xff]  ;;  %v4099_v54 = vld [vmem:[%s3901_s20 + $0x38] sm:$0xff] }
  0x29   : > { %3277 = vmatmul.msk.f32.gmra.mxu2 %vm362_vm2, %v329_v34  ;;  %3286 = vmatmul.msk.f32.gmra.mxu3 %vm362_vm2, %v347_v35  ;;  %v353_v25 = vsel %vm288_vm1, %v350_v55, %v352_v14  ;;  %v299_v30 = vsel %vm288_vm1, %v296_v56, %v298_v19  ;;  %v336_v34 = vrot.slane %v4059_v27, 1  ;;  %v354_v35 = vrot.slane %v4062_v29, 1  ;;  %v3483_v55 = vld [vmem:[%s5223_s1 + $0x18] sm:$0xf] }
  0x2a   : > { %3259 = vmatmul.msk.f32.gmra.mxu0 %vm362_vm2, %v293_v39  ;;  %v343_v31 = vsel %vm288_vm1, %v340_v26, %v342_v15  ;;  %v300_v39 = vrot.slane %v4073_v33, 1  ;;  %v319_v15 = vsel %vm288_vm1, %v316_v2, %v318_v32  ;;  %3484 = vmatpush.msk.msra.mxu2 %vm435_vm0, %v3483_v55 }
  0x2b   : > { %v337_v43 = vsel %vm288_vm1, %v334_v9, %v336_v34  ;;  %v355_v44 = vsel %vm288_vm1, %v352_v14, %v354_v35 }
  0x2c   : > { %v301_v52 = vsel %vm288_vm1, %v298_v19, %v300_v39  ;;  %v4126_v19 = vld [vmem:[%s3901_s20 + $0x118] sm:$0xff] }
  0x30   : > { %3269 = vmatmul.msk.f32.gmra.mxu1 %vm362_vm2, %v313_v45  ;;  %v4089_v45 = vld [vmem:[%s3901_s20 + $0xc8] sm:$0xff] }
  0x31   : > { %3278 = vmatmul.msk.f32.gmra.mxu2 %vm362_vm2, %v331_v46  ;;  %3287 = vmatmul.msk.f32.gmra.mxu3 %vm362_vm2, %v349_v47  ;;  %v4092_v46 = vld [vmem:[%s3901_s20 + $0x110] sm:$0xff]  ;;  %v304_v47 = vrot.slane %v4080_v40, 1 }
  0x32   : > { %3260 = vmatmul.msk.f32.gmra.mxu0 %vm362_vm2, %v295_v51  ;;  %v320_v51 = vrot.slane %v4084_v42, 1 }
  0x33   : > { %v307_v56 = vsel %vm288_vm1, %v304_v47, %v306_v8  ;;  %v302_v8 = vrot.slane %v4099_v54, 1 }
  0x34   : > { %v321_v2 = vsel %vm288_vm1, %v318_v32, %v320_v51 }
  0x38   : > { %3270 = vmatmul.msk.f32.gmra.mxu1 %vm362_vm2, %v315_v58  ;;  %v3521_v58 = vld [vmem:[%s5223_s1 + $0x1c] sm:$0xf] }
  0x39   : > { %3279 = vmatmul.msk.f32.gmra.mxu2 %vm362_vm2, %v333_v59  ;;  %3288 = vmatmul.msk.f32.gmra.mxu3 %vm362_vm2, %v351_v60  ;;  %v3445_v59 = vld [vmem:[%s5223_s1 + $0x14] sm:$0xf]  ;;  %v338_v60 = vrot.slane %v4089_v45, 1 }
  0x3a   : > { %3261 = vmatmul.msk.f32.gmra.mxu0 %vm362_vm2, %v297_v1  ;;  %v356_v1 = vrot.slane %v4092_v46, 1  ;;  %3522 = vmatpush.msk.msra.mxu3 %vm435_vm0, %v3521_v58  ;;  %v1258_v58 = vrot.slane %v4007_v53, 3 }
  0x3b   : > { %3446 = vmatpush.msk.msra.mxu1 %vm435_vm0, %v3445_v59  ;;  %v339_v9 = vsel %vm288_vm1, %v336_v34, %v338_v60  ;;  %v341_v32 = vsel %vm288_vm1, %v338_v60, %v340_v26  ;;  %v767_v26 = vrot.slane %v3931_v18, 2 }
  0x3c   : > { %v357_v14 = vsel %vm288_vm1, %v354_v35, %v356_v1  ;;  %v4144_v35 = vld [vmem:[%s3901_s20 + $0x120] sm:$0xff] }
  0x40   : > { %3271 = vmatmul.msk.f32.gmra.mxu1 %vm362_vm2, %v317_v22  ;;  %v303_v22 = vsel %vm288_vm1, %v300_v39, %v302_v8  ;;  %v305_v39 = vsel %vm288_vm1, %v302_v8, %v304_v47  ;;  %v772_v47 = vrot.slane %v3983_v41, 2  ;;  %v1260_v8 = vrot.slane %v4035_v3, 3 }
  0x41   : > { %3280 = vmatmul.msk.f32.gmra.mxu2 %vm362_vm2, %v335_v24  ;;  %3289 = vmatmul.msk.f32.gmra.mxu3 %vm362_vm2, %v353_v25  ;;  %v3559_v24 = vld [vmem:[%s5223_s1 + $0x20] sm:$0xf]  ;;  %v358_v25 = vrot.slane %v4126_v19, 1 }
  0x42   : > { %3262 = vmatmul.msk.f32.gmra.mxu0 %vm362_vm2, %v299_v30  ;;  %v323_v30 = vsel %vm288_vm1, %v320_v51, %v322_v0  ;;  %v1255_v51 = vrot.slane %v3958_v28, 3 }
  0x43   : > { %3560 = vmatpush.msk.msra.mxu0 %vm435_vm0, %v3559_v24  ;;  %v359_v34 = vsel %vm288_vm1, %v356_v1, %v358_v25  ;;  %v776_v1 = vrot.slane %v4035_v3, 2 }
  0x48   : > { %3272 = vmatmul.msk.f32.gmra.mxu1 %vm362_vm2, %v319_v15  ;;  %v360_v15 = vrot.slane %v4144_v35, 1 }
  0x49   : > { %3281 = vmatmul.msk.f32.gmra.mxu2 %vm362_vm2, %v337_v43  ;;  %3290 = vmatmul.msk.f32.gmra.mxu3 %vm362_vm2, %v355_v44  ;;  %v768_v43 = vrot.slane %v3940_v21, 2  ;;  %v770_v44 = vrot.slane %v3958_v28, 2 }
  0x4a   : > { %3263 = vmatmul.msk.f32.gmra.mxu0 %vm362_vm2, %v301_v52  ;;  %v361_v0 = vsel %vm288_vm1, %v358_v25, %v360_v15  ;;  %v1256_v52 = vrot.slane %v3983_v41, 3  ;;  %v1264_v25 = vrot.slane %v4099_v54, 3 }
  0x4b   : > { %v771_v59 = vsel %vm766_vm3, %v768_v43, %v770_v44 }
  0x4c   : > { %v1257_v55 = vsel %vm1254_vm4, %v1255_v51, %v1256_v52 }
  0x50   : > { %3273 = vmatmul.msk.f32.gmra.mxu1 %vm362_vm2, %v321_v2 }
  0x51   : > { %3282 = vmatmul.msk.f32.gmra.mxu2 %vm362_vm2, %v339_v9  ;;  %3291 = vmatmul.msk.f32.gmra.mxu3 %vm362_vm2, %v357_v14  ;;  %v1261_v9 = vsel %vm1254_vm4, %v1258_v58, %v1260_v8  ;;  %v1262_v14 = vrot.slane %v4073_v33, 3 }
  0x52   : > { %3264 = vmatmul.msk.f32.gmra.mxu0 %vm362_vm2, %v303_v22 }
  0x53   : > { %v1263_v24 = vsel %vm1254_vm4, %v1260_v8, %v1262_v14 }
  0x58   : > { %3274 = vmatmul.msk.f32.gmra.mxu1 %vm362_vm2, %v323_v30 }
  0x59   : > { %3283 = vmatmul.msk.f32.gmra.mxu2 %vm362_vm2, %v341_v32  ;;  %3292 = vmatmul.msk.f32.gmra.mxu3 %vm362_vm2, %v359_v34  ;;  %v1265_v32 = vsel %vm1254_vm4, %v1262_v14, %v1264_v25  ;;  %v1266_v34 = vrot.slane %v4080_v40, 3 }
  0x5a   : > { %3265 = vmatmul.msk.f32.gmra.mxu0 %vm362_vm2, %v305_v39 }
  0x5b   : > { %v1267_v15 = vsel %vm1254_vm4, %v1264_v25, %v1266_v34  ;;  %v1276_v25 = vrot.slane %v3993_v48, 3 }
  0x60   : > { %3275 = vmatmul.msk.f32.gmra.mxu1 %vm362_vm2, %v4042_v4  ;;  %v769_v4 = vsel %vm766_vm3, %v767_v26, %v768_v43 }
  0x61   : > { %3284 = vmatmul.msk.f32.gmra.mxu2 %vm362_vm2, %v343_v31  ;;  %3293 = vmatmul.msk.f32.gmra.mxu3 %vm362_vm2, %v361_v0  ;;  %v773_v31 = vsel %vm766_vm3, %v770_v44, %v772_v47  ;;  %v1268_v0 = vrot.slane %v3904_v5, 3  ;;  %v1270_v44 = vrot.slane %v3907_v6, 3 }
  0x62   : > { %3266 = vmatmul.msk.f32.gmra.mxu0 %vm362_vm2, %v307_v56  ;;  %v774_v56 = vrot.slane %v4007_v53, 2 }
  0x63   : > { %v1269_v43 = vsel %vm1254_vm4, %v1266_v34, %v1268_v0  ;;  %v794_v34 = vrot.slane %v4020_v61, 2 }
  0x64   : > { %v775_v60 = vsel %vm766_vm3, %v772_v47, %v774_v56  ;;  %v777_v2 = vsel %vm766_vm3, %v774_v56, %v776_v1  ;;  %v1272_v56 = vrot.slane %v3928_v17, 3 }
  0x68   : > { %3295 = vmatmul.msk.f32.vlgmr.msrb.gmra.mxu1 %vm362_vm2, %v3931_v18  ;;  %v1259_v18 = vsel %vm1254_vm4, %v1256_v52, %v1258_v58  ;;  %v1271_v52 = vsel %vm1254_vm4, %v1268_v0, %v1270_v44 }
  0x69   : > { %3333 = vmatmul.msk.f32.vlgmr.msrb.gmra.mxu2 %vm362_vm2, %v769_v4  ;;  %3371 = vmatmul.msk.f32.vlgmr.msrb.gmra.mxu3 %vm362_vm2, %v773_v31  ;;  %v788_v4 = vrot.slane %v3928_v17, 2 }
  0x6a   : > { %3409 = vmatmul.msk.f32.vlgmr.msrb.gmra.mxu0 %vm362_vm2, %v1257_v55 }
  0x70   : > { %3296 = vmatmul.msk.f32.gmra.mxu1 %vm362_vm2, %v3940_v21  ;;  %v778_v21 = vrot.slane %v4073_v33, 2 }
  0x71   : > { %3334 = vmatmul.msk.f32.gmra.mxu2 %vm362_vm2, %v771_v59  ;;  %3372 = vmatmul.msk.f32.gmra.mxu3 %vm362_vm2, %v775_v60 }
  0x72   : > { %3410 = vmatmul.msk.f32.gmra.mxu0 %vm362_vm2, %v1259_v18  ;;  %v779_v22 = vsel %vm766_vm3, %v776_v1, %v778_v21  ;;  %v790_v18 = vrot.slane %v3969_v36, 2 }
  0x78   : > { %3297 = vmatmul.msk.f32.gmra.mxu1 %vm362_vm2, %v3958_v28  ;;  %v780_v28 = vrot.slane %v4099_v54, 2 }
  0x79   : > { %3335 = vmatmul.msk.f32.gmra.mxu2 %vm362_vm2, %v773_v31  ;;  %3373 = vmatmul.msk.f32.gmra.mxu3 %vm362_vm2, %v777_v2 }
  0x7a   : > { %3411 = vmatmul.msk.f32.gmra.mxu0 %vm362_vm2, %v1261_v9  ;;  %v781_v30 = vsel %vm766_vm3, %v778_v21, %v780_v28 }
  0x80   : > { %3298 = vmatmul.msk.f32.gmra.mxu1 %vm362_vm2, %v3983_v41  ;;  %v782_v41 = vrot.slane %v4080_v40, 2 }
  0x81   : > { %3336 = vmatmul.msk.f32.gmra.mxu2 %vm362_vm2, %v775_v60  ;;  %3374 = vmatmul.msk.f32.gmra.mxu3 %vm362_vm2, %v779_v22  ;;  %v1273_v60 = vsel %vm1254_vm4, %v1270_v44, %v1272_v56 }
  0x82   : > { %3412 = vmatmul.msk.f32.gmra.mxu0 %vm362_vm2, %v1263_v24  ;;  %v783_v39 = vsel %vm766_vm3, %v780_v28, %v782_v41 }
  0x88   : > { %3299 = vmatmul.msk.f32.gmra.mxu1 %vm362_vm2, %v4007_v53  ;;  %v784_v53 = vrot.slane %v3904_v5, 2 }
  0x89   : > { %3337 = vmatmul.msk.f32.gmra.mxu2 %vm362_vm2, %v777_v2  ;;  %3375 = vmatmul.msk.f32.gmra.mxu3 %vm362_vm2, %v781_v30  ;;  %v1274_v2 = vrot.slane %v3969_v36, 3 }
  0x8a   : > { %3413 = vmatmul.msk.f32.gmra.mxu0 %vm362_vm2, %v1265_v32  ;;  %v785_v26 = vsel %vm766_vm3, %v782_v41, %v784_v53 }
  0x8b   : > { %v1275_v14 = vsel %vm1254_vm4, %v1272_v56, %v1274_v2  ;;  %v1277_v41 = vsel %vm1254_vm4, %v1274_v2, %v1276_v25 }
  0x90   : > { %3300 = vmatmul.msk.f32.gmra.mxu1 %vm362_vm2, %v4035_v3  ;;  %v786_v3 = vrot.slane %v3907_v6, 2 }
  0x91   : > { %3338 = vmatmul.msk.f32.gmra.mxu2 %vm362_vm2, %v779_v22  ;;  %3376 = vmatmul.msk.f32.gmra.mxu3 %vm362_vm2, %v783_v39  ;;  %v792_v22 = vrot.slane %v3993_v48, 2 }
  0x92   : > { %3414 = vmatmul.msk.f32.gmra.mxu0 %vm362_vm2, %v1267_v15  ;;  %v787_v51 = vsel %vm766_vm3, %v784_v53, %v786_v3  ;;  %v1278_v53 = vrot.slane %v4020_v61, 3 }
  0x98   : > { %3301 = vmatmul.msk.f32.gmra.mxu1 %vm362_vm2, %v4073_v33 }
  0x99   : > { %3339 = vmatmul.msk.f32.gmra.mxu2 %vm362_vm2, %v781_v30  ;;  %3377 = vmatmul.msk.f32.gmra.mxu3 %vm362_vm2, %v785_v26 }
  0x9a   : > { %3415 = vmatmul.msk.f32.gmra.mxu0 %vm362_vm2, %v1269_v43  ;;  %v1279_v43 = vsel %vm1254_vm4, %v1276_v25, %v1278_v53 }
  0x9d   : > { %v4229_v47 = vpop.f32.mrf.mxu1 }
  0x9f   : > { %v4234_v33 = vpop.f32.mrf.mxu0 }
  0xa0   : > { %3302 = vmatmul.msk.f32.gmra.mxu1 %vm362_vm2, %v4099_v54  ;;  %v789_v54 = vsel %vm766_vm3, %v786_v3, %v788_v4  ;;  %v796_v3 = vrot.slane %v4055_v11, 2 }
  0xa1   : > { %3340 = vmatmul.msk.f32.gmra.mxu2 %vm362_vm2, %v783_v39  ;;  %3378 = vmatmul.msk.f32.gmra.mxu3 %vm362_vm2, %v787_v51 }
  0xa2   : > { %3416 = vmatmul.msk.f32.gmra.mxu0 %vm362_vm2, %v1271_v52  ;;  %v1280_v52 = vrot.slane %v4055_v11, 3 }
  0xa4   : > { %v4241_v31 = vpop.f32.mrf.mxu2  ;;  %v4243_v55 = vpop.f32.mrf.mxu3 }
  0xa5   : > { %5229 = vst [vmem:[#allocation8_spill] sm:$0xff] %v4243_v55  ;;  %v4246_v58 = vpop.f32.mrf.mxu1 }
  0xa7   : > { %v4251_v59 = vpop.f32.mrf.mxu0 }
  0xa8   : > { %3303 = vmatmul.msk.f32.gmra.mxu1 %vm362_vm2, %v4080_v40  ;;  %v791_v40 = vsel %vm766_vm3, %v788_v4, %v790_v18 }
  0xa9   : > { %3341 = vmatmul.msk.f32.gmra.mxu2 %vm362_vm2, %v785_v26  ;;  %3379 = vmatmul.msk.f32.gmra.mxu3 %vm362_vm2, %v789_v54 }
  0xaa   : > { %3417 = vmatmul.msk.f32.gmra.mxu0 %vm362_vm2, %v1273_v60  ;;  %v798_v60 = vrot.slane %v4084_v42, 2 }
  0xac   : > { %v4258_v1 = vpop.f32.mrf.mxu2  ;;  %v4260_v8 = vpop.f32.mrf.mxu3 }
  0xad   : > { %5230 = vst [vmem:[#allocation9_spill] sm:$0xff] %v4260_v8  ;;  %v4263_v9 = vpop.f32.mrf.mxu1 }
  0xaf   : > { %v4268_v21 = vpop.f32.mrf.mxu0 }
  0xb0   : > { %3304 = vmatmul.msk.f32.gmra.mxu1 %vm362_vm2, %v3904_v5  ;;  %v793_v5 = vsel %vm766_vm3, %v790_v18, %v792_v22 }
  0xb1   : > { %3342 = vmatmul.msk.f32.gmra.mxu2 %vm362_vm2, %v787_v51  ;;  %3380 = vmatmul.msk.f32.gmra.mxu3 %vm362_vm2, %v791_v40 }
  0xb2   : > { %3418 = vmatmul.msk.f32.gmra.mxu0 %vm362_vm2, %v1275_v14 }
  0xb4   : > { %v4275_v24 = vpop.f32.mrf.mxu2  ;;  %v4277_v28 = vpop.f32.mrf.mxu3 }
  0xb5   : > { %5231 = vst [vmem:[#allocation10_spill] sm:$0xff] %v4277_v28  ;;  %v4280_v30 = vpop.f32.mrf.mxu1 }
  0xb7   : > { %v4285_v32 = vpop.f32.mrf.mxu0 }
  0xb8   : > { %3305 = vmatmul.msk.f32.gmra.mxu1 %vm362_vm2, %v3907_v6  ;;  %v795_v6 = vsel %vm766_vm3, %v792_v22, %v794_v34 }
  0xb9   : > { %3343 = vmatmul.msk.f32.gmra.mxu2 %vm362_vm2, %v789_v54  ;;  %3381 = vmatmul.msk.f32.gmra.mxu3 %vm362_vm2, %v793_v5  ;;  %v1281_v54 = vsel %vm1254_vm4, %v1278_v53, %v1280_v52  ;;  %v1284_v53 = vrot.slane %v4014_v57, 3 }
  0xba   : > { %3419 = vmatmul.msk.f32.gmra.mxu0 %vm362_vm2, %v1277_v41 }
  0xbc   : > { %v4292_v39 = vpop.f32.mrf.mxu2  ;;  %v4294_v15 = vpop.f32.mrf.mxu3 }
  0xbd   : > { %5232 = vst [vmem:[#allocation11_spill] sm:$0xff] %v4294_v15  ;;  %v4297_v0 = vpop.f32.mrf.mxu1 }
  0xbf   : > { %v4302_v26 = vpop.f32.mrf.mxu0 }
  0xc0   : > { %3306 = vmatmul.msk.f32.gmra.mxu1 %vm362_vm2, %v3928_v17  ;;  %v797_v17 = vsel %vm766_vm3, %v794_v34, %v796_v3 }
  0xc1   : > { %3344 = vmatmul.msk.f32.gmra.mxu2 %vm362_vm2, %v791_v40  ;;  %3382 = vmatmul.msk.f32.gmra.mxu3 %vm362_vm2, %v795_v6  ;;  %v1282_v40 = vrot.slane %v4084_v42, 3 }
  0xc2   : > { %3420 = vmatmul.msk.f32.gmra.mxu0 %vm362_vm2, %v1279_v43 }
  0xc3   : > { %v1283_v25 = vsel %vm1254_vm4, %v1280_v52, %v1282_v40  ;;  %v802_v52 = vrot.slane %v3910_v7, 2 }
  0xc4   : > { %v4309_v44 = vpop.f32.mrf.mxu2  ;;  %v4311_v51 = vpop.f32.mrf.mxu3 }
  0xc5   : > { %5233 = vst [vmem:[#allocation12_spill] sm:$0xff] %v4311_v51  ;;  %v4314_v4 = vpop.f32.mrf.mxu1 }
  0xc7   : > { %v4319_v56 = vpop.f32.mrf.mxu0 }
  0xc8   : > { %3307 = vmatmul.msk.f32.gmra.mxu1 %vm362_vm2, %v3969_v36  ;;  %v799_v36 = vsel %vm766_vm3, %v796_v3, %v798_v60  ;;  %v1285_v3 = vsel %vm1254_vm4, %v1282_v40, %v1284_v53 }
  0xc9   : > { %3345 = vmatmul.msk.f32.gmra.mxu2 %vm362_vm2, %v793_v5  ;;  %3383 = vmatmul.msk.f32.gmra.mxu3 %vm362_vm2, %v797_v17  ;;  %v800_v5 = vrot.slane %v4014_v57, 2 }
  0xca   : > { %3421 = vmatmul.msk.f32.gmra.mxu0 %vm362_vm2, %v1281_v54 }
  0xcc   : > { %v4326_v18 = vpop.f32.mrf.mxu2  ;;  %v4328_v2 = vpop.f32.mrf.mxu3 }
  0xcd   : > { %5234 = vst [vmem:[#allocation13_spill] sm:$0xff] %v4328_v2  ;;  %v4331_v14 = vpop.f32.mrf.mxu1 }
  0xcf   : > { %v4336_v22 = vpop.f32.mrf.mxu0 }
  0xd0   : > { %3308 = vmatmul.msk.f32.gmra.mxu1 %vm362_vm2, %v3993_v48  ;;  %v801_v48 = vsel %vm766_vm3, %v798_v60, %v800_v5  ;;  %v1286_v60 = vrot.slane %v3910_v7, 3 }
  0xd1   : > { %3346 = vmatmul.msk.f32.gmra.mxu2 %vm362_vm2, %v795_v6  ;;  %3384 = vmatmul.msk.f32.gmra.mxu3 %vm362_vm2, %v799_v36 }
  0xd2   : > { %3422 = vmatmul.msk.f32.gmra.mxu0 %vm362_vm2, %v1283_v25  ;;  %v1287_v40 = vsel %vm1254_vm4, %v1284_v53, %v1286_v60 }
  0xd4   : > { %v4343_v41 = vpop.f32.mrf.mxu2  ;;  %v4345_v34 = vpop.f32.mrf.mxu3 }
  0xd5   : > { %5235 = vst [vmem:[#allocation14_spill] sm:$0xff] %v4345_v34  ;;  %v4348_v43 = vpop.f32.mrf.mxu1 }
  0xd7   : > { %v4353_v6 = vpop.f32.mrf.mxu0 }
  0xd8   : > { %3309 = vmatmul.msk.f32.gmra.mxu1 %vm362_vm2, %v4020_v61  ;;  %v803_v61 = vsel %vm766_vm3, %v800_v5, %v802_v52  ;;  %v1288_v5 = vrot.slane %v3915_v10, 3 }
  0xd9   : > { %3347 = vmatmul.msk.f32.gmra.mxu2 %vm362_vm2, %v797_v17  ;;  %3385 = vmatmul.msk.f32.gmra.mxu3 %vm362_vm2, %v801_v48 }
  0xda   : > { %3423 = vmatmul.msk.f32.gmra.mxu0 %vm362_vm2, %v1285_v3  ;;  %v804_v3 = vrot.slane %v3915_v10, 2 }
  0xdc   : > { %v4360_v54 = vpop.f32.mrf.mxu2  ;;  %v4362_v25 = vpop.f32.mrf.mxu3 }
  0xdd   : > { %5236 = vst [vmem:[#allocation15_spill] sm:$0xff] %v4360_v54  ;;  %v4365_v34 = vpop.f32.mrf.mxu1 }
  0xde   : > { %5237 = vst [vmem:[#allocation16_spill] sm:$0xff] %v4362_v25 }
  0xdf   : > { %v4370_v17 = vpop.f32.mrf.mxu0 }
  0xe0   : > { %3310 = vmatmul.msk.f32.gmra.mxu1 %vm362_vm2, %v4055_v11  ;;  %v805_v11 = vsel %vm766_vm3, %v802_v52, %v804_v3  ;;  %v1290_v52 = vrot.slane %v3937_v20, 3 }
  0xe1   : > { %3348 = vmatmul.msk.f32.gmra.mxu2 %vm362_vm2, %v799_v36  ;;  %3386 = vmatmul.msk.f32.gmra.mxu3 %vm362_vm2, %v803_v61  ;;  %v1289_v36 = vsel %vm1254_vm4, %v1286_v60, %v1288_v5 }
  0xe2   : > { %3424 = vmatmul.msk.f32.gmra.mxu0 %vm362_vm2, %v1287_v40  ;;  %v806_v40 = vrot.slane %v3937_v20, 2  ;;  %v1291_v60 = vsel %vm1254_vm4, %v1288_v5, %v1290_v52 }
  0xe4   : > { %v4377_v25 = vpop.f32.mrf.mxu2  ;;  %v4379_v2 = vpop.f32.mrf.mxu3 }
  0xe5   : > { %5238 = vst [vmem:[#allocation17_spill] sm:$0xff] %v4377_v25  ;;  %v656_v51 = vpop.f32.mrf.mxu1 }
  0xe6   : > { %5239 = vst [vmem:[#allocation18_spill] sm:$0xff] %v4379_v2  ;;  %v657_v15 = vadd.f32 %v656_v51, %v4234_v33  ;;  %v808_v33 = vrot.slane %v3972_v37, 2 }
  0xe7   : > { %v1420_v53 = vpop.f32.mrf.mxu0 }
  0xe8   : > { %3311 = vmatmul.msk.f32.gmra.mxu1 %vm362_vm2, %v4084_v42  ;;  %v807_v42 = vsel %vm766_vm3, %v804_v3, %v806_v40  ;;  %v809_v3 = vsel %vm766_vm3, %v806_v40, %v808_v33 }
  0xe9   : > { %3349 = vmatmul.msk.f32.gmra.mxu2 %vm362_vm2, %v801_v48  ;;  %3387 = vmatmul.msk.f32.gmra.mxu3 %vm362_vm2, %v805_v11 }
  0xea   : > { %3425 = vmatmul.msk.f32.gmra.mxu0 %vm362_vm2, %v1289_v36 }
  0xec   : > { %v932_v2 = vpop.f32.mrf.mxu2  ;;  %v1108_v28 = vpop.f32.mrf.mxu3 }
  0xed   : > { %v1040_v8 = vadd.f32 %v932_v2, %v657_v15  ;;  %v659_v55 = vpop.f32.mrf.mxu1 }
  0xee   : > { %v660_v15 = vadd.f32 %v659_v55, %v4251_v59  ;;  %v810_v55 = vrot.slane %v3996_v49, 2 }
  0xef   : > { %v1216_v25 = vadd.f32 %v1108_v28, %v1040_v8  ;;  %v1423_v48 = vpop.f32.mrf.mxu0  ;;  %v1292_v28 = vrot.slane %v3972_v37, 3 }
  0xf0   : > { %3312 = vmatmul.msk.f32.gmra.mxu1 %vm362_vm2, %v4014_v57 }
  0xf1   : > { %v4396_v54 = vadd.f32 %v1420_v53, %v1216_v25  ;;  %3350 = vmatmul.msk.f32.gmra.mxu2 %vm362_vm2, %v803_v61  ;;  %3388 = vmatmul.msk.f32.gmra.mxu3 %vm362_vm2, %v807_v42  ;;  %v1293_v5 = vsel %vm1254_vm4, %v1290_v52, %v1292_v28  ;;  %v811_v52 = vsel %vm766_vm3, %v808_v33, %v810_v55 }
  0xf2   : > { %3426 = vmatmul.msk.f32.gmra.mxu0 %vm362_vm2, %v1291_v60  ;;  %v1294_v60 = vrot.slane %v3996_v49, 3 }
  0xf4   : > { %v935_v51 = vpop.f32.mrf.mxu2  ;;  %v1111_v8 = vpop.f32.mrf.mxu3 }
  0xf5   : > { %v1041_v57 = vadd.f32 %v935_v51, %v660_v15  ;;  %v662_v2 = vpop.f32.mrf.mxu1  ;;  %v1295_v51 = vsel %vm1254_vm4, %v1292_v28, %v1294_v60 }
  0xf6   : > { %v663_v59 = vadd.f32 %v662_v2, %v4268_v21  ;;  %v812_v21 = vrot.slane %v4023_v62, 2 }
  0xf7   : > { %v1217_v25 = vadd.f32 %v1111_v8, %v1041_v57  ;;  %v1426_v61 = vpop.f32.mrf.mxu0 }
  0xf8   : > { %3313 = vmatmul.msk.f32.gmra.mxu1 %vm362_vm2, %v3910_v7  ;;  %v813_v28 = vsel %vm766_vm3, %v810_v55, %v812_v21 }
  0xf9   : > { %v4408_v53 = vadd.f32 %v1423_v48, %v1217_v25  ;;  %3351 = vmatmul.msk.f32.gmra.mxu2 %vm362_vm2, %v805_v11  ;;  %3389 = vmatmul.msk.f32.gmra.mxu3 %vm362_vm2, %v809_v3  ;;  %v1296_v25 = vrot.slane %v4023_v62, 3 }
  0xfa   : > { %3427 = vmatmul.msk.f32.gmra.mxu0 %vm362_vm2, %v1293_v5 }
  0xfc   : > { %v938_v36 = vpop.f32.mrf.mxu2  ;;  %v1114_v40 = vpop.f32.mrf.mxu3 }
  0xfd   : > { %v1042_v7 = vadd.f32 %v938_v36, %v663_v59  ;;  %v665_v15 = vpop.f32.mrf.mxu1  ;;  %v1297_v59 = vsel %vm1254_vm4, %v1294_v60, %v1296_v25 }
  0xfe   : > { %v666_v57 = vadd.f32 %v665_v15, %v4285_v32  ;;  %v814_v32 = vrot.slane %v4059_v27, 2  ;;  %v1298_v15 = vrot.slane %v4059_v27, 3 }
  0xff   : > { %v1218_v48 = vadd.f32 %v1114_v40, %v1042_v7  ;;  %v1429_v11 = vpop.f32.mrf.mxu0 }
 0x100   : > { %3314 = vmatmul.msk.f32.gmra.mxu1 %vm362_vm2, %v3915_v10  ;;  %v815_v60 = vsel %vm766_vm3, %v812_v21, %v814_v32 }
 0x101   : > { %v4420_v8 = vadd.f32 %v1426_v61, %v1218_v48  ;;  %3352 = vmatmul.msk.f32.gmra.mxu2 %vm362_vm2, %v807_v42  ;;  %3390 = vmatmul.msk.f32.gmra.mxu3 %vm362_vm2, %v811_v52 }
 0x102   : > { %3428 = vmatmul.msk.f32.gmra.mxu0 %vm362_vm2, %v1295_v51  ;;  %v1299_v51 = vsel %vm1254_vm4, %v1296_v25, %v1298_v15 }
 0x104   : > { %v941_v33 = vpop.f32.mrf.mxu2  ;;  %v1117_v2 = vpop.f32.mrf.mxu3 }
 0x105   : > { %v1043_v10 = vadd.f32 %v941_v33, %v666_v57  ;;  %v668_v5 = vpop.f32.mrf.mxu1 }
 0x106   : > { %v669_v40 = vadd.f32 %v668_v5, %v4302_v26  ;;  %v816_v26 = vrot.slane %v4089_v45, 2 }
 0x107   : > { %v1219_v61 = vadd.f32 %v1117_v2, %v1043_v10  ;;  %v1432_v42 = vpop.f32.mrf.mxu0  ;;  %v1300_v10 = vrot.slane %v4089_v45, 3 }
 0x108   : > { %3315 = vmatmul.msk.f32.gmra.mxu1 %vm362_vm2, %v3937_v20  ;;  %v817_v25 = vsel %vm766_vm3, %v814_v32, %v816_v26 }
 0x109   : > { %v4432_v36 = vadd.f32 %v1429_v11, %v1219_v61  ;;  %3353 = vmatmul.msk.f32.gmra.mxu2 %vm362_vm2, %v809_v3  ;;  %3391 = vmatmul.msk.f32.gmra.mxu3 %vm362_vm2, %v813_v28 }
 0x10a   : > { %3429 = vmatmul.msk.f32.gmra.mxu0 %vm362_vm2, %v1297_v59 }
 0x10c   : > { %v944_v55 = vpop.f32.mrf.mxu2  ;;  %v1120_v7 = vpop.f32.mrf.mxu3 }
 0x10d   : > { %v1044_v20 = vadd.f32 %v944_v55, %v669_v40  ;;  %v671_v48 = vpop.f32.mrf.mxu1 }
 0x10e   : > { %v672_v33 = vadd.f32 %v671_v48, %v4319_v56  ;;  %v818_v56 = vrot.slane %v4048_v16, 2 }
 0x10f   : > { %v1220_v11 = vadd.f32 %v1120_v7, %v1044_v20  ;;  %v1435_v3 = vpop.f32.mrf.mxu0  ;;  %v1302_v7 = vrot.slane %v4048_v16, 3 }
 0x110   : > { %3316 = vmatmul.msk.f32.gmra.mxu1 %vm362_vm2, %v3972_v37 }
 0x111   : > { %v4444_v57 = vadd.f32 %v1432_v42, %v1220_v11  ;;  %3354 = vmatmul.msk.f32.gmra.mxu2 %vm362_vm2, %v811_v52  ;;  %3392 = vmatmul.msk.f32.gmra.mxu3 %vm362_vm2, %v815_v60  ;;  %v1301_v42 = vsel %vm1254_vm4, %v1298_v15, %v1300_v10  ;;  %v819_v15 = vsel %vm766_vm3, %v816_v26, %v818_v56 }
 0x112   : > { %3430 = vmatmul.msk.f32.gmra.mxu0 %vm362_vm2, %v1299_v51  ;;  %v1303_v11 = vsel %vm1254_vm4, %v1300_v10, %v1302_v7 }
 0x114   : > { %v947_v21 = vpop.f32.mrf.mxu2  ;;  %v1123_v2 = vpop.f32.mrf.mxu3 }
 0x115   : > { %v1045_v37 = vadd.f32 %v947_v21, %v672_v33  ;;  %v674_v5 = vpop.f32.mrf.mxu1  ;;  %v1304_v21 = vrot.slane %v3919_v12, 3 }
 0x116   : > { %v675_v40 = vadd.f32 %v674_v5, %v4336_v22  ;;  %v820_v22 = vrot.slane %v3919_v12, 2 }
 0x117   : > { %v1221_v61 = vadd.f32 %v1123_v2, %v1045_v37  ;;  %v1438_v52 = vpop.f32.mrf.mxu0  ;;  %v1305_v5 = vsel %vm1254_vm4, %v1302_v7, %v1304_v21 }
 0x118   : > { %3317 = vmatmul.msk.f32.gmra.mxu1 %vm362_vm2, %v3996_v49  ;;  %v821_v10 = vsel %vm766_vm3, %v818_v56, %v820_v22 }
 0x119   : > { %v4456_v59 = vadd.f32 %v1435_v3, %v1221_v61  ;;  %3355 = vmatmul.msk.f32.gmra.mxu2 %vm362_vm2, %v813_v28  ;;  %3393 = vmatmul.msk.f32.gmra.mxu3 %vm362_vm2, %v817_v25 }
 0x11a   : > { %3431 = vmatmul.msk.f32.gmra.mxu0 %vm362_vm2, %v1301_v42 }
 0x11c   : > { %v950_v32 = vpop.f32.mrf.mxu2  ;;  %v1126_v55 = vpop.f32.mrf.mxu3 }
 0x11d   : > { %v1046_v49 = vadd.f32 %v950_v32, %v675_v40  ;;  %v677_v20 = vpop.f32.mrf.mxu1  ;;  %v1306_v40 = vrot.slane %v3922_v13, 3 }
 0x11e   : > { %v678_v51 = vadd.f32 %v677_v20, %v4353_v6  ;;  %v822_v6 = vrot.slane %v3922_v13, 2 }
 0x11f   : > { %v1222_v48 = vadd.f32 %v1126_v55, %v1046_v49  ;;  %v1441_v28 = vpop.f32.mrf.mxu0  ;;  %v1307_v49 = vsel %vm1254_vm4, %v1304_v21, %v1306_v40 }
 0x120   : > { %3318 = vmatmul.msk.f32.gmra.mxu1 %vm362_vm2, %v4023_v62  ;;  %v823_v55 = vsel %vm766_vm3, %v820_v22, %v822_v6 }
 0x121   : > { %v4468_v3 = vadd.f32 %v1438_v52, %v1222_v48  ;;  %3356 = vmatmul.msk.f32.gmra.mxu2 %vm362_vm2, %v815_v60  ;;  %3394 = vmatmul.msk.f32.gmra.mxu3 %vm362_vm2, %v819_v15 }
 0x122   : > { %3432 = vmatmul.msk.f32.gmra.mxu0 %vm362_vm2, %v1303_v11  ;;  %v1308_v11 = vrot.slane %v3944_v23, 3 }
 0x124   : > { %v953_v26 = vpop.f32.mrf.mxu2  ;;  %v1129_v33 = vpop.f32.mrf.mxu3 }
 0x125   : > { %v1047_v62 = vadd.f32 %v953_v26, %v678_v51  ;;  %v680_v2 = vpop.f32.mrf.mxu1 }
 0x126   : > { %v681_v52 = vadd.f32 %v680_v2, %v4370_v17  ;;  %v824_v17 = vrot.slane %v3944_v23, 2 }
 0x127   : > { %v1223_v37 = vadd.f32 %v1129_v33, %v1047_v62  ;;  %v1444_v60 = vpop.f32.mrf.mxu0  ;;  %v1309_v33 = vsel %vm1254_vm4, %v1306_v40, %v1308_v11 }
 0x128   : > { %3319 = vmatmul.msk.f32.gmra.mxu1 %vm362_vm2, %v4059_v27  ;;  %v825_v51 = vsel %vm766_vm3, %v822_v6, %v824_v17 }
 0x129   : > { %v4480_v61 = vadd.f32 %v1441_v28, %v1223_v37  ;;  %3357 = vmatmul.msk.f32.gmra.mxu2 %vm362_vm2, %v817_v25  ;;  %3395 = vmatmul.msk.f32.gmra.mxu3 %vm362_vm2, %v821_v10  ;;  %v1310_v37 = vrot.slane %v3975_v38, 3 }
 0x12a   : > { %3433 = vmatmul.msk.f32.gmra.mxu0 %vm362_vm2, %v1305_v5 }
 0x12c   : > { %v956_v42 = vpop.f32.mrf.mxu2  ;;  %v1132_v56 = vpop.f32.mrf.mxu3 }
 0x12d   : > { %v1048_v27 = vadd.f32 %v956_v42, %v681_v52  ;;  %v683_v32 = vpop.f32.mrf.mxu1  ;;  %v1311_v52 = vsel %vm1254_vm4, %v1308_v11, %v1310_v37  ;;  %v1314_v11 = vrot.slane %v4026_v63, 3 }
 0x12e   : > { %v684_v13 = vadd.f32 %v683_v32, %v4229_v47  ;;  %v826_v47 = vrot.slane %v3975_v38, 2  ;;  %v828_v38 = vrot.slane %v3999_v50, 2 }
 0x12f   : > { %v1224_v7 = vadd.f32 %v1132_v56, %v1048_v27  ;;  %v1447_v25 = vpop.f32.mrf.mxu0 }
 0x130   : > { %3320 = vmatmul.msk.f32.gmra.mxu1 %vm362_vm2, %v4089_v45  ;;  %v827_v5 = vsel %vm766_vm3, %v824_v17, %v826_v47 }
 0x131   : > { %v4492_v20 = vadd.f32 %v1444_v60, %v1224_v7  ;;  %3358 = vmatmul.msk.f32.gmra.mxu2 %vm362_vm2, %v819_v15  ;;  %3396 = vmatmul.msk.f32.gmra.mxu3 %vm362_vm2, %v823_v55  ;;  %v829_v7 = vsel %vm766_vm3, %v826_v47, %v828_v38 }
 0x132   : > { %3434 = vmatmul.msk.f32.gmra.mxu0 %vm362_vm2, %v1307_v49  ;;  %v3658_v49 = vld [vmem:[%s3901_s20 + $0xe0] sm:$0xff] }
 0x134   : > { %v959_v48 = vpop.f32.mrf.mxu2  ;;  %v1135_v28 = vpop.f32.mrf.mxu3 }
 0x135   : > { %v1049_v45 = vadd.f32 %v959_v48, %v684_v13  ;;  %v686_v22 = vpop.f32.mrf.mxu1 }
 0x136   : > { %v687_v23 = vadd.f32 %v686_v22, %v4246_v58 }
 0x137   : > { %v1225_v26 = vadd.f32 %v1135_v28, %v1049_v45  ;;  %v1450_v15 = vpop.f32.mrf.mxu0 }
 0x138   : > { %3321 = vmatmul.msk.f32.gmra.mxu1 %vm362_vm2, %v4048_v16 }
 0x139   : > { %v4504_v21 = vadd.f32 %v1447_v25, %v1225_v26  ;;  %3359 = vmatmul.msk.f32.gmra.mxu2 %vm362_vm2, %v821_v10  ;;  %3397 = vmatmul.msk.f32.gmra.mxu3 %vm362_vm2, %v825_v51 }
 0x13a   : > { %3435 = vmatmul.msk.f32.gmra.mxu0 %vm362_vm2, %v1309_v33  ;;  %v3659_v33 = vld [vmem:[%s3901_s20 + $0xe8] sm:$0xff] }
 0x13c   : > { %v962_v62 = vpop.f32.mrf.mxu2  ;;  %v1138_v2 = vpop.f32.mrf.mxu3 }
 0x13d   : > { %v1050_v16 = vadd.f32 %v962_v62, %v687_v23  ;;  %v689_v60 = vpop.f32.mrf.mxu1 }
 0x13e   : > { %v690_v58 = vadd.f32 %v689_v60, %v4263_v9 }
 0x13f   : > { %v1226_v6 = vadd.f32 %v1138_v2, %v1050_v16  ;;  %v1453_v10 = vpop.f32.mrf.mxu0 }
 0x140   : > { %3322 = vmatmul.msk.f32.gmra.mxu1 %vm362_vm2, %v3919_v12  ;;  %v1312_v12 = vrot.slane %v3999_v50, 3  ;;  %v830_v50 = vrot.slane %v4026_v63, 2  ;;  %v832_v63 = vrot.slane %v4062_v29, 2 }
 0x141   : > { %v4516_v42 = vadd.f32 %v1450_v15, %v1226_v6  ;;  %3360 = vmatmul.msk.f32.gmra.mxu2 %vm362_vm2, %v823_v55  ;;  %3398 = vmatmul.msk.f32.gmra.mxu3 %vm362_vm2, %v827_v5 }
 0x142   : > { %3436 = vmatmul.msk.f32.gmra.mxu0 %vm362_vm2, %v1311_v52  ;;  %v1313_v17 = vsel %vm1254_vm4, %v1310_v37, %v1312_v12  ;;  %v831_v26 = vsel %vm766_vm3, %v828_v38, %v830_v50  ;;  %v1315_v47 = vsel %vm1254_vm4, %v1312_v12, %v1314_v11  ;;  %v1316_v37 = vrot.slane %v4062_v29, 3  ;;  %v3660_v52 = vld [vmem:[%s3901_s20 + $0xf0] sm:$0xff] }
 0x143   : > { %v833_v6 = vsel %vm766_vm3, %v830_v50, %v832_v63  ;;  %v834_v29 = vrot.slane %v4092_v46, 2  ;;  %v1318_v12 = vrot.slane %v4092_v46, 3 }
 0x144   : > { %v965_v56 = vpop.f32.mrf.mxu2  ;;  %v1141_v40 = vpop.f32.mrf.mxu3  ;;  %v1317_v38 = vsel %vm1254_vm4, %v1314_v11, %v1316_v37  ;;  %v1320_v11 = vrot.slane %v4126_v19, 3 }
 0x145   : > { %v1051_v27 = vadd.f32 %v965_v56, %v690_v58  ;;  %v692_v32 = vpop.f32.mrf.mxu1 }
 0x146   : > { %v693_v9 = vadd.f32 %v692_v32, %v4280_v30 }
 0x147   : > { %v1227_v25 = vadd.f32 %v1141_v40, %v1051_v27  ;;  %v1456_v55 = vpop.f32.mrf.mxu0 }
 0x148   : > { %3323 = vmatmul.msk.f32.gmra.mxu1 %vm362_vm2, %v3658_v49 }
 0x149   : > { %v4528_v13 = vadd.f32 %v1453_v10, %v1227_v25  ;;  %3361 = vmatmul.msk.f32.gmra.mxu2 %vm362_vm2, %v825_v51  ;;  %3399 = vmatmul.msk.f32.gmra.mxu3 %vm362_vm2, %v829_v7  ;;  %v835_v25 = vsel %vm766_vm3, %v832_v63, %v834_v29  ;;  %v838_v63 = vrot.slane %v4144_v35, 2 }
 0x14a   : > { %3437 = vmatmul.msk.f32.gmra.mxu0 %vm362_vm2, %v1313_v17  ;;  %v1319_v17 = vsel %vm1254_vm4, %v1316_v37, %v1318_v12  ;;  %v1322_v37 = vrot.slane %v4144_v35, 3 }
 0x14c   : > { %v968_v48 = vpop.f32.mrf.mxu2  ;;  %v1144_v28 = vpop.f32.mrf.mxu3 }
 0x14d   : > { %v1052_v45 = vadd.f32 %v968_v48, %v693_v9  ;;  %v695_v22 = vpop.f32.mrf.mxu1 }
 0x14e   : > { %v696_v30 = vadd.f32 %v695_v22, %v4297_v0 }
 0x14f   : > { %v1228_v15 = vadd.f32 %v1144_v28, %v1052_v45  ;;  %v1459_v51 = vpop.f32.mrf.mxu0 }
 0x150   : > { %3324 = vmatmul.msk.f32.gmra.mxu1 %vm362_vm2, %v3659_v33 }
 0x151   : > { %v4540_v23 = vadd.f32 %v1456_v55, %v1228_v15  ;;  %3362 = vmatmul.msk.f32.gmra.mxu2 %vm362_vm2, %v827_v5  ;;  %3400 = vmatmul.msk.f32.gmra.mxu3 %vm362_vm2, %v831_v26  ;;  %v3661_v55 = vld [vmem:[%s3901_s20 + $0xf8] sm:$0xff] }
 0x152   : > { %3438 = vmatmul.msk.f32.gmra.mxu0 %vm362_vm2, %v1315_v47  ;;  %v1321_v47 = vsel %vm1254_vm4, %v1318_v12, %v1320_v11 }
 0x154   : > { %v971_v62 = vpop.f32.mrf.mxu2  ;;  %v1147_v2 = vpop.f32.mrf.mxu3 }
 0x155   : > { %v1053_v16 = vadd.f32 %v971_v62, %v696_v30  ;;  %v698_v60 = vpop.f32.mrf.mxu1 }
 0x156   : > { %v699_v0 = vadd.f32 %v698_v60, %v4314_v4  ;;  %v836_v4 = vrot.slane %v4126_v19, 2 }
 0x157   : > { %v1229_v10 = vadd.f32 %v1147_v2, %v1053_v16  ;;  %v1462_v5 = vpop.f32.mrf.mxu0 }
 0x158   : > { %3325 = vmatmul.msk.f32.gmra.mxu1 %vm362_vm2, %v3660_v52  ;;  %v837_v15 = vsel %vm766_vm3, %v834_v29, %v836_v4  ;;  %v1323_v29 = vsel %vm1254_vm4, %v1320_v11, %v1322_v37 }
 0x159   : > { %v4552_v58 = vadd.f32 %v1459_v51, %v1229_v10  ;;  %3363 = vmatmul.msk.f32.gmra.mxu2 %vm362_vm2, %v829_v7  ;;  %3401 = vmatmul.msk.f32.gmra.mxu3 %vm362_vm2, %v833_v6  ;;  %v3662_v51 = vld [vmem:[%s3901_s20 + $0x100] sm:$0xff]  ;;  %v839_v10 = vsel %vm766_vm3, %v836_v4, %v838_v63 }
 0x15a   : > { %3439 = vmatmul.msk.f32.gmra.mxu0 %vm362_vm2, %v1317_v38  ;;  %v3663_v38 = vld [vmem:[%s3901_s20 + $0x108] sm:$0xff] }
 0x15c   : > { %v974_v56 = vpop.f32.mrf.mxu2  ;;  %v1150_v40 = vpop.f32.mrf.mxu3 }
 0x15d   : > { %v1054_v27 = vadd.f32 %v974_v56, %v699_v0  ;;  %v701_v32 = vpop.f32.mrf.mxu1 }
 0x15e   : > { %v702_v9 = vadd.f32 %v701_v32, %v4331_v14 }
 0x15f   : > { %v1230_v49 = vadd.f32 %v1150_v40, %v1054_v27  ;;  %v1465_v7 = vpop.f32.mrf.mxu0 }
 0x160   : > { %3326 = vmatmul.msk.f32.gmra.mxu1 %vm362_vm2, %v3661_v55 }
 0x161   : > { %v4564_v50 = vadd.f32 %v1462_v5, %v1230_v49  ;;  %3364 = vmatmul.msk.f32.gmra.mxu2 %vm362_vm2, %v831_v26  ;;  %3402 = vmatmul.msk.f32.gmra.mxu3 %vm362_vm2, %v835_v25  ;;  %v244_v5 = vld [vmem:[%s3901_s20 + $0x128] sm:$0xff] }
 0x162   : > { %3440 = vmatmul.msk.f32.gmra.mxu0 %vm362_vm2, %v1319_v17  ;;  %v1080_v35 = vrot.slane %v244_v5, 2  ;;  %v1324_v12 = vrot.slane %v244_v5, 3 }
 0x164   : > { %v977_v48 = vpop.f32.mrf.mxu2  ;;  %v1153_v28 = vpop.f32.mrf.mxu3  ;;  %v1081_v49 = vsel %vm766_vm3, %v838_v63, %v1080_v35  ;;  %v1325_v17 = vsel %vm1254_vm4, %v1322_v37, %v1324_v12  ;;  %v3664_v63 = vld [vmem:[%s3901_s20 + $0x10] sm:$0xff]  ;;  %v3666_v37 = vld [vmem:[%s3901_s20 + $0x20] sm:$0xff] }
 0x165   : > { %v1055_v45 = vadd.f32 %v977_v48, %v702_v9  ;;  %v704_v22 = vpop.f32.mrf.mxu1  ;;  %v2054_v5 = vrot.slane %v3666_v37, 5 }
 0x166   : > { %v705_v30 = vadd.f32 %v704_v22, %v4348_v43 }
 0x167   : > { %v1231_v33 = vadd.f32 %v1153_v28, %v1055_v45  ;;  %v1468_v26 = vpop.f32.mrf.mxu0 }
 0x168   : > { %3327 = vmatmul.msk.f32.gmra.mxu1 %vm362_vm2, %v3662_v51  ;;  %v3797_v51 = vmov 0  }
 0x169   : > { %v4576_v14 = vadd.f32 %v1465_v7, %v1231_v33  ;;  %3365 = vmatmul.msk.f32.gmra.mxu2 %vm362_vm2, %v833_v6  ;;  %3403 = vmatmul.msk.f32.gmra.mxu3 %vm362_vm2, %v837_v15  ;;  %v245_v7 = vld [vmem:[%s3901_s20 + $0x130] sm:$0xff] }
 0x16a   : > { %3441 = vmatmul.msk.f32.gmra.mxu0 %vm362_vm2, %v1321_v47  ;;  %v1326_v11 = vrot.slane %v245_v7, 3  ;;  %3655 = vset.pattern.permute.xlu0 %v3797_v51 }
 0x16b   : > { %3656 = vset.pattern.permute.xlu1 %v3797_v51  ;;  %3657 = vset.pattern.permute.xlu2 %v3797_v51 }
 0x16c   : > { %v980_v62 = vpop.f32.mrf.mxu2  ;;  %v1156_v2 = vpop.f32.mrf.mxu3 }
 0x16d   : > { %v1056_v16 = vadd.f32 %v980_v62, %v705_v30  ;;  %v707_v60 = vpop.f32.mrf.mxu1  ;;  %v1566_v30 = vrot.slane %v3664_v63, 4  ;;  %v3665_v62 = vld [vmem:[%s3901_s20 + $0x18] sm:$0xff] }
 0x16e   : > { %v708_v0 = vadd.f32 %v707_v60, %v4365_v34  ;;  %v1082_v34 = vrot.slane %v245_v7, 2  ;;  %v3667_v60 = vld [vmem:[%s3901_s20 + $0x28] sm:$0xff] }
 0x16f   : > { %v1232_v52 = vadd.f32 %v1156_v2, %v1056_v16  ;;  %v1471_v6 = vpop.f32.mrf.mxu0  ;;  %v1567_v2 = vrot.slane %v3665_v62, 4  ;;  %v1569_v16 = vrot.slane %v3666_v37, 4 }
 0x170   : > { %3328 = vmatmul.msk.f32.gmra.mxu1 %vm362_vm2, %v3663_v38  ;;  %v1083_v22 = vsel %vm766_vm3, %v1080_v35, %v1082_v34  ;;  %v2367_v35 = vrot.slane %v3667_v60, 6 }
 0x171   : > { %v4589_v43 = vadd.f32 %v1468_v26, %v1232_v52  ;;  %3366 = vmatmul.msk.f32.gmra.mxu2 %vm362_vm2, %v835_v25  ;;  %3404 = vmatmul.msk.f32.gmra.mxu3 %vm362_vm2, %v839_v10  ;;  %v1327_v26 = vsel %vm1254_vm4, %v1324_v12, %v1326_v11  ;;  %v1571_v52 = vrot.slane %v3667_v60, 4 }
 0x172   : > { %3442 = vmatmul.msk.f32.gmra.mxu0 %vm362_vm2, %v1323_v29  ;;  %v2366_v29 = vrot.slane %v3666_v37, 6 }
 0x173   : > { %v1572_v12 = vsel %vm435_vm0, %v1569_v16, %v1571_v52 }
 0x174   : > { %v983_v56 = vpop.f32.mrf.mxu2  ;;  %v1159_v40 = vpop.f32.mrf.mxu3 }
 0x175   : > { %v1057_v27 = vadd.f32 %v983_v56, %v708_v0  ;;  %v710_v32 = vpop.f32.mrf.mxu1 }
 0x176   : > { %v711_v9 = vadd.f32 %v710_v32, %v4241_v31  ;;  %v2711_v31 = vld [vmem:[%s5224_s2] sm:$0xff] }
 0x177   : > { %v1233_v55 = vadd.f32 %v1159_v40, %v1057_v27  ;;  %v1474_v25 = vpop.f32.mrf.mxu0  ;;  %2749 = vperm.xlu0 %3655, %v2711_v31   ;;  %v1568_v40 = vsel %vm435_vm0, %v1566_v30, %v1567_v2  ;;  %v3669_v30 = vld [vmem:[%s3901_s20 + $0x38] sm:$0xff] }
 0x178   : > { %3329 = vmatmul.msk.f32.gmra.mxu1 %vm362_vm2, %v4092_v46  ;;  %v1575_v62 = vrot.slane %v3669_v30, 4 }
 0x179   : > { %v4600_v4 = vadd.f32 %v1471_v6, %v1233_v55  ;;  %3367 = vmatmul.msk.f32.gmra.mxu2 %vm362_vm2, %v837_v15  ;;  %3405 = vmatmul.msk.f32.gmra.mxu3 %vm362_vm2, %v1081_v49  ;;  %v2368_v55 = vsel %vm2365_vm6, %v2366_v29, %v2367_v35  ;;  %v2714_v29 = vld [vmem:[%s5224_s2 + $0x18] sm:$0xff] }
 0x17a   : > { %3443 = vmatmul.msk.f32.gmra.mxu0 %vm362_vm2, %v1325_v17 }
 0x17c   : > { %v986_v48 = vpop.f32.mrf.mxu2  ;;  %v1162_v28 = vpop.f32.mrf.mxu3 }
 0x17d   : > { %v1058_v45 = vadd.f32 %v986_v48, %v711_v9  ;;  %v713_v46 = vpop.f32.mrf.mxu1 }
 0x17e   : > { %v714_v38 = vadd.f32 %v713_v46, %v4258_v1  ;;  %v2712_v1 = vld [vmem:[%s5224_s2 + $0x8] sm:$0xff] }
 0x17f   : > { %v1234_v33 = vadd.f32 %v1162_v28, %v1058_v45  ;;  %v1477_v15 = vpop.f32.mrf.mxu0  ;;  %2754 = vperm.xlu0 %3655, %v2712_v1  }
 0x180   : > { %3330 = vmatmul.msk.f32.gmra.mxu1 %vm362_vm2, %v4126_v19  ;;  %v2055_v19 = vrot.slane %v3667_v60, 5 }
 0x181   : > { %v4613_v47 = vadd.f32 %v1474_v25, %v1234_v33  ;;  %3368 = vmatmul.msk.f32.gmra.mxu2 %vm362_vm2, %v839_v10  ;;  %3406 = vmatmul.msk.f32.gmra.mxu3 %vm362_vm2, %v1083_v22  ;;  %v3668_v25 = vld [vmem:[%s3901_s20 + $0x30] sm:$0xff]  ;;  %v1570_v22 = vsel %vm435_vm0, %v1567_v2, %v1569_v16  ;;  %v2059_v2 = vrot.slane %v3669_v30, 5 }
 0x182   : > { %3444 = vmatmul.msk.f32.gmra.mxu0 %vm362_vm2, %v1327_v26  ;;  %v2056_v27 = vsel %vm2053_vm5, %v2054_v5, %v2055_v19  ;;  %v1573_v17 = vrot.slane %v3668_v25, 4  ;;  %v2057_v34 = vrot.slane %v3668_v25, 5  ;;  %v2369_v11 = vrot.slane %v3668_v25, 6 }
 0x184   : > { %v989_v6 = vpop.f32.mrf.mxu2  ;;  %v1165_v10 = vpop.f32.mrf.mxu3  ;;  %v1574_v33 = vsel %vm435_vm0, %v1571_v52, %v1573_v17  ;;  %v2058_v51 = vsel %vm2053_vm5, %v2055_v19, %v2057_v34  ;;  %v2370_v26 = vsel %vm2365_vm6, %v2367_v35, %v2369_v11  ;;  %v2371_v52 = vrot.slane %v3669_v30, 6 }
 0x185   : > { %v1059_v0 = vadd.f32 %v989_v6, %v714_v38  ;;  %v716_v56 = vpop.f32.mrf.mxu1  ;;  %v1576_v38 = vsel %vm435_vm0, %v1573_v17, %v1575_v62  ;;  %v2060_v6 = vsel %vm2053_vm5, %v2057_v34, %v2059_v2 }
 0x186   : > { %v717_v9 = vadd.f32 %v716_v56, %v4275_v24  ;;  %v2372_v35 = vsel %vm2365_vm6, %v2369_v11, %v2371_v52  ;;  %v3670_v56 = vld [vmem:[%s3901_s20 + $0x40] sm:$0xff] }
 0x187   : > { %v1235_v32 = vadd.f32 %v1165_v10, %v1059_v0  ;;  %v1480_v49 = vpop.f32.mrf.mxu0 }
 0x188   : > { %3447 = vmatmul.msk.f32.vlgmr.msra.gmra.mxu1 %vm362_vm2, %v1568_v40  ;;  %v1577_v40 = vrot.slane %v3670_v56, 4 }
 0x189   : > { %v4631_v7 = vadd.f32 %v1477_v15, %v1235_v32  ;;  %3485 = vmatmul.msk.f32.vlgmr.msra.gmra.mxu2 %vm362_vm2, %v1572_v12  ;;  %3523 = vmatmul.msk.f32.vlgmr.msra.gmra.mxu3 %vm362_vm2, %v2056_v27  ;;  %v2713_v15 = vld [vmem:[%s5224_s2 + $0x10] sm:$0xff]  ;;  %v2061_v27 = vrot.slane %v3670_v56, 5 }
 0x18a   : > { %3561 = vmatmul.msk.f32.vlgmr.msra.gmra.mxu0 %vm362_vm2, %v2368_v55  ;;  %2759 = vperm.xlu1 %3656, %v2713_v15   ;;  %v1578_v17 = vsel %vm435_vm0, %v1575_v62, %v1577_v40 }
 0x18b   : > { %v2062_v34 = vsel %vm2053_vm5, %v2059_v2, %v2061_v27 }
 0x18c   : > { %v992_v48 = vpop.f32.mrf.mxu2  ;;  %v1168_v28 = vpop.f32.mrf.mxu3 }
 0x18d   : > { %v1060_v45 = vadd.f32 %v992_v48, %v717_v9  ;;  %v719_v46 = vpop.f32.mrf.mxu1 }
 0x18e   : > { %v720_v37 = vadd.f32 %v719_v46, %v4292_v39 }
 0x18f   : > { %v1236_v31 = vadd.f32 %v1168_v28, %v1060_v45  ;;  %v1483_v24 = vpop.f32.mrf.mxu0 }
 0x190   : > { %3448 = vmatmul.msk.f32.gmra.mxu1 %vm362_vm2, %v1570_v22 }
 0x191   : > { %v4646_v63 = vadd.f32 %v1480_v49, %v1236_v31  ;;  %3486 = vmatmul.msk.f32.gmra.mxu2 %vm362_vm2, %v1574_v33  ;;  %3524 = vmatmul.msk.f32.gmra.mxu3 %vm362_vm2, %v2058_v51  ;;  %v2373_v49 = vrot.slane %v3670_v56, 6 }
 0x192   : > { %3562 = vmatmul.msk.f32.gmra.mxu0 %vm362_vm2, %v2370_v26  ;;  %2764 = vperm.xlu1 %3656, %v2714_v29  }
 0x193   : > { %v2374_v28 = vsel %vm2365_vm6, %v2371_v52, %v2373_v49 }
 0x194   : > { %v995_v16 = vpop.f32.mrf.mxu2  ;;  %v1171_v60 = vpop.f32.mrf.mxu3 }
 0x195   : > { %v1061_v5 = vadd.f32 %v995_v16, %v720_v37  ;;  %v722_v19 = vpop.f32.mrf.mxu1 }
 0x196   : > { %v723_v32 = vadd.f32 %v722_v19, %v4309_v44  ;;  %v3671_v44 = vld [vmem:[%s3901_s20 + $0x48] sm:$0xff] }
 0x197   : > { %v1237_v10 = vadd.f32 %v1171_v60, %v1061_v5  ;;  %v1486_v39 = vpop.f32.mrf.mxu0  ;;  %v1579_v45 = vrot.slane %v3671_v44, 4  ;;  %v2063_v46 = vrot.slane %v3671_v44, 5 }
 0x198   : > { %3449 = vmatmul.msk.f32.gmra.mxu1 %vm362_vm2, %v1572_v12 }
 0x199   : > { %v4660_v0 = vadd.f32 %v1483_v24, %v1237_v10  ;;  %3487 = vmatmul.msk.f32.gmra.mxu2 %vm362_vm2, %v1576_v38  ;;  %3525 = vmatmul.msk.f32.gmra.mxu3 %vm362_vm2, %v2060_v6  ;;  %v1580_v26 = vsel %vm435_vm0, %v1577_v40, %v1579_v45  ;;  %v2064_v30 = vsel %vm2053_vm5, %v2061_v27, %v2063_v46  ;;  %v2717_v40 = vld [vmem:[%s5224_s2 + $0x30] sm:$0xff] }
 0x19a   : > { %3563 = vmatmul.msk.f32.gmra.mxu0 %vm362_vm2, %v2372_v35  ;;  %2779 = vperm.xlu0 %3655, %v2717_v40   ;;  %v3675_v40 = vld [vmem:[%s3901_s20 + $0x68] sm:$0xff] }
 0x19c   : > { %v998_v1 = vpop.f32.mrf.mxu2  ;;  %v1174_v12 = vpop.f32.mrf.mxu3 }
 0x19d   : > { %v1062_v55 = vadd.f32 %v998_v1, %v723_v32  ;;  %v725_v25 = vpop.f32.mrf.mxu1  ;;  %v3673_v1 = vld [vmem:[%s3901_s20 + $0x58] sm:$0xff] }
 0x19e   : > { %v726_v22 = vadd.f32 %v725_v25, %v4326_v18  ;;  %v3672_v18 = vld [vmem:[%s3901_s20 + $0x50] sm:$0xff] }
 0x19f   : > { %v1238_v9 = vadd.f32 %v1174_v12, %v1062_v55  ;;  %v1489_v48 = vpop.f32.mrf.mxu0  ;;  %v1581_v60 = vrot.slane %v3672_v18, 4  ;;  %v2065_v52 = vrot.slane %v3672_v18, 5  ;;  %v1583_v12 = vrot.slane %v3673_v1, 4  ;;  %v5240_v55 = vld [vmem:[#allocation15_spill] sm:$0xff] }
 0x1a0   : > { %3450 = vmatmul.msk.f32.gmra.mxu1 %vm362_vm2, %v1574_v33  ;;  %v2375_v33 = vrot.slane %v3671_v44, 6 }
 0x1a1   : > { %v4671_v11 = vadd.f32 %v1486_v39, %v1238_v9  ;;  %3488 = vmatmul.msk.f32.gmra.mxu2 %vm362_vm2, %v1578_v17  ;;  %3526 = vmatmul.msk.f32.gmra.mxu3 %vm362_vm2, %v2062_v34  ;;  %v1582_v39 = vsel %vm435_vm0, %v1579_v45, %v1581_v60  ;;  %v2066_v35 = vsel %vm2053_vm5, %v2063_v46, %v2065_v52 }
 0x1a2   : > { %3564 = vmatmul.msk.f32.gmra.mxu0 %vm362_vm2, %v2374_v28  ;;  %v2376_v37 = vsel %vm2365_vm6, %v2373_v49, %v2375_v33  ;;  %v2067_v49 = vrot.slane %v3673_v1, 5  ;;  %v1584_v44 = vsel %vm435_vm0, %v1581_v60, %v1583_v12 }
 0x1a4   : > { %v1001_v51 = vpop.f32.mrf.mxu2  ;;  %v1177_v31 = vpop.f32.mrf.mxu3  ;;  %v2068_v45 = vsel %vm2053_vm5, %v2065_v52, %v2067_v49 }
 0x1a5   : > { %v1063_v15 = vadd.f32 %v1001_v51, %v726_v22  ;;  %v728_v24 = vpop.f32.mrf.mxu1  ;;  %v2715_v22 = vld [vmem:[%s5224_s2 + $0x20] sm:$0xff]  ;;  %v2718_v51 = vld [vmem:[%s5224_s2 + $0x38] sm:$0xff] }
 0x1a6   : > { %v729_v5 = vadd.f32 %v728_v24, %v4343_v41  ;;  %2769 = vperm.xlu2 %3657, %v2715_v22   ;;  %v3674_v24 = vld [vmem:[%s3901_s20 + $0x60] sm:$0xff]  ;;  %2784 = vperm.xlu1 %3656, %v2718_v51   ;;  %v3676_v51 = vld [vmem:[%s3901_s20 + $0x70] sm:$0xff] }
 0x1a7   : > { %v1239_v62 = vadd.f32 %v1177_v31, %v1063_v15  ;;  %v1492_v2 = vpop.f32.mrf.mxu0  ;;  %v2381_v60 = vrot.slane %v3674_v24, 6 }
 0x1a8   : > { %3451 = vmatmul.msk.f32.gmra.mxu1 %vm362_vm2, %v1576_v38  ;;  %v2377_v38 = vrot.slane %v3672_v18, 6 }
 0x1a9   : > { %v4682_v16 = vadd.f32 %v1489_v48, %v1239_v62  ;;  %3489 = vmatmul.msk.f32.gmra.mxu2 %vm362_vm2, %v1580_v26  ;;  %3527 = vmatmul.msk.f32.gmra.mxu3 %vm362_vm2, %v2064_v30  ;;  %v1585_v30 = vrot.slane %v3674_v24, 4  ;;  %v2069_v62 = vrot.slane %v3674_v24, 5  ;;  %v5243_v24 = vld [vmem:[#allocation9_spill] sm:$0xff] }
 0x1aa   : > { %3565 = vmatmul.msk.f32.gmra.mxu0 %vm362_vm2, %v2376_v37  ;;  %v2378_v27 = vsel %vm2365_vm6, %v2375_v33, %v2377_v38 }
 0x1ac   : > { %v1004_v19 = vpop.f32.mrf.mxu2  ;;  %v1180_v6 = vpop.f32.mrf.mxu3 }
 0x1ad   : > { %v1064_v10 = vadd.f32 %v1004_v19, %v729_v5  ;;  %v731_v29 = vpop.f32.mrf.mxu1  ;;  %v1586_v19 = vsel %vm435_vm0, %v1583_v12, %v1585_v30 }
 0x1ae   : > { %v732_v25 = vadd.f32 %v731_v29, %v5240_v55  ;;  %v2383_v55 = vrot.slane %v3675_v40, 6 }
 0x1af   : > { %v1240_v56 = vadd.f32 %v1180_v6, %v1064_v10  ;;  %v1495_v41 = vpop.f32.mrf.mxu0  ;;  %v2070_v6 = vsel %vm2053_vm5, %v2067_v49, %v2069_v62  ;;  %v2716_v10 = vld [vmem:[%s5224_s2 + $0x28] sm:$0xff] }
 0x1b0   : > { %3452 = vmatmul.msk.f32.gmra.mxu1 %vm362_vm2, %v1578_v17  ;;  %v2379_v17 = vrot.slane %v3673_v1, 6  ;;  %2774 = vperm.xlu2 %3657, %v2716_v10   ;;  %v5242_v1 = vld [vmem:[#allocation8_spill] sm:$0xff] }
 0x1b1   : > { %v4696_v32 = vadd.f32 %v1492_v2, %v1240_v56  ;;  %3490 = vmatmul.msk.f32.gmra.mxu2 %vm362_vm2, %v1582_v39  ;;  %3528 = vmatmul.msk.f32.gmra.mxu3 %vm362_vm2, %v2066_v35  ;;  %v5241_v2 = vld [vmem:[#allocation17_spill] sm:$0xff] }
 0x1b2   : > { %3566 = vmatmul.msk.f32.gmra.mxu0 %vm362_vm2, %v2378_v27  ;;  %v2380_v33 = vsel %vm2365_vm6, %v2377_v38, %v2379_v17  ;;  %v2382_v35 = vsel %vm2365_vm6, %v2379_v17, %v2381_v60  ;;  %v2071_v27 = vrot.slane %v3675_v40, 5 }
 0x1b4   : > { %v1007_v34 = vpop.f32.mrf.mxu2  ;;  %v1183_v9 = vpop.f32.mrf.mxu3  ;;  %v2072_v17 = vsel %vm2053_vm5, %v2069_v62, %v2071_v27 }
 0x1b5   : > { %v1065_v48 = vadd.f32 %v1007_v34, %v732_v25  ;;  %v734_v28 = vpop.f32.mrf.mxu1 }
 0x1b6   : > { %v735_v37 = vadd.f32 %v734_v28, %v5241_v2  ;;  %v2720_v28 = vld [vmem:[%s5224_s2 + $0x48] sm:$0xff]  ;;  %v2385_v2 = vrot.slane %v3676_v51, 6 }
 0x1b7   : > { %v1241_v46 = vadd.f32 %v1183_v9, %v1065_v48  ;;  %v1498_v31 = vpop.f32.mrf.mxu0  ;;  %2794 = vperm.xlu0 %3655, %v2720_v28  }
 0x1b8   : > { %3453 = vmatmul.msk.f32.gmra.mxu1 %vm362_vm2, %v1580_v26 }
 0x1b9   : > { %v4713_v15 = vadd.f32 %v1495_v41, %v1241_v46  ;;  %3491 = vmatmul.msk.f32.gmra.mxu2 %vm362_vm2, %v1584_v44  ;;  %3529 = vmatmul.msk.f32.gmra.mxu3 %vm362_vm2, %v2068_v45  ;;  %v1587_v41 = vrot.slane %v3675_v40, 4  ;;  %v2384_v46 = vsel %vm2365_vm6, %v2381_v60, %v2383_v55 }
 0x1ba   : > { %3567 = vmatmul.msk.f32.gmra.mxu0 %vm362_vm2, %v2380_v33  ;;  %v2073_v33 = vrot.slane %v3676_v51, 5 }
 0x1bb   : > { %v1588_v9 = vsel %vm435_vm0, %v1585_v30, %v1587_v41 }
 0x1bc   : > { %v1010_v18 = vpop.f32.mrf.mxu2  ;;  %v1186_v26 = vpop.f32.mrf.mxu3  ;;  %v2074_v60 = vsel %vm2053_vm5, %v2071_v27, %v2073_v33 }
 0x1bd   : > { %v1066_v52 = vadd.f32 %v1010_v18, %v735_v37  ;;  %v737_v5 = vpop.f32.mrf.mxu1 }
 0x1be   : > { %v738_v12 = vadd.f32 %v737_v5, %v5242_v1  ;;  %v2721_v5 = vld [vmem:[%s5224_s2 + $0x50] sm:$0xff] }
 0x1bf   : > { %v1242_v38 = vadd.f32 %v1186_v26, %v1066_v52  ;;  %v1501_v29 = vpop.f32.mrf.mxu0  ;;  %2799 = vperm.xlu1 %3656, %v2721_v5  }
 0x1c0   : > { %3454 = vmatmul.msk.f32.gmra.mxu1 %vm362_vm2, %v1582_v39 }
 0x1c1   : > { %v4727_v56 = vadd.f32 %v1498_v31, %v1242_v38  ;;  %3492 = vmatmul.msk.f32.gmra.mxu2 %vm362_vm2, %v1586_v19  ;;  %3530 = vmatmul.msk.f32.gmra.mxu3 %vm362_vm2, %v2070_v6  ;;  %v1589_v31 = vrot.slane %v3676_v51, 4  ;;  %v2386_v38 = vsel %vm2365_vm6, %v2383_v55, %v2385_v2 }
 0x1c2   : > { %3568 = vmatmul.msk.f32.gmra.mxu0 %vm362_vm2, %v2382_v35 }
 0x1c3   : > { %v1590_v26 = vsel %vm435_vm0, %v1587_v41, %v1589_v31  ;;  %v5244_v41 = vld [vmem:[#allocation10_spill] sm:$0xff] }
 0x1c4   : > { %v1013_v49 = vpop.f32.mrf.mxu2  ;;  %v1189_v39 = vpop.f32.mrf.mxu3 }
 0x1c5   : > { %v1067_v25 = vadd.f32 %v1013_v49, %v738_v12  ;;  %v740_v34 = vpop.f32.mrf.mxu1 }
 0x1c6   : > { %v741_v30 = vadd.f32 %v740_v34, %v5243_v24 }
 0x1c7   : > { %v1243_v48 = vadd.f32 %v1189_v39, %v1067_v25  ;;  %v1504_v45 = vpop.f32.mrf.mxu0 }
 0x1c8   : > { %3455 = vmatmul.msk.f32.gmra.mxu1 %vm362_vm2, %v1584_v44 }
 0x1c9   : > { %v4741_v22 = vadd.f32 %v1501_v29, %v1243_v48  ;;  %3493 = vmatmul.msk.f32.gmra.mxu2 %vm362_vm2, %v1588_v9  ;;  %3531 = vmatmul.msk.f32.gmra.mxu3 %vm362_vm2, %v2072_v17  ;;  %v3677_v29 = vld [vmem:[%s3901_s20 + $0x78] sm:$0xff]  ;;  %v2719_v17 = vld [vmem:[%s5224_s2 + $0x40] sm:$0xff] }
 0x1ca   : > { %3569 = vmatmul.msk.f32.gmra.mxu0 %vm362_vm2, %v2384_v46  ;;  %v1591_v35 = vrot.slane %v3677_v29, 4  ;;  %v2075_v40 = vrot.slane %v3677_v29, 5  ;;  %v2387_v12 = vrot.slane %v3677_v29, 6  ;;  %2789 = vperm.xlu2 %3657, %v2719_v17   ;;  %v3678_v46 = vld [vmem:[%s3901_s20 + $0x80] sm:$0xff]  ;;  %v3679_v29 = vld [vmem:[%s3901_s20 + $0x88] sm:$0xff] }
 0x1cb   : > { %v1593_v51 = vrot.slane %v3678_v46, 4  ;;  %v2724_v17 = vld [vmem:[%s5224_s2 + $0x68] sm:$0xff] }
 0x1cc   : > { %v1016_v62 = vpop.f32.mrf.mxu2  ;;  %v1192_v44 = vpop.f32.mrf.mxu3  ;;  %v1592_v55 = vsel %vm435_vm0, %v1589_v31, %v1591_v35  ;;  %v2076_v25 = vsel %vm2053_vm5, %v2073_v33, %v2075_v40  ;;  %v2388_v28 = vsel %vm2365_vm6, %v2385_v2, %v2387_v12  ;;  %v2077_v31 = vrot.slane %v3678_v46, 5  ;;  %v5245_v33 = vld [vmem:[#allocation11_spill] sm:$0xff]  ;;  %2814 = vperm.xlu1 %3656, %v2724_v17  }
 0x1cd   : > { %v1068_v37 = vadd.f32 %v1016_v62, %v741_v30  ;;  %v743_v18 = vpop.f32.mrf.mxu1  ;;  %v2389_v62 = vrot.slane %v3678_v46, 6 }
 0x1ce   : > { %v744_v27 = vadd.f32 %v743_v18, %v5244_v41  ;;  %v2078_v18 = vsel %vm2053_vm5, %v2075_v40, %v2077_v31  ;;  %v2079_v40 = vrot.slane %v3679_v29, 5  ;;  %v5246_v41 = vld [vmem:[#allocation12_spill] sm:$0xff] }
 0x1cf   : > { %v1244_v52 = vadd.f32 %v1192_v44, %v1068_v37  ;;  %v1507_v6 = vpop.f32.mrf.mxu0  ;;  %v1594_v37 = vsel %vm435_vm0, %v1591_v35, %v1593_v51  ;;  %v1595_v35 = vrot.slane %v3679_v29, 4 }
 0x1d0   : > { %3456 = vmatmul.msk.f32.gmra.mxu1 %vm362_vm2, %v1586_v19 }
 0x1d1   : > { %v4755_v10 = vadd.f32 %v1504_v45, %v1244_v52  ;;  %3494 = vmatmul.msk.f32.gmra.mxu2 %vm362_vm2, %v1590_v26  ;;  %3532 = vmatmul.msk.f32.gmra.mxu3 %vm362_vm2, %v2074_v60  ;;  %v2723_v52 = vld [vmem:[%s5224_s2 + $0x60] sm:$0xff] }
 0x1d2   : > { %3570 = vmatmul.msk.f32.gmra.mxu0 %vm362_vm2, %v2386_v38  ;;  %2809 = vperm.xlu0 %3655, %v2723_v52  }
 0x1d4   : > { %v1019_v1 = vpop.f32.mrf.mxu2  ;;  %v1195_v19 = vpop.f32.mrf.mxu3 }
 0x1d5   : > { %v1069_v49 = vadd.f32 %v1019_v1, %v744_v27  ;;  %v746_v39 = vpop.f32.mrf.mxu1 }
 0x1d6   : > { %v747_v24 = vadd.f32 %v746_v39, %v5245_v33  ;;  %v1596_v39 = vsel %vm435_vm0, %v1593_v51, %v1595_v35  ;;  %v3680_v51 = vld [vmem:[%s3901_s20 + $0x90] sm:$0xff] }
 0x1d7   : > { %v1245_v34 = vadd.f32 %v1195_v19, %v1069_v49  ;;  %v1510_v48 = vpop.f32.mrf.mxu0  ;;  %v2391_v19 = vrot.slane %v3679_v29, 6  ;;  %v1597_v33 = vrot.slane %v3680_v51, 4 }
 0x1d8   : > { %3457 = vmatmul.msk.f32.gmra.mxu1 %vm362_vm2, %v1588_v9 }
 0x1d9   : > { %v4769_v45 = vadd.f32 %v1507_v6, %v1245_v34  ;;  %3495 = vmatmul.msk.f32.gmra.mxu2 %vm362_vm2, %v1592_v55  ;;  %3533 = vmatmul.msk.f32.gmra.mxu3 %vm362_vm2, %v2076_v25  ;;  %v2390_v6 = vsel %vm2365_vm6, %v2387_v12, %v2389_v62  ;;  %v2080_v25 = vsel %vm2053_vm5, %v2077_v31, %v2079_v40  ;;  %v2081_v31 = vrot.slane %v3680_v51, 5 }
 0x1da   : > { %3571 = vmatmul.msk.f32.gmra.mxu0 %vm362_vm2, %v2388_v28  ;;  %v2392_v28 = vsel %vm2365_vm6, %v2389_v62, %v2391_v19 }
 0x1dc   : > { %v1022_v30 = vpop.f32.mrf.mxu2  ;;  %v1198_v9 = vpop.f32.mrf.mxu3 }
 0x1dd   : > { %v1070_v44 = vadd.f32 %v1022_v30, %v747_v24  ;;  %v749_v2 = vpop.f32.mrf.mxu1  ;;  %v5247_v24 = vld [vmem:[#allocation13_spill] sm:$0xff] }
 0x1de   : > { %v750_v27 = vadd.f32 %v749_v2, %v5246_v41 }
 0x1df   : > { %v1246_v60 = vadd.f32 %v1198_v9, %v1070_v44  ;;  %v1513_v5 = vpop.f32.mrf.mxu0  ;;  %v2393_v44 = vrot.slane %v3680_v51, 6 }
 0x1e0   : > { %3458 = vmatmul.msk.f32.gmra.mxu1 %vm362_vm2, %v1590_v26 }
 0x1e1   : > { %v4783_v38 = vadd.f32 %v1510_v48, %v1246_v60  ;;  %3496 = vmatmul.msk.f32.gmra.mxu2 %vm362_vm2, %v1594_v37  ;;  %3534 = vmatmul.msk.f32.gmra.mxu3 %vm362_vm2, %v2078_v18  ;;  %v1598_v18 = vsel %vm435_vm0, %v1595_v35, %v1597_v33  ;;  %v2082_v60 = vsel %vm2053_vm5, %v2079_v40, %v2081_v31  ;;  %v3681_v35 = vld [vmem:[%s3901_s20 + $0x98] sm:$0xff] }
 0x1e2   : > { %3572 = vmatmul.msk.f32.gmra.mxu0 %vm362_vm2, %v2390_v6  ;;  %v2394_v29 = vsel %vm2365_vm6, %v2391_v19, %v2393_v44  ;;  %v2083_v40 = vrot.slane %v3681_v35, 5 }
 0x1e4   : > { %v1025_v1 = vpop.f32.mrf.mxu2  ;;  %v1201_v26 = vpop.f32.mrf.mxu3  ;;  %v2084_v17 = vsel %vm2053_vm5, %v2081_v31, %v2083_v40 }
 0x1e5   : > { %v1071_v49 = vadd.f32 %v1025_v1, %v750_v27  ;;  %v752_v12 = vpop.f32.mrf.mxu1  ;;  %v1599_v27 = vrot.slane %v3681_v35, 4  ;;  %v5248_v1 = vld [vmem:[#allocation14_spill] sm:$0xff] }
 0x1e6   : > { %v753_v30 = vadd.f32 %v752_v12, %v5247_v24  ;;  %v2395_v12 = vrot.slane %v3681_v35, 6  ;;  %v2727_v35 = vld [vmem:[%s5224_s2 + $0x80] sm:$0xff] }
 0x1e7   : > { %v1247_v34 = vadd.f32 %v1201_v26, %v1071_v49  ;;  %v1516_v48 = vpop.f32.mrf.mxu0  ;;  %2829 = vperm.xlu1 %3656, %v2727_v35  }
 0x1e8   : > { %3459 = vmatmul.msk.f32.gmra.mxu1 %vm362_vm2, %v1592_v55  ;;  %v2396_v24 = vsel %vm2365_vm6, %v2393_v44, %v2395_v12 }
 0x1e9   : > { %v4797_v46 = vadd.f32 %v1513_v5, %v1247_v34  ;;  %3497 = vmatmul.msk.f32.gmra.mxu2 %vm362_vm2, %v1596_v39  ;;  %3535 = vmatmul.msk.f32.gmra.mxu3 %vm362_vm2, %v2080_v25  ;;  %v2722_v5 = vld [vmem:[%s5224_s2 + $0x58] sm:$0xff]  ;;  %v1600_v34 = vsel %vm435_vm0, %v1597_v33, %v1599_v27  ;;  %v3682_v33 = vld [vmem:[%s3901_s20 + $0xa0] sm:$0xff] }
 0x1ea   : > { %3573 = vmatmul.msk.f32.gmra.mxu0 %vm362_vm2, %v2392_v28  ;;  %2804 = vperm.xlu2 %3657, %v2722_v5   ;;  %v2726_v28 = vld [vmem:[%s5224_s2 + $0x78] sm:$0xff]  ;;  %v2085_v31 = vrot.slane %v3682_v33, 5 }
 0x1eb   : > { %2824 = vperm.xlu0 %3655, %v2726_v28  }
 0x1ec   : > { %v1028_v9 = vpop.f32.mrf.mxu2  ;;  %v1204_v55 = vpop.f32.mrf.mxu3 }
 0x1ed   : > { %v1072_v2 = vadd.f32 %v1028_v9, %v753_v30  ;;  %v755_v62 = vpop.f32.mrf.mxu1  ;;  %v1601_v9 = vrot.slane %v3682_v33, 4 }
 0x1ee   : > { %v756_v26 = vadd.f32 %v755_v62, %v5248_v1 }
 0x1ef   : > { %v1248_v52 = vadd.f32 %v1204_v55, %v1072_v2  ;;  %v1519_v6 = vpop.f32.mrf.mxu0  ;;  %v5249_v55 = vld [vmem:[#allocation16_spill] sm:$0xff]  ;;  %v1602_v5 = vsel %vm435_vm0, %v1599_v27, %v1601_v9 }
 0x1f0   : > { %3460 = vmatmul.msk.f32.gmra.mxu1 %vm362_vm2, %v1594_v37  ;;  %v3683_v27 = vld [vmem:[%s3901_s20 + $0xa8] sm:$0xff] }
 0x1f1   : > { %v4811_v41 = vadd.f32 %v1516_v48, %v1248_v52  ;;  %3498 = vmatmul.msk.f32.gmra.mxu2 %vm362_vm2, %v1598_v18  ;;  %3536 = vmatmul.msk.f32.gmra.mxu3 %vm362_vm2, %v2082_v60  ;;  %v2397_v60 = vrot.slane %v3682_v33, 6 }
 0x1f2   : > { %3574 = vmatmul.msk.f32.gmra.mxu0 %vm362_vm2, %v2394_v29 }
 0x1f4   : > { %v1031_v49 = vpop.f32.mrf.mxu2  ;;  %v1207_v37 = vpop.f32.mrf.mxu3 }
 0x1f5   : > { %v1073_v25 = vadd.f32 %v1031_v49, %v756_v26  ;;  %v758_v19 = vpop.f32.mrf.mxu1  ;;  %v2398_v26 = vsel %vm2365_vm6, %v2395_v12, %v2397_v60 }
 0x1f6   : > { %v759_v2 = vadd.f32 %v758_v19, %v5249_v55  ;;  %v2725_v55 = vld [vmem:[%s5224_s2 + $0x70] sm:$0xff] }
 0x1f7   : > { %v1249_v48 = vadd.f32 %v1207_v37, %v1073_v25  ;;  %v1522_v51 = vpop.f32.mrf.mxu0  ;;  %v1603_v37 = vrot.slane %v3683_v27, 4  ;;  %v5250_v25 = vld [vmem:[#allocation18_spill] sm:$0xff]  ;;  %2819 = vperm.xlu2 %3657, %v2725_v55  }
 0x1f8   : > { %3461 = vmatmul.msk.f32.gmra.mxu1 %vm362_vm2, %v1596_v39 }
 0x1f9   : > { %v4825_v30 = vadd.f32 %v1519_v6, %v1249_v48  ;;  %3499 = vmatmul.msk.f32.gmra.mxu2 %vm362_vm2, %v1600_v34  ;;  %3537 = vmatmul.msk.f32.gmra.mxu3 %vm362_vm2, %v2084_v17  ;;  %v2086_v6 = vsel %vm2053_vm5, %v2083_v40, %v2085_v31  ;;  %v2087_v40 = vrot.slane %v3683_v27, 5  ;;  %v2399_v48 = vrot.slane %v3683_v27, 6 }
 0x1fa   : > { %3575 = vmatmul.msk.f32.gmra.mxu0 %vm362_vm2, %v2396_v24 }
 0x1fb   : > { %v2088_v24 = vsel %vm2053_vm5, %v2085_v31, %v2087_v40 }
 0x1fc   : > { %v1034_v62 = vpop.f32.mrf.mxu2  ;;  %v1210_v39 = vpop.f32.mrf.mxu3 }
 0x1fd   : > { %v1074_v52 = vadd.f32 %v1034_v62, %v759_v2  ;;  %v761_v44 = vpop.f32.mrf.mxu1  ;;  %v2400_v62 = vsel %vm2365_vm6, %v2397_v60, %v2399_v48 }
 0x1fe   : > { %v762_v19 = vadd.f32 %v761_v44, %v5250_v25 }
 0x1ff   : > { %v1250_v29 = vadd.f32 %v1210_v39, %v1074_v52  ;;  %v1525_v1 = vpop.f32.mrf.mxu0 }
 0x200   : > { %3462 = vmatmul.msk.f32.gmra.mxu1 %vm362_vm2, %v1598_v18 }
 0x201   : > { %v4839_v49 = vadd.f32 %v1522_v51, %v1250_v29  ;;  %3500 = vmatmul.msk.f32.gmra.mxu2 %vm362_vm2, %v1602_v5  ;;  %3538 = vmatmul.msk.f32.gmra.mxu3 %vm362_vm2, %v2086_v6  ;;  %v1604_v51 = vsel %vm435_vm0, %v1601_v9, %v1603_v37  ;;  %v3684_v9 = vld [vmem:[%s3901_s20 + $0xb0] sm:$0xff] }
 0x202   : > { %3576 = vmatmul.msk.f32.gmra.mxu0 %vm362_vm2, %v2398_v26  ;;  %v1605_v31 = vrot.slane %v3684_v9, 4  ;;  %v2089_v52 = vrot.slane %v3684_v9, 5  ;;  %v2401_v60 = vrot.slane %v3684_v9, 6  ;;  %v2750_v26 = vpop.permute.xlu0 %2749 }
 0x204   : > { %v1037_v17 = vpop.f32.mrf.mxu2  ;;  %v1213_v18 = vpop.f32.mrf.mxu3  ;;  %v2090_v27 = vsel %vm2053_vm5, %v2087_v40, %v2089_v52 }
 0x205   : > { %v1075_v12 = vadd.f32 %v1037_v17, %v762_v19  ;;  %v1731_v28 = vpop.f32.mrf.mxu1  ;;  %v2402_v17 = vsel %vm2365_vm6, %v2399_v48, %v2401_v60 }
 0x206   : > { %v1839_v44 = vadd.f32 %v1731_v28, %v4396_v54  ;;  %v2729_v54 = vld [vmem:[%s5224_s2 + $0x90] sm:$0xff] }
 0x207   : > { %v1251_v33 = vadd.f32 %v1213_v18, %v1075_v12  ;;  %v2531_v2 = vpop.f32.mrf.mxu0  ;;  %2839 = vperm.xlu0 %3655, %v2729_v54  }
 0x208   : > { %3463 = vmatmul.msk.f32.gmra.mxu1 %vm362_vm2, %v1600_v34 }
 0x209   : > { %v4853_v39 = vadd.f32 %v1525_v1, %v1251_v33  ;;  %3501 = vmatmul.msk.f32.gmra.mxu2 %vm362_vm2, %v1604_v51  ;;  %3539 = vmatmul.msk.f32.gmra.mxu3 %vm362_vm2, %v2088_v24  ;;  %v4865_v1 = vsel %vm435_vm0, %v1603_v37, %v1605_v31  ;;  %v3685_v37 = vld [vmem:[%s3901_s20 + $0xb8] sm:$0xff] }
 0x20a   : > { %3577 = vmatmul.msk.f32.gmra.mxu0 %vm362_vm2, %v2400_v62  ;;  %v1607_v12 = vrot.slane %v3685_v37, 4  ;;  %v2091_v40 = vrot.slane %v3685_v37, 5  ;;  %v2403_v24 = vrot.slane %v3685_v37, 6 }
 0x20c   : > { %v1907_v34 = vpop.f32.mrf.mxu2  ;;  %v2219_v6 = vpop.f32.mrf.mxu3  ;;  %v2092_v62 = vsel %vm2053_vm5, %v2089_v52, %v2091_v40  ;;  %v3686_v52 = vld [vmem:[%s3901_s20 + $0xc0] sm:$0xff] }
 0x20d   : > { %v2015_v29 = vadd.f32 %v1907_v34, %v1839_v44  ;;  %v1734_v35 = vpop.f32.mrf.mxu1  ;;  %v2755_v44 = vpop.permute.xlu0 %2754 }
 0x20e   : > { %v1840_v28 = vadd.f32 %v1734_v35, %v4408_v53  ;;  %v2730_v53 = vld [vmem:[%s5224_s2 + $0x98] sm:$0xff] }
 0x20f   : > { %v2327_v25 = vadd.f32 %v2219_v6, %v2015_v29  ;;  %v2534_v19 = vpop.f32.mrf.mxu0  ;;  %v2404_v6 = vsel %vm2365_vm6, %v2401_v60, %v2403_v24  ;;  %2844 = vperm.xlu1 %3656, %v2730_v53  }
 0x210   : > { %3464 = vmatmul.msk.f32.gmra.mxu1 %vm362_vm2, %v1602_v5 }
 0x211   : > { %v2639_v18 = vadd.f32 %v2531_v2, %v2327_v25  ;;  %3502 = vmatmul.msk.f32.gmra.mxu2 %vm362_vm2, %v4865_v1  ;;  %3540 = vmatmul.msk.f32.gmra.mxu3 %vm362_vm2, %v2090_v27  ;;  %v4883_v2 = vsel %vm435_vm0, %v1605_v31, %v1607_v12  ;;  %v1609_v27 = vrot.slane %v3686_v52, 4  ;;  %v2093_v25 = vrot.slane %v3686_v52, 5 }
 0x212   : > { %3578 = vmatmul.msk.f32.gmra.mxu0 %vm362_vm2, %v2402_v17 }
 0x213   : > { %2675 = vst [vmem:[%s4878_s13] sm:$0xff] %v2639_v18  ;;  %v3004_v29 = vmul.f32 %v2639_v18, %v2639_v18  ;;  %v2927_v31 = vmul.f32 %v2750_v26, %v2639_v18  ;;  %v2732_v18 = vld [vmem:[%s5224_s2 + $0xa8] sm:$0xff] }
 0x214   : > { %v1910_v5 = vpop.f32.mrf.mxu2  ;;  %v2222_v48 = vpop.f32.mrf.mxu3  ;;  %2854 = vperm.xlu0 %3655, %v2732_v18  }
 0x215   : > { %v2016_v33 = vadd.f32 %v1910_v5, %v1840_v28  ;;  %v1737_v55 = vpop.f32.mrf.mxu1  ;;  %v2405_v28 = vrot.slane %v3686_v52, 6 }
 0x216   : > { %v1841_v54 = vadd.f32 %v1737_v55, %v4420_v8  ;;  %v4902_v8 = vsel %vm435_vm0, %v1607_v12, %v1609_v27  ;;  %v2760_v55 = vpop.permute.xlu1 %2759 }
 0x217   : > { %v2328_v9 = vadd.f32 %v2222_v48, %v2016_v33  ;;  %v2537_v34 = vpop.f32.mrf.mxu0 }
 0x218   : > { %3465 = vmatmul.msk.f32.gmra.mxu1 %vm362_vm2, %v1604_v51 }
 0x219   : > { %v2640_v35 = vadd.f32 %v2534_v19, %v2328_v9  ;;  %3503 = vmatmul.msk.f32.gmra.mxu2 %vm362_vm2, %v4883_v2  ;;  %3541 = vmatmul.msk.f32.gmra.mxu3 %vm362_vm2, %v2092_v62  ;;  %v3040_v19 = vmul.f32 %v3004_v29, %v2750_v26  ;;  %v2094_v62 = vsel %vm2053_vm5, %v2091_v40, %v2093_v25  ;;  %v2728_v26 = vld [vmem:[%s5224_s2 + $0x88] sm:$0xff] }
 0x21a   : > { %3579 = vmatmul.msk.f32.gmra.mxu0 %vm362_vm2, %v2404_v6  ;;  %v2406_v29 = vsel %vm2365_vm6, %v2403_v24, %v2405_v28  ;;  %2834 = vperm.xlu2 %3657, %v2728_v26  }
 0x21b   : > { %2676 = vst [vmem:[%s4878_s13 + $0x8] sm:$0xff] %v2640_v35  ;;  %v2928_v51 = vmul.f32 %v2755_v44, %v2640_v35  ;;  %v3005_v17 = vmul.f32 %v2640_v35, %v2640_v35  ;;  %v3687_v35 = vld [vmem:[%s3901_s20 + $0xc8] sm:$0xff] }
 0x21c   : > { %v1913_v60 = vpop.f32.mrf.mxu2  ;;  %v2225_v37 = vpop.f32.mrf.mxu3  ;;  %v2095_v52 = vrot.slane %v3687_v35, 5 }
 0x21d   : > { %v2963_v5 = vadd.f32 %v2928_v51, %v2927_v31  ;;  %v3041_v48 = vmul.f32 %v3005_v17, %v2755_v44  ;;  %v2017_v33 = vadd.f32 %v1913_v60, %v1841_v54  ;;  %v1740_v9 = vpop.f32.mrf.mxu1  ;;  %v2733_v44 = vld [vmem:[%s5224_s2 + $0xb0] sm:$0xff]  ;;  %v1611_v31 = vrot.slane %v3687_v35, 4 }
 0x21e   : > { %2859 = vperm.xlu1 %3656, %v2733_v44   ;;  %v1842_v54 = vadd.f32 %v1740_v9, %v4432_v36  ;;  %v2407_v60 = vrot.slane %v3687_v35, 6  ;;  %v2096_v36 = vsel %vm2053_vm5, %v2093_v25, %v2095_v52 }
 0x21f   : > { %v3076_v53 = vadd.f32 %v3041_v48, %v3040_v19  ;;  %v2329_v6 = vadd.f32 %v2225_v37, %v2017_v33  ;;  %v2540_v12 = vpop.f32.mrf.mxu0  ;;  %v2735_v33 = vld [vmem:[%s5224_s2 + $0xc0] sm:$0xff]  ;;  %v4925_v18 = vsel %vm435_vm0, %v1609_v27, %v1611_v31  ;;  %v3688_v27 = vld [vmem:[%s3901_s20 + $0xd0] sm:$0xff] }
 0x220   : > { %3466 = vmatmul.msk.f32.gmra.mxu1 %vm362_vm2, %v4865_v1  ;;  %2869 = vperm.xlu0 %3655, %v2735_v33   ;;  %v2408_v26 = vsel %vm2365_vm6, %v2405_v28, %v2407_v60  ;;  %v1613_v25 = vrot.slane %v3688_v27, 4  ;;  %v2409_v28 = vrot.slane %v3688_v27, 6 }
 0x221   : > { %v2641_v40 = vadd.f32 %v2537_v34, %v2329_v6  ;;  %3504 = vmatmul.msk.f32.gmra.mxu2 %vm362_vm2, %v4902_v8  ;;  %3542 = vmatmul.msk.f32.gmra.mxu3 %vm362_vm2, %v2094_v62 }
 0x222   : > { %3580 = vmatmul.msk.f32.gmra.mxu0 %vm362_vm2, %v2406_v29 }
 0x223   : > { %2677 = vst [vmem:[%s4878_s13 + $0x10] sm:$0xff] %v2641_v40  ;;  %v2929_v51 = vmul.f32 %v2760_v55, %v2641_v40  ;;  %v3006_v17 = vmul.f32 %v2641_v40, %v2641_v40 }
 0x224   : > { %v1916_v1 = vpop.f32.mrf.mxu2  ;;  %v2228_v24 = vpop.f32.mrf.mxu3 }
 0x225   : > { %v2964_v34 = vadd.f32 %v2963_v5, %v2929_v51  ;;  %v3042_v37 = vmul.f32 %v3006_v17, %v2760_v55  ;;  %v2018_v19 = vadd.f32 %v1916_v1, %v1842_v54  ;;  %v1743_v48 = vpop.f32.mrf.mxu1  ;;  %v2736_v5 = vld [vmem:[%s5224_s2 + $0xc8] sm:$0xff]  ;;  %v2765_v55 = vpop.permute.xlu1 %2764 }
 0x226   : > { %2874 = vperm.xlu1 %3656, %v2736_v5   ;;  %v1843_v29 = vadd.f32 %v1743_v48, %v4444_v57  ;;  %v2770_v57 = vpop.permute.xlu2 %2769 }
 0x227   : > { %v3077_v9 = vadd.f32 %v3076_v53, %v3042_v37  ;;  %v2330_v62 = vadd.f32 %v2228_v24, %v2018_v19  ;;  %v2543_v6 = vpop.f32.mrf.mxu0  ;;  %v2097_v53 = vrot.slane %v3688_v27, 5  ;;  %v2738_v24 = vld [vmem:[%s5224_s2 + $0xd8] sm:$0xff]  ;;  %v4945_v37 = vsel %vm435_vm0, %v1611_v31, %v1613_v25  ;;  %v2731_v31 = vld [vmem:[%s5224_s2 + $0xa0] sm:$0xff] }
 0x228   : > { %3467 = vmatmul.msk.f32.gmra.mxu1 %vm362_vm2, %v4883_v2  ;;  %2884 = vperm.xlu0 %3655, %v2738_v24  }
 0x229   : > { %v2642_v44 = vadd.f32 %v2540_v12, %v2330_v62  ;;  %3505 = vmatmul.msk.f32.gmra.mxu2 %vm362_vm2, %v4925_v18  ;;  %3543 = vmatmul.msk.f32.gmra.mxu3 %vm362_vm2, %v2096_v36  ;;  %v2098_v19 = vsel %vm2053_vm5, %v2095_v52, %v2097_v53  ;;  %v2410_v62 = vsel %vm2365_vm6, %v2407_v60, %v2409_v28  ;;  %v3689_v52 = vld [vmem:[%s3901_s20 + $0xd8] sm:$0xff] }
 0x22a   : > { %3581 = vmatmul.msk.f32.gmra.mxu0 %vm362_vm2, %v2408_v26  ;;  %2849 = vperm.xlu2 %3657, %v2731_v31   ;;  %v2411_v27 = vrot.slane %v3689_v52, 6 }
 0x22b   : > { %2678 = vst [vmem:[%s4878_s13 + $0x18] sm:$0xff] %v2642_v44  ;;  %v2930_v40 = vmul.f32 %v2765_v55, %v2642_v44  ;;  %v3007_v35 = vmul.f32 %v2642_v44, %v2642_v44 }
 0x22c   : > { %v1919_v2 = vpop.f32.mrf.mxu2  ;;  %v2231_v54 = vpop.f32.mrf.mxu3 }
 0x22d   : > { %v2965_v12 = vadd.f32 %v2964_v34, %v2930_v40  ;;  %v3043_v51 = vmul.f32 %v3007_v35, %v2765_v55  ;;  %v2019_v17 = vadd.f32 %v1919_v2, %v1843_v29  ;;  %v1746_v1 = vpop.f32.mrf.mxu1  ;;  %v2739_v34 = vld [vmem:[%s5224_s2 + $0xe0] sm:$0xff]  ;;  %v2099_v55 = vrot.slane %v3689_v52, 5 }
 0x22e   : > { %2889 = vperm.xlu1 %3656, %v2739_v34   ;;  %v2775_v24 = vpop.permute.xlu2 %2774 }
 0x22f   : > { %v3078_v48 = vadd.f32 %v3077_v9, %v3043_v51  ;;  %v2331_v33 = vadd.f32 %v2231_v54, %v2019_v17  ;;  %v2546_v36 = vpop.f32.mrf.mxu0  ;;  %v1615_v9 = vrot.slane %v3689_v52, 4  ;;  %v2741_v54 = vld [vmem:[%s5224_s2 + $0xf0] sm:$0xff] }
 0x230   : > { %3468 = vmatmul.msk.f32.gmra.mxu1 %vm362_vm2, %v4902_v8  ;;  %v1844_v8 = vadd.f32 %v1746_v1, %v4456_v59  ;;  %v2100_v59 = vsel %vm2053_vm5, %v2097_v53, %v2099_v55  ;;  %2899 = vperm.xlu0 %3655, %v2741_v54   ;;  %v3690_v53 = vld [vmem:[%s3901_s20 + $0xe0] sm:$0xff] }
 0x231   : > { %v2643_v5 = vadd.f32 %v2543_v6, %v2331_v33  ;;  %3506 = vmatmul.msk.f32.gmra.mxu2 %vm362_vm2, %v4945_v37  ;;  %3544 = vmatmul.msk.f32.gmra.mxu3 %vm362_vm2, %v2098_v19  ;;  %v4968_v51 = vsel %vm435_vm0, %v1613_v25, %v1615_v9  ;;  %v2412_v19 = vsel %vm2365_vm6, %v2409_v28, %v2411_v27  ;;  %v2734_v25 = vld [vmem:[%s5224_s2 + $0xb8] sm:$0xff]  ;;  %v2101_v34 = vrot.slane %v3690_v53, 5 }
 0x232   : > { %3582 = vmatmul.msk.f32.gmra.mxu0 %vm362_vm2, %v2410_v62  ;;  %2864 = vperm.xlu2 %3657, %v2734_v25   ;;  %v2413_v31 = vrot.slane %v3690_v53, 6 }
 0x233   : > { %2679 = vst [vmem:[%s4878_s13 + $0x20] sm:$0xff] %v2643_v5  ;;  %v2931_v26 = vmul.f32 %v2770_v57, %v2643_v5  ;;  %v3008_v60 = vmul.f32 %v2643_v5, %v2643_v5 }
 0x234   : > { %v1922_v6 = vpop.f32.mrf.mxu2  ;;  %v2234_v44 = vpop.f32.mrf.mxu3 }
 0x235   : > { %v2966_v29 = vadd.f32 %v2965_v12, %v2931_v26  ;;  %v3044_v40 = vmul.f32 %v3008_v60, %v2770_v57  ;;  %v2020_v35 = vadd.f32 %v1922_v6, %v1844_v8  ;;  %v1749_v2 = vpop.f32.mrf.mxu1  ;;  %v2742_v12 = vld [vmem:[%s5224_s2 + $0xf8] sm:$0xff]  ;;  %v2744_v6 = vld [vmem:[%s5224_s2 + $0x108] sm:$0xff] }
 0x236   : > { %2904 = vperm.xlu1 %3656, %v2742_v12  }
 0x237   : > { %v3079_v17 = vadd.f32 %v3078_v48, %v3044_v40  ;;  %v2332_v1 = vadd.f32 %v2234_v44, %v2020_v35  ;;  %v2549_v57 = vpop.f32.mrf.mxu0  ;;  %v1617_v48 = vrot.slane %v3690_v53, 4 }
 0x238   : > { %3469 = vmatmul.msk.f32.gmra.mxu1 %vm362_vm2, %v4925_v18  ;;  %v1845_v18 = vadd.f32 %v1749_v2, %v4468_v3  ;;  %v2102_v3 = vsel %vm2053_vm5, %v2099_v55, %v2101_v34  ;;  %2914 = vperm.xlu0 %3655, %v2744_v6   ;;  %v2780_v2 = vpop.permute.xlu0 %2779  ;;  %v3691_v55 = vld [vmem:[%s3901_s20 + $0xe8] sm:$0xff] }
 0x239   : > { %v2644_v33 = vadd.f32 %v2546_v36, %v2332_v1  ;;  %3507 = vmatmul.msk.f32.gmra.mxu2 %vm362_vm2, %v4968_v51  ;;  %3545 = vmatmul.msk.f32.gmra.mxu3 %vm362_vm2, %v2100_v59  ;;  %v4991_v44 = vsel %vm435_vm0, %v1615_v9, %v1617_v48  ;;  %v2414_v59 = vsel %vm2365_vm6, %v2411_v27, %v2413_v31  ;;  %v2737_v9 = vld [vmem:[%s5224_s2 + $0xd0] sm:$0xff]  ;;  %v2103_v12 = vrot.slane %v3691_v55, 5 }
 0x23a   : > { %3583 = vmatmul.msk.f32.gmra.mxu0 %vm362_vm2, %v2412_v19  ;;  %2879 = vperm.xlu2 %3657, %v2737_v9  }
 0x23b   : > { %2680 = vst [vmem:[%s4878_s13 + $0x28] sm:$0xff] %v2644_v33  ;;  %v2932_v62 = vmul.f32 %v2775_v24, %v2644_v33  ;;  %v3009_v28 = vmul.f32 %v2644_v33, %v2644_v33  ;;  %v2415_v33 = vrot.slane %v3691_v55, 6 }
 0x23c   : > { %v1925_v36 = vpop.f32.mrf.mxu2  ;;  %v2237_v5 = vpop.f32.mrf.mxu3 }
 0x23d   : > { %v2967_v52 = vadd.f32 %v2966_v29, %v2932_v62  ;;  %v3045_v8 = vmul.f32 %v3009_v28, %v2775_v24  ;;  %v2021_v26 = vadd.f32 %v1925_v36, %v1845_v18  ;;  %v1752_v60 = vpop.f32.mrf.mxu1  ;;  %v2745_v29 = vld [vmem:[%s5224_s2 + $0x110] sm:$0xff]  ;;  %v2104_v36 = vsel %vm2053_vm5, %v2101_v34, %v2103_v12 }
 0x23e   : > { %2919 = vperm.xlu1 %3656, %v2745_v29   ;;  %v3692_v34 = vld [vmem:[%s3901_s20 + $0xf0] sm:$0xff] }
 0x23f   : > { %v3080_v40 = vadd.f32 %v3079_v17, %v3045_v8  ;;  %v2333_v35 = vadd.f32 %v2237_v5, %v2021_v26  ;;  %v2552_v54 = vpop.f32.mrf.mxu0  ;;  %v1619_v17 = vrot.slane %v3691_v55, 4  ;;  %v2785_v8 = vpop.permute.xlu1 %2784 }
 0x240   : > { %3470 = vmatmul.msk.f32.gmra.mxu1 %vm362_vm2, %v4945_v37  ;;  %v1846_v37 = vadd.f32 %v1752_v60, %v4480_v61  ;;  %v2416_v60 = vsel %vm2365_vm6, %v2413_v31, %v2415_v33 }
 0x241   : > { %v2645_v1 = vadd.f32 %v2549_v57, %v2333_v35  ;;  %3508 = vmatmul.msk.f32.gmra.mxu2 %vm362_vm2, %v4991_v44  ;;  %3546 = vmatmul.msk.f32.gmra.mxu3 %vm362_vm2, %v2102_v3  ;;  %v1620_v28 = vsel %vm435_vm0, %v1617_v48, %v1619_v17  ;;  %v2740_v48 = vld [vmem:[%s5224_s2 + $0xe8] sm:$0xff]  ;;  %v2105_v3 = vrot.slane %v3692_v34, 5 }
 0x242   : > { %3584 = vmatmul.msk.f32.gmra.mxu0 %vm362_vm2, %v2414_v59  ;;  %2894 = vperm.xlu2 %3657, %v2740_v48  }
 0x243   : > { %2681 = vst [vmem:[%s4878_s13 + $0x30] sm:$0xff] %v2645_v1  ;;  %v2933_v24 = vmul.f32 %v2780_v2, %v2645_v1  ;;  %v3010_v27 = vmul.f32 %v2645_v1, %v2645_v1 }
 0x244   : > { %v1928_v57 = vpop.f32.mrf.mxu2  ;;  %v2240_v19 = vpop.f32.mrf.mxu3 }
 0x245   : > { %v2968_v25 = vadd.f32 %v2967_v52, %v2933_v24  ;;  %v3046_v53 = vmul.f32 %v3010_v27, %v2780_v2  ;;  %v2022_v18 = vadd.f32 %v1928_v57, %v1846_v37  ;;  %v1755_v62 = vpop.f32.mrf.mxu1  ;;  %v1621_v52 = vrot.slane %v3692_v34, 4  ;;  %v2790_v27 = vpop.permute.xlu2 %2789 }
 0x246   : > { %v2417_v2 = vrot.slane %v3692_v34, 6  ;;  %v2106_v37 = vsel %vm2053_vm5, %v2103_v12, %v2105_v3  ;;  %v3693_v12 = vld [vmem:[%s3901_s20 + $0xf8] sm:$0xff] }
 0x247   : > { %v3081_v5 = vadd.f32 %v3080_v40, %v3046_v53  ;;  %v2334_v61 = vadd.f32 %v2240_v19, %v2022_v18  ;;  %v2555_v26 = vpop.f32.mrf.mxu0  ;;  %v1847_v40 = vadd.f32 %v1755_v62, %v4492_v20  ;;  %v1622_v55 = vsel %vm435_vm0, %v1619_v17, %v1621_v52  ;;  %v2743_v17 = vld [vmem:[%s5224_s2 + $0x100] sm:$0xff] }
 0x248   : > { %3471 = vmatmul.msk.f32.gmra.mxu1 %vm362_vm2, %v4968_v51  ;;  %v2418_v19 = vsel %vm2365_vm6, %v2415_v33, %v2417_v2  ;;  %v2107_v18 = vrot.slane %v3693_v12, 5 }
 0x249   : > { %v2646_v6 = vadd.f32 %v2552_v54, %v2334_v61  ;;  %3509 = vmatmul.msk.f32.gmra.mxu2 %vm362_vm2, %v1620_v28  ;;  %3547 = vmatmul.msk.f32.gmra.mxu3 %vm362_vm2, %v2104_v36  ;;  %v2419_v61 = vrot.slane %v3693_v12, 6 }
 0x24a   : > { %3585 = vmatmul.msk.f32.gmra.mxu0 %vm362_vm2, %v2416_v60  ;;  %2909 = vperm.xlu2 %3657, %v2743_v17   ;;  %v2108_v34 = vsel %vm2053_vm5, %v2105_v3, %v2107_v18 }
 0x24b   : > { %2682 = vst [vmem:[%s4878_s13 + $0x38] sm:$0xff] %v2646_v6  ;;  %v2934_v51 = vmul.f32 %v2785_v8, %v2646_v6  ;;  %v3011_v35 = vmul.f32 %v2646_v6, %v2646_v6 }
 0x24c   : > { %v1931_v31 = vpop.f32.mrf.mxu2  ;;  %v2243_v29 = vpop.f32.mrf.mxu3 }
 0x24d   : > { %v2969_v54 = vadd.f32 %v2968_v25, %v2934_v51  ;;  %v3047_v59 = vmul.f32 %v3011_v35, %v2785_v8  ;;  %v2023_v1 = vadd.f32 %v1931_v31, %v1847_v40  ;;  %v1758_v9 = vpop.f32.mrf.mxu1  ;;  %v1623_v25 = vrot.slane %v3693_v12, 4  ;;  %v2795_v51 = vpop.permute.xlu0 %2794 }
 0x24e   : > { %v1848_v62 = vadd.f32 %v1758_v9, %v4504_v21  ;;  %v2420_v31 = vsel %vm2365_vm6, %v2417_v2, %v2419_v61 }
 0x24f   : > { %v3082_v24 = vadd.f32 %v3081_v5, %v3047_v59  ;;  %v2335_v20 = vadd.f32 %v2243_v29, %v2023_v1  ;;  %v2558_v57 = vpop.f32.mrf.mxu0  ;;  %v1624_v48 = vsel %vm435_vm0, %v1621_v52, %v1623_v25  ;;  %v2746_v52 = vld [vmem:[%s5224_s2 + $0x118] sm:$0xff] }
 0x250   : > { %3472 = vmatmul.msk.f32.gmra.mxu1 %vm362_vm2, %v4991_v44 }
 0x251   : > { %v2647_v53 = vadd.f32 %v2555_v26, %v2335_v20  ;;  %3510 = vmatmul.msk.f32.gmra.mxu2 %vm362_vm2, %v1622_v55  ;;  %3548 = vmatmul.msk.f32.gmra.mxu3 %vm362_vm2, %v2106_v37 }
 0x252   : > { %3586 = vmatmul.msk.f32.gmra.mxu0 %vm362_vm2, %v2418_v19  ;;  %2924 = vperm.xlu2 %3657, %v2746_v52   ;;  %v2805_v52 = vpop.permute.xlu2 %2804 }
 0x253   : > { %2683 = vst [vmem:[%s4878_s13 + $0x40] sm:$0xff] %v2647_v53  ;;  %v2935_v44 = vmul.f32 %v2790_v27, %v2647_v53  ;;  %v3012_v36 = vmul.f32 %v2647_v53, %v2647_v53 }
 0x254   : > { %v1934_v33 = vpop.f32.mrf.mxu2  ;;  %v2246_v5 = vpop.f32.mrf.mxu3 }
 0x255   : > { %v2970_v8 = vadd.f32 %v2969_v54, %v2935_v44  ;;  %v3048_v26 = vmul.f32 %v3012_v36, %v2790_v27  ;;  %v2024_v60 = vadd.f32 %v1934_v33, %v1848_v62  ;;  %v1761_v6 = vpop.f32.mrf.mxu1  ;;  %v3694_v54 = vld [vmem:[%s3901_s20 + $0x100] sm:$0xff]  ;;  %v2800_v62 = vpop.permute.xlu1 %2799 }
 0x256   : > { %v1625_v3 = vrot.slane %v3694_v54, 4  ;;  %v2109_v59 = vrot.slane %v3694_v54, 5  ;;  %v1849_v1 = vadd.f32 %v1761_v6, %v4516_v42 }
 0x257   : > { %v3083_v40 = vadd.f32 %v3082_v24, %v3048_v26  ;;  %v2336_v21 = vadd.f32 %v2246_v5, %v2024_v60  ;;  %v2561_v35 = vpop.f32.mrf.mxu0  ;;  %v2421_v24 = vrot.slane %v3694_v54, 6  ;;  %v3695_v5 = vld [vmem:[%s3901_s20 + $0x108] sm:$0xff] }
 0x258   : > { %3473 = vmatmul.msk.f32.gmra.mxu1 %vm362_vm2, %v1620_v28  ;;  %v1626_v53 = vsel %vm435_vm0, %v1623_v25, %v1625_v3  ;;  %v2110_v17 = vsel %vm2053_vm5, %v2107_v18, %v2109_v59  ;;  %v2111_v26 = vrot.slane %v3695_v5, 5 }
 0x259   : > { %v2648_v29 = vadd.f32 %v2558_v57, %v2336_v21  ;;  %3511 = vmatmul.msk.f32.gmra.mxu2 %vm362_vm2, %v1624_v48  ;;  %3549 = vmatmul.msk.f32.gmra.mxu3 %vm362_vm2, %v2108_v34  ;;  %v2422_v36 = vsel %vm2365_vm6, %v2419_v61, %v2421_v24  ;;  %v2423_v34 = vrot.slane %v3695_v5, 6 }
 0x25a   : > { %3587 = vmatmul.msk.f32.gmra.mxu0 %vm362_vm2, %v2420_v31  ;;  %v2112_v31 = vsel %vm2053_vm5, %v2109_v59, %v2111_v26 }
 0x25b   : > { %2684 = vst [vmem:[%s4878_s13 + $0x48] sm:$0xff] %v2648_v29  ;;  %v2936_v28 = vmul.f32 %v2795_v51, %v2648_v29  ;;  %v3013_v9 = vmul.f32 %v2648_v29, %v2648_v29 }
 0x25c   : > { %v1937_v2 = vpop.f32.mrf.mxu2  ;;  %v2249_v37 = vpop.f32.mrf.mxu3 }
 0x25d   : > { %v2971_v20 = vadd.f32 %v2970_v8, %v2936_v28  ;;  %v3049_v27 = vmul.f32 %v3013_v9, %v2795_v51  ;;  %v2025_v57 = vadd.f32 %v1937_v2, %v1849_v1  ;;  %v1764_v19 = vpop.f32.mrf.mxu1  ;;  %v1627_v8 = vrot.slane %v3695_v5, 4  ;;  %v3696_v9 = vld [vmem:[%s3901_s20 + $0x110] sm:$0xff] }
 0x25e   : > { %v1850_v25 = vadd.f32 %v1764_v19, %v4528_v13  ;;  %v2424_v1 = vsel %vm2365_vm6, %v2421_v24, %v2423_v34  ;;  %v1629_v2 = vrot.slane %v3696_v9, 4 }
 0x25f   : > { %v3084_v12 = vadd.f32 %v3083_v40, %v3049_v27  ;;  %v2337_v42 = vadd.f32 %v2249_v37, %v2025_v57  ;;  %v2564_v44 = vpop.f32.mrf.mxu0  ;;  %v2113_v37 = vrot.slane %v3696_v9, 5  ;;  %v2425_v57 = vrot.slane %v3696_v9, 6 }
 0x260   : > { %3474 = vmatmul.msk.f32.gmra.mxu1 %vm362_vm2, %v1622_v55 }
 0x261   : > { %v2649_v33 = vadd.f32 %v2561_v35, %v2337_v42  ;;  %3512 = vmatmul.msk.f32.gmra.mxu2 %vm362_vm2, %v1626_v53  ;;  %3550 = vmatmul.msk.f32.gmra.mxu3 %vm362_vm2, %v2110_v17  ;;  %v1628_v35 = vsel %vm435_vm0, %v1625_v3, %v1627_v8  ;;  %v1630_v42 = vsel %vm435_vm0, %v1627_v8, %v1629_v2 }
 0x262   : > { %3588 = vmatmul.msk.f32.gmra.mxu0 %vm362_vm2, %v2422_v36  ;;  %v2810_v36 = vpop.permute.xlu0 %2809  ;;  %v2426_v5 = vsel %vm2365_vm6, %v2423_v34, %v2425_v57 }
 0x263   : > { %2685 = vst [vmem:[%s4878_s13 + $0x50] sm:$0xff] %v2649_v33  ;;  %v2937_v18 = vmul.f32 %v2800_v62, %v2649_v33  ;;  %v3014_v60 = vmul.f32 %v2649_v33, %v2649_v33 }
 0x264   : > { %v1940_v55 = vpop.f32.mrf.mxu2  ;;  %v2252_v6 = vpop.f32.mrf.mxu3 }
 0x265   : > { %v2972_v61 = vadd.f32 %v2971_v20, %v2937_v18  ;;  %v3050_v40 = vmul.f32 %v3014_v60, %v2800_v62  ;;  %v2026_v21 = vadd.f32 %v1940_v55, %v1850_v25  ;;  %v1767_v51 = vpop.f32.mrf.mxu1  ;;  %v2114_v62 = vsel %vm2053_vm5, %v2111_v26, %v2113_v37  ;;  %v3697_v18 = vld [vmem:[%s3901_s20 + $0x118] sm:$0xff] }
 0x266   : > { %v1851_v3 = vadd.f32 %v1767_v51, %v4540_v23  ;;  %v1631_v60 = vrot.slane %v3697_v18, 4  ;;  %v2115_v55 = vrot.slane %v3697_v18, 5 }
 0x267   : > { %v3085_v29 = vadd.f32 %v3084_v12, %v3050_v40  ;;  %v2338_v13 = vadd.f32 %v2252_v6, %v2026_v21  ;;  %v2567_v54 = vpop.f32.mrf.mxu0  ;;  %v2427_v40 = vrot.slane %v3697_v18, 6  ;;  %v3699_v18 = vld [vmem:[%s3901_s20 + $0x128] sm:$0xff] }
 0x268   : > { %3475 = vmatmul.msk.f32.gmra.mxu1 %vm362_vm2, %v1624_v48 }
 0x269   : > { %v2650_v28 = vadd.f32 %v2564_v44, %v2338_v13  ;;  %3513 = vmatmul.msk.f32.gmra.mxu2 %vm362_vm2, %v1628_v35  ;;  %3551 = vmatmul.msk.f32.gmra.mxu3 %vm362_vm2, %v2112_v31  ;;  %v2116_v13 = vsel %vm2053_vm5, %v2113_v37, %v2115_v55 }
 0x26a   : > { %3589 = vmatmul.msk.f32.gmra.mxu0 %vm362_vm2, %v2424_v1 }
 0x26b   : > { %2686 = vst [vmem:[%s4878_s13 + $0x58] sm:$0xff] %v2650_v28  ;;  %v2938_v59 = vmul.f32 %v2805_v52, %v2650_v28  ;;  %v3015_v20 = vmul.f32 %v2650_v28, %v2650_v28  ;;  %v2428_v28 = vsel %vm2365_vm6, %v2425_v57, %v2427_v40 }
 0x26c   : > { %v1943_v48 = vpop.f32.mrf.mxu2  ;;  %v2255_v27 = vpop.f32.mrf.mxu3 }
 0x26d   : > { %v2973_v24 = vadd.f32 %v2972_v61, %v2938_v59  ;;  %v3051_v19 = vmul.f32 %v3015_v20, %v2805_v52  ;;  %v2027_v17 = vadd.f32 %v1943_v48, %v1851_v3  ;;  %v1770_v12 = vpop.f32.mrf.mxu1  ;;  %v3698_v3 = vld [vmem:[%s3901_s20 + $0x120] sm:$0xff] }
 0x26e   : > { %v1852_v8 = vadd.f32 %v1770_v12, %v4552_v58  ;;  %v1633_v59 = vrot.slane %v3698_v3, 4  ;;  %v2117_v20 = vrot.slane %v3698_v3, 5 }
 0x26f   : > { %v3086_v44 = vadd.f32 %v3085_v29, %v3051_v19  ;;  %v2339_v23 = vadd.f32 %v2255_v27, %v2027_v17  ;;  %v2570_v33 = vpop.f32.mrf.mxu0  ;;  %v1632_v29 = vsel %vm435_vm0, %v1629_v2, %v1631_v60 }
 0x270   : > { %3476 = vmatmul.msk.f32.gmra.mxu1 %vm362_vm2, %v1626_v53 }
 0x271   : > { %v2651_v25 = vadd.f32 %v2567_v54, %v2339_v23  ;;  %3514 = vmatmul.msk.f32.gmra.mxu2 %vm362_vm2, %v1630_v42  ;;  %3552 = vmatmul.msk.f32.gmra.mxu3 %vm362_vm2, %v2114_v62  ;;  %v2815_v54 = vpop.permute.xlu1 %2814  ;;  %v1634_v62 = vsel %vm435_vm0, %v1631_v60, %v1633_v59 }
 0x272   : > { %3590 = vmatmul.msk.f32.gmra.mxu0 %vm362_vm2, %v2426_v5 }
 0x273   : > { %2687 = vst [vmem:[%s4878_s13 + $0x60] sm:$0xff] %v2651_v25  ;;  %v2939_v26 = vmul.f32 %v2810_v36, %v2651_v25  ;;  %v3016_v6 = vmul.f32 %v2651_v25, %v2651_v25 }
 0x274   : > { %v1946_v53 = vpop.f32.mrf.mxu2  ;;  %v2258_v61 = vpop.f32.mrf.mxu3 }
 0x275   : > { %v2974_v34 = vadd.f32 %v2973_v24, %v2939_v26  ;;  %v3052_v21 = vmul.f32 %v3016_v6, %v2810_v36  ;;  %v2028_v51 = vadd.f32 %v1946_v53, %v1852_v8  ;;  %v1773_v31 = vpop.f32.mrf.mxu1  ;;  %v2429_v24 = vrot.slane %v3698_v3, 6  ;;  %v2820_v36 = vpop.permute.xlu2 %2819 }
 0x276   : > { %v1853_v2 = vadd.f32 %v1773_v31, %v4564_v50  ;;  %v1635_v8 = vrot.slane %v3699_v18, 4  ;;  %v2119_v26 = vrot.slane %v3699_v18, 5 }
 0x277   : > { %v3087_v52 = vadd.f32 %v3086_v44, %v3052_v21  ;;  %v2340_v58 = vadd.f32 %v2258_v61, %v2028_v51  ;;  %v2573_v1 = vpop.f32.mrf.mxu0  ;;  %v2118_v44 = vsel %vm2053_vm5, %v2115_v55, %v2117_v20  ;;  %v2430_v5 = vsel %vm2365_vm6, %v2427_v40, %v2429_v24 }
 0x278   : > { %3477 = vmatmul.msk.f32.gmra.mxu1 %vm362_vm2, %v1628_v35  ;;  %v2431_v61 = vrot.slane %v3699_v18, 6  ;;  %v1636_v31 = vsel %vm435_vm0, %v1633_v59, %v1635_v8 }
 0x279   : > { %v2652_v9 = vadd.f32 %v2570_v33, %v2340_v58  ;;  %3515 = vmatmul.msk.f32.gmra.mxu2 %vm362_vm2, %v1632_v29  ;;  %3553 = vmatmul.msk.f32.gmra.mxu3 %vm362_vm2, %v2116_v13  ;;  %v2120_v13 = vsel %vm2053_vm5, %v2117_v20, %v2119_v26  ;;  %v2825_v58 = vpop.permute.xlu0 %2824 }
 0x27a   : > { %3591 = vmatmul.msk.f32.gmra.mxu0 %vm362_vm2, %v2428_v28 }
 0x27b   : > { %2688 = vst [vmem:[%s4878_s13 + $0x68] sm:$0xff] %v2652_v9  ;;  %v2940_v37 = vmul.f32 %v2815_v54, %v2652_v9  ;;  %v3017_v48 = vmul.f32 %v2652_v9, %v2652_v9  ;;  %v3700_v9 = vld [vmem:[%s3901_s20 + $0x130] sm:$0xff] }
 0x27c   : > { %v1949_v35 = vpop.f32.mrf.mxu2  ;;  %v2261_v27 = vpop.f32.mrf.mxu3  ;;  %v1637_v3 = vrot.slane %v3700_v9, 4 }
 0x27d   : > { %v2975_v57 = vadd.f32 %v2974_v34, %v2940_v37  ;;  %v3053_v19 = vmul.f32 %v3017_v48, %v2815_v54  ;;  %v2029_v17 = vadd.f32 %v1949_v35, %v1853_v2  ;;  %v1776_v12 = vpop.f32.mrf.mxu1  ;;  %v2121_v2 = vrot.slane %v3700_v9, 5 }
 0x27e   : > { %v1854_v60 = vadd.f32 %v1776_v12, %v4576_v14  ;;  %v2433_v35 = vrot.slane %v3700_v9, 6 }
 0x27f   : > { %v3088_v23 = vadd.f32 %v3087_v52, %v3053_v19  ;;  %v2341_v50 = vadd.f32 %v2261_v27, %v2029_v17  ;;  %v2576_v33 = vpop.f32.mrf.mxu0  ;;  %v1638_v17 = vsel %vm435_vm0, %v1635_v8, %v1637_v3  ;;  %v2122_v12 = vsel %vm2053_vm5, %v2119_v26, %v2121_v2 }
 0x280   : > { %3478 = vmatmul.msk.f32.gmra.mxu1 %vm362_vm2, %v1630_v42 }
 0x281   : > { %v2653_v25 = vadd.f32 %v2573_v1, %v2341_v50  ;;  %3516 = vmatmul.msk.f32.gmra.mxu2 %vm362_vm2, %v1634_v62  ;;  %3554 = vmatmul.msk.f32.gmra.mxu3 %vm362_vm2, %v2118_v44  ;;  %v2432_v1 = vsel %vm2365_vm6, %v2429_v24, %v2431_v61  ;;  %v2830_v50 = vpop.permute.xlu1 %2829 }
 0x282   : > { %3592 = vmatmul.msk.f32.gmra.mxu0 %vm362_vm2, %v2430_v5 }
 0x283   : > { %2689 = vst [vmem:[%s4878_s13 + $0x70] sm:$0xff] %v2653_v25  ;;  %v2941_v55 = vmul.f32 %v2820_v36, %v2653_v25  ;;  %v3018_v6 = vmul.f32 %v2653_v25, %v2653_v25 }
 0x284   : > { %v1952_v42 = vpop.f32.mrf.mxu2  ;;  %v2264_v53 = vpop.f32.mrf.mxu3 }
 0x285   : > { %v2976_v40 = vadd.f32 %v2975_v57, %v2941_v55  ;;  %v3054_v34 = vmul.f32 %v3018_v6, %v2820_v36  ;;  %v2030_v21 = vadd.f32 %v1952_v42, %v1854_v60  ;;  %v1779_v51 = vpop.f32.mrf.mxu1 }
 0x286   : > { %v1855_v59 = vadd.f32 %v1779_v51, %v4589_v43 }
 0x287   : > { %v3089_v52 = vadd.f32 %v3088_v23, %v3054_v34  ;;  %v2342_v14 = vadd.f32 %v2264_v53, %v2030_v21  ;;  %v2579_v54 = vpop.f32.mrf.mxu0  ;;  %v246_v23 = vld [vmem:[%s3901_s20 + $0x138] sm:$0xff] }
 0x288   : > { %3479 = vmatmul.msk.f32.gmra.mxu1 %vm362_vm2, %v1632_v29  ;;  %v1879_v25 = vrot.slane %v246_v23, 4  ;;  %v2123_v18 = vrot.slane %v246_v23, 5  ;;  %v2435_v6 = vrot.slane %v246_v23, 6 }
 0x289   : > { %v2654_v28 = vadd.f32 %v2576_v33, %v2342_v14  ;;  %3517 = vmatmul.msk.f32.gmra.mxu2 %vm362_vm2, %v1636_v31  ;;  %3555 = vmatmul.msk.f32.gmra.mxu3 %vm362_vm2, %v2120_v13  ;;  %v2434_v33 = vsel %vm2365_vm6, %v2431_v61, %v2433_v35  ;;  %v247_v13 = vld [vmem:[%s3901_s20 + $0x140] sm:$0x3f]  ;;  %s3607_s20 = smul.u32 288, %s3846_s19 }
 0x28a   : > { %3593 = vmatmul.msk.f32.gmra.mxu0 %vm362_vm2, %v2432_v1  ;;  %v1880_v34 = vsel %vm435_vm0, %v1637_v3, %v1879_v25  ;;  %v2124_v21 = vsel %vm2053_vm5, %v2121_v2, %v2123_v18  ;;  %v1881_v1 = vrot.slane %v247_v13, 4 }
 0x28b   : > { %2690 = vst [vmem:[%s4878_s13 + $0x78] sm:$0xff] %v2654_v28  ;;  %v2942_v20 = vmul.f32 %v2825_v58, %v2654_v28  ;;  %v3019_v37 = vmul.f32 %v2654_v28, %v2654_v28  ;;  %v2125_v28 = vrot.slane %v247_v13, 5  ;;  %s3137_s8 = scalar_lea.hbm %s5225_s3, %s3607_s20 }
 0x28c   : > { %v1955_v29 = vpop.f32.mrf.mxu2  ;;  %v2267_v48 = vpop.f32.mrf.mxu3  ;;  %s3140_s11 = sshll.u32 %s3137_s8, 4  ;;  %s3141_s11 = int_to_ptr.hbm [resolvable:$true] %s3140_s11 }
 0x28d   : > { %v2977_v27 = vadd.f32 %v2976_v40, %v2942_v20  ;;  %v3055_v24 = vmul.f32 %v3019_v37, %v2825_v58  ;;  %v2031_v57 = vadd.f32 %v1955_v29, %v1855_v59  ;;  %v1782_v19 = vpop.f32.mrf.mxu1  ;;  %v2436_v58 = vsel %vm2365_vm6, %v2433_v35, %v2435_v6  ;;  %s3715_s14 = sshra.s32 %s3141_s11, 4  ;;  %s3716_s14 = int_to_ptr.hbm [resolvable:$true] %s3715_s14 }
 0x28e   : > { %v1856_v8 = vadd.f32 %v1782_v19, %v4600_v4  ;;  %v2437_v20 = vrot.slane %v247_v13, 6  ;;  %s3717_s22 = scalar_lea.hbm %s3716_s14, 288  ;;  %p3722_p0 = scmp.lt.s32.totalorder %s3716_s14, %s5225_s3 }
 0x28f   : > { %v3090_v44 = vadd.f32 %v3089_v52, %v3055_v24  ;;  %v2343_v43 = vadd.f32 %v2267_v48, %v2031_v57  ;;  %v2582_v36 = vpop.f32.mrf.mxu0  ;;  %v2835_v52 = vpop.permute.xlu2 %2834  ;;  %v2126_v24 = vsel %vm2053_vm5, %v2123_v18, %v2125_v28  ;;  %p3718_p11 = scmp.ne.s32.totalorder %s3716_s14, %s3717_s22  ;;  %p3723_p1 = scmp.lt.s32.totalorder %s3721_s28, %s3717_s22 }
 0x290   : > { %3480 = vmatmul.msk.f32.gmra.mxu1 %vm362_vm2, %v1634_v62 }
 0x291   : > { %v2655_v5 = vadd.f32 %v2579_v54, %v2343_v43  ;;  %3518 = vmatmul.msk.f32.gmra.mxu2 %vm362_vm2, %v1638_v17  ;;  %3556 = vmatmul.msk.f32.gmra.mxu3 %vm362_vm2, %v2122_v12  ;;  %p3719_p12 = pnand %p3718_p11, %p3863_p5  ;;  %p3724_p2 = por %p3723_p1, %p3722_p0 }
 0x292   : > { %3594 = vmatmul.msk.f32.gmra.mxu0 %vm362_vm2, %v2434_v33 }
 0x293   : > { %2691 = vst [vmem:[%s4878_s13 + $0x80] sm:$0xff] %v2655_v5  ;;  %v2943_v26 = vmul.f32 %v2830_v50, %v2655_v5  ;;  %v3020_v60 = vmul.f32 %v2655_v5, %v2655_v5  ;;  %p3720_p13 = pneg %p3719_p12 }
 0x294   : > { %v1958_v62 = vpop.f32.mrf.mxu2  ;;  %v2270_v55 = vpop.f32.mrf.mxu3 }
 0x295   : > { %v2978_v42 = vadd.f32 %v2977_v27, %v2943_v26  ;;  %v3056_v53 = vmul.f32 %v3020_v60, %v2830_v50  ;;  %v2032_v61 = vadd.f32 %v1958_v62, %v1856_v8  ;;  %v1785_v40 = vpop.f32.mrf.mxu1  ;;  %v1882_v27 = vsel %vm435_vm0, %v1879_v25, %v1881_v1  ;;  %v2845_v62 = vpop.permute.xlu1 %2844  ;;  %p3725_p3 = pnand %p3724_p2, %p3720_p13 }
 0x296   : > { %v1857_v9 = vadd.f32 %v1785_v40, %v4613_v47  ;;  %v2840_v47 = vpop.permute.xlu0 %2839 }
 0x297   : > { %v3091_v51 = vadd.f32 %v3090_v44, %v3056_v53  ;;  %v2344_v4 = vadd.f32 %v2270_v55, %v2032_v61  ;;  %v2585_v14 = vpop.f32.mrf.mxu0  ;;  %v2438_v44 = vsel %vm2365_vm6, %v2435_v6, %v2437_v20 }
 0x298   : > { %3481 = vmatmul.msk.f32.gmra.mxu1 %vm362_vm2, %v1636_v31 }
 0x299   : > { %v2656_v54 = vadd.f32 %v2582_v36, %v2344_v4  ;;  %3519 = vmatmul.msk.f32.gmra.mxu2 %vm362_vm2, %v1880_v34  ;;  %3557 = vmatmul.msk.f32.gmra.mxu3 %vm362_vm2, %v2124_v21 }
 0x29a   : > { %3595 = vmatmul.msk.f32.gmra.mxu0 %vm362_vm2, %v2436_v58 }
 0x29b   : > { %2692 = vst [vmem:[%s4878_s13 + $0x88] sm:$0xff] %v2656_v54  ;;  %v2944_v3 = vmul.f32 %v2835_v52, %v2656_v54  ;;  %v3021_v2 = vmul.f32 %v2656_v54, %v2656_v54  ;;  %v2850_v54 = vpop.permute.xlu2 %2849 }
 0x29c   : > { %v1961_v59 = vpop.f32.mrf.mxu2  ;;  %v2273_v31 = vpop.f32.mrf.mxu3 }
 0x29d   : > { %v2979_v37 = vadd.f32 %v2978_v42, %v2944_v3  ;;  %v3057_v29 = vmul.f32 %v3021_v2, %v2835_v52  ;;  %v2033_v48 = vadd.f32 %v1961_v59, %v1857_v9  ;;  %v1788_v35 = vpop.f32.mrf.mxu1 }
 0x29e   : > { %v1858_v23 = vadd.f32 %v1788_v35, %v4631_v7 }
 0x29f   : > { %v3092_v57 = vadd.f32 %v3091_v51, %v3057_v29  ;;  %v2345_v19 = vadd.f32 %v2273_v31, %v2033_v48  ;;  %v2588_v12 = vpop.f32.mrf.mxu0 }
 0x2a0   : > { %3482 = vmatmul.msk.f32.gmra.mxu1 %vm362_vm2, %v1638_v17 }
 0x2a1   : > { %v2657_v43 = vadd.f32 %v2585_v14, %v2345_v19  ;;  %3520 = vmatmul.msk.f32.gmra.mxu2 %vm362_vm2, %v1882_v27  ;;  %3558 = vmatmul.msk.f32.gmra.mxu3 %vm362_vm2, %v2126_v24  ;;  %v2855_v27 = vpop.permute.xlu0 %2854 }
 0x2a2   : > { %3596 = vmatmul.msk.f32.gmra.mxu0 %vm362_vm2, %v2438_v44 }
 0x2a3   : > { %2693 = vst [vmem:[%s4878_s13 + $0x90] sm:$0xff] %v2657_v43  ;;  %v2945_v50 = vmul.f32 %v2840_v47, %v2657_v43  ;;  %v3022_v36 = vmul.f32 %v2657_v43, %v2657_v43 }
 0x2a4   : > { %v1964_v33 = vpop.f32.mrf.mxu2  ;;  %v2276_v5 = vpop.f32.mrf.mxu3 }
 0x2a5   : > { %v2980_v17 = vadd.f32 %v2979_v37, %v2945_v50  ;;  %v3058_v25 = vmul.f32 %v3022_v36, %v2840_v47  ;;  %v2034_v18 = vadd.f32 %v1964_v33, %v1858_v23  ;;  %v1791_v8 = vpop.f32.mrf.mxu1 }
 0x2a6   : > { %v1859_v42 = vadd.f32 %v1791_v8, %v4646_v63 }
 0x2a7   : > { %v3093_v26 = vadd.f32 %v3092_v57, %v3058_v25  ;;  %v2346_v60 = vadd.f32 %v2276_v5, %v2034_v18  ;;  %v2591_v55 = vpop.f32.mrf.mxu0 }
 0x2a9   : > { %v2658_v6 = vadd.f32 %v2588_v12, %v2346_v60 }
 0x2ab   : > { %2694 = vst [vmem:[%s4878_s13 + $0x98] sm:$0xff] %v2658_v6  ;;  %v2946_v7 = vmul.f32 %v2845_v62, %v2658_v6  ;;  %v3023_v53 = vmul.f32 %v2658_v6, %v2658_v6 }
 0x2ac   : > { %v1967_v61 = vpop.f32.mrf.mxu2  ;;  %v2279_v40 = vpop.f32.mrf.mxu3 }
 0x2ad   : > { %v2981_v34 = vadd.f32 %v2980_v17, %v2946_v7  ;;  %v3059_v21 = vmul.f32 %v3023_v53, %v2845_v62  ;;  %v2035_v51 = vadd.f32 %v1967_v61, %v1859_v42  ;;  %v1794_v4 = vpop.f32.mrf.mxu1  ;;  %v2860_v17 = vpop.permute.xlu1 %2859 }
 0x2ae   : > { %v1860_v1 = vadd.f32 %v1794_v4, %v4660_v0 }
 0x2af   : > { %v3094_v13 = vadd.f32 %v3093_v26, %v3059_v21  ;;  %v2347_v52 = vadd.f32 %v2279_v40, %v2035_v51  ;;  %v2594_v14 = vpop.f32.mrf.mxu0  ;;  %v2865_v40 = vpop.permute.xlu2 %2864 }
 0x2b1   : > { %v2659_v58 = vadd.f32 %v2591_v55, %v2347_v52 }
 0x2b3   : > { %2695 = vst [vmem:[%s4878_s13 + $0xa0] sm:$0xff] %v2659_v58  ;;  %v2947_v63 = vmul.f32 %v2850_v54, %v2659_v58  ;;  %v3024_v28 = vmul.f32 %v2659_v58, %v2659_v58 }
 0x2b4   : > { %v1970_v9 = vpop.f32.mrf.mxu2  ;;  %v2282_v3 = vpop.f32.mrf.mxu3 }
 0x2b5   : > { %v2982_v2 = vadd.f32 %v2981_v34, %v2947_v63  ;;  %v3060_v59 = vmul.f32 %v3024_v28, %v2850_v54  ;;  %v2036_v31 = vadd.f32 %v1970_v9, %v1860_v1  ;;  %v1797_v20 = vpop.f32.mrf.mxu1  ;;  %v2870_v9 = vpop.permute.xlu0 %2869 }
 0x2b6   : > { %v1861_v24 = vadd.f32 %v1797_v20, %v4671_v11 }
 0x2b7   : > { %v3095_v37 = vadd.f32 %v3094_v13, %v3060_v59  ;;  %v2348_v29 = vadd.f32 %v2282_v3, %v2036_v31  ;;  %v2597_v48 = vpop.f32.mrf.mxu0 }
 0x2b9   : > { %v2660_v35 = vadd.f32 %v2594_v14, %v2348_v29 }
 0x2bb   : > { %2696 = vst [vmem:[%s4878_s13 + $0xa8] sm:$0xff] %v2660_v35  ;;  %v2948_v0 = vmul.f32 %v2855_v27, %v2660_v35  ;;  %v3025_v57 = vmul.f32 %v2660_v35, %v2660_v35 }
 0x2bc   : > { %v1973_v19 = vpop.f32.mrf.mxu2  ;;  %v2285_v47 = vpop.f32.mrf.mxu3 }
 0x2bd   : > { %v2983_v12 = vadd.f32 %v2982_v2, %v2948_v0  ;;  %v3061_v44 = vmul.f32 %v3025_v57, %v2855_v27  ;;  %v2037_v43 = vadd.f32 %v1973_v19, %v1861_v24  ;;  %v1800_v23 = vpop.f32.mrf.mxu1  ;;  %v2875_v57 = vpop.permute.xlu1 %2874 }
 0x2be   : > { %v1862_v25 = vadd.f32 %v1800_v23, %v4682_v16 }
 0x2bf   : > { %v3096_v50 = vadd.f32 %v3095_v37, %v3061_v44  ;;  %v2349_v36 = vadd.f32 %v2285_v47, %v2037_v43  ;;  %v2600_v33 = vpop.f32.mrf.mxu0 }
 0x2c1   : > { %v2661_v5 = vadd.f32 %v2597_v48, %v2349_v36 }
 0x2c3   : > { %2697 = vst [vmem:[%s4878_s13 + $0xb0] sm:$0xff] %v2661_v5  ;;  %v2949_v11 = vmul.f32 %v2860_v17, %v2661_v5  ;;  %v3026_v18 = vmul.f32 %v2661_v5, %v2661_v5 }
 0x2c4   : > { %v1976_v8 = vpop.f32.mrf.mxu2  ;;  %v2288_v26 = vpop.f32.mrf.mxu3 }
 0x2c5   : > { %v2984_v60 = vadd.f32 %v2983_v12, %v2949_v11  ;;  %v3062_v62 = vmul.f32 %v3026_v18, %v2860_v17  ;;  %v2038_v55 = vadd.f32 %v1976_v8, %v1862_v25  ;;  %v1803_v6 = vpop.f32.mrf.mxu1  ;;  %v2880_v11 = vpop.permute.xlu2 %2879 }
 0x2c6   : > { %v1863_v34 = vadd.f32 %v1803_v6, %v4696_v32 }
 0x2c7   : > { %v3097_v42 = vadd.f32 %v3096_v50, %v3062_v62  ;;  %v2350_v7 = vadd.f32 %v2288_v26, %v2038_v55  ;;  %v2603_v53 = vpop.f32.mrf.mxu0 }
 0x2c9   : > { %v2662_v61 = vadd.f32 %v2600_v33, %v2350_v7 }
 0x2cb   : > { %2698 = vst [vmem:[%s4878_s13 + $0xb8] sm:$0xff] %v2662_v61  ;;  %v2950_v16 = vmul.f32 %v2865_v40, %v2662_v61  ;;  %v3027_v21 = vmul.f32 %v2662_v61, %v2662_v61 }
 0x2cc   : > { %v1979_v51 = vpop.f32.mrf.mxu2  ;;  %v2291_v4 = vpop.f32.mrf.mxu3 }
 0x2cd   : > { %v2985_v13 = vadd.f32 %v2984_v60, %v2950_v16  ;;  %v3063_v52 = vmul.f32 %v3027_v21, %v2865_v40  ;;  %v2039_v14 = vadd.f32 %v1979_v51, %v1863_v34  ;;  %v1806_v58 = vpop.f32.mrf.mxu1  ;;  %v2885_v34 = vpop.permute.xlu0 %2884 }
 0x2ce   : > { %v1864_v3 = vadd.f32 %v1806_v58, %v4713_v15 }
 0x2cf   : > { %v3098_v54 = vadd.f32 %v3097_v42, %v3063_v52  ;;  %v2351_v1 = vadd.f32 %v2291_v4, %v2039_v14  ;;  %v2606_v63 = vpop.f32.mrf.mxu0 }
 0x2d1   : > { %v2663_v28 = vadd.f32 %v2603_v53, %v2351_v1 }
 0x2d3   : > { %2699 = vst [vmem:[%s4878_s13 + $0xc0] sm:$0xff] %v2663_v28  ;;  %v2951_v32 = vmul.f32 %v2870_v9, %v2663_v28  ;;  %v3028_v2 = vmul.f32 %v2663_v28, %v2663_v28 }
 0x2d4   : > { %v1982_v59 = vpop.f32.mrf.mxu2  ;;  %v2294_v31 = vpop.f32.mrf.mxu3 }
 0x2d5   : > { %v2986_v20 = vadd.f32 %v2985_v13, %v2951_v32  ;;  %v3064_v37 = vmul.f32 %v3028_v2, %v2870_v9  ;;  %v2040_v29 = vadd.f32 %v1982_v59, %v1864_v3  ;;  %v1809_v48 = vpop.f32.mrf.mxu1  ;;  %v2890_v9 = vpop.permute.xlu1 %2889 }
 0x2d6   : > { %v1865_v19 = vadd.f32 %v1809_v48, %v4727_v56 }
 0x2d7   : > { %v3099_v35 = vadd.f32 %v3098_v54, %v3064_v37  ;;  %v2352_v27 = vadd.f32 %v2294_v31, %v2040_v29  ;;  %v2609_v24 = vpop.f32.mrf.mxu0 }
 0x2d9   : > { %v2664_v0 = vadd.f32 %v2606_v63, %v2352_v27 }
 0x2db   : > { %2700 = vst [vmem:[%s4878_s13 + $0xc8] sm:$0xff] %v2664_v0  ;;  %v2952_v15 = vmul.f32 %v2875_v57, %v2664_v0  ;;  %v3029_v47 = vmul.f32 %v2664_v0, %v2664_v0  ;;  %v2895_v0 = vpop.permute.xlu2 %2894 }
 0x2dc   : > { %v1985_v12 = vpop.f32.mrf.mxu2  ;;  %v2297_v44 = vpop.f32.mrf.mxu3 }
 0x2dd   : > { %v2987_v43 = vadd.f32 %v2986_v20, %v2952_v15  ;;  %v3065_v23 = vmul.f32 %v3029_v47, %v2875_v57  ;;  %v2041_v50 = vadd.f32 %v1985_v12, %v1865_v19  ;;  %v1812_v36 = vpop.f32.mrf.mxu1 }
 0x2de   : > { %v1866_v18 = vadd.f32 %v1812_v36, %v4741_v22 }
 0x2df   : > { %v3100_v33 = vadd.f32 %v3099_v35, %v3065_v23  ;;  %v2353_v5 = vadd.f32 %v2297_v44, %v2041_v50  ;;  %v2612_v17 = vpop.f32.mrf.mxu0 }
 0x2e1   : > { %v2665_v25 = vadd.f32 %v2609_v24, %v2353_v5 }
 0x2e3   : > { %2701 = vst [vmem:[%s4878_s13 + $0xd0] sm:$0xff] %v2665_v25  ;;  %v2953_v56 = vmul.f32 %v2880_v11, %v2665_v25  ;;  %v3030_v8 = vmul.f32 %v2665_v25, %v2665_v25 }
 0x2e4   : > { %v1988_v26 = vpop.f32.mrf.mxu2  ;;  %v2300_v60 = vpop.f32.mrf.mxu3 }
 0x2e5   : > { %v2988_v62 = vadd.f32 %v2987_v43, %v2953_v56  ;;  %v3066_v55 = vmul.f32 %v3030_v8, %v2880_v11  ;;  %v2042_v6 = vadd.f32 %v1988_v26, %v1866_v18  ;;  %v1815_v42 = vpop.f32.mrf.mxu1 }
 0x2e6   : > { %v1867_v16 = vadd.f32 %v1815_v42, %v4755_v10 }
 0x2e7   : > { %v3101_v7 = vadd.f32 %v3100_v33, %v3066_v55  ;;  %v2354_v53 = vadd.f32 %v2300_v60, %v2042_v6  ;;  %v2615_v61 = vpop.f32.mrf.mxu0 }
 0x2e9   : > { %v2666_v40 = vadd.f32 %v2612_v17, %v2354_v53  ;;  %v2900_v17 = vpop.permute.xlu0 %2899  ;;  %v2905_v53 = vpop.permute.xlu1 %2904 }
 0x2eb   : > { %2702 = vst [vmem:[%s4878_s13 + $0xd8] sm:$0xff] %v2666_v40  ;;  %v2954_v22 = vmul.f32 %v2885_v34, %v2666_v40  ;;  %v3031_v21 = vmul.f32 %v2666_v40, %v2666_v40 }
 0x2ec   : > { %v1991_v51 = vpop.f32.mrf.mxu2  ;;  %v2303_v4 = vpop.f32.mrf.mxu3 }
 0x2ed   : > { %v2989_v13 = vadd.f32 %v2988_v62, %v2954_v22  ;;  %v3067_v52 = vmul.f32 %v3031_v21, %v2885_v34  ;;  %v2043_v14 = vadd.f32 %v1991_v51, %v1867_v16  ;;  %v1818_v58 = vpop.f32.mrf.mxu1 }
 0x2ee   : > { %v1868_v3 = vadd.f32 %v1818_v58, %v4769_v45 }
 0x2ef   : > { %v3102_v54 = vadd.f32 %v3101_v7, %v3067_v52  ;;  %v2355_v1 = vadd.f32 %v2303_v4, %v2043_v14  ;;  %v2618_v63 = vpop.f32.mrf.mxu0 }
 0x2f1   : > { %v2667_v28 = vadd.f32 %v2615_v61, %v2355_v1 }
 0x2f3   : > { %2703 = vst [vmem:[%s4878_s13 + $0xe0] sm:$0xff] %v2667_v28  ;;  %v2955_v10 = vmul.f32 %v2890_v9, %v2667_v28  ;;  %v3032_v32 = vmul.f32 %v2667_v28, %v2667_v28 }
 0x2f4   : > { %v1994_v2 = vpop.f32.mrf.mxu2  ;;  %v2306_v59 = vpop.f32.mrf.mxu3 }
 0x2f5   : > { %v2990_v31 = vadd.f32 %v2989_v13, %v2955_v10  ;;  %v3068_v20 = vmul.f32 %v3032_v32, %v2890_v9  ;;  %v2044_v37 = vadd.f32 %v1994_v2, %v1868_v3  ;;  %v1821_v29 = vpop.f32.mrf.mxu1 }
 0x2f6   : > { %v1869_v57 = vadd.f32 %v1821_v29, %v4783_v38 }
 0x2f7   : > { %v3103_v48 = vadd.f32 %v3102_v54, %v3068_v20  ;;  %v2356_v35 = vadd.f32 %v2306_v59, %v2044_v37  ;;  %v2621_v27 = vpop.f32.mrf.mxu0  ;;  %v2910_v54 = vpop.permute.xlu2 %2909 }
 0x2f8   : > { %v2915_v37 = vpop.permute.xlu0 %2914 }
 0x2f9   : > { %v2668_v24 = vadd.f32 %v2618_v63, %v2356_v35 }
 0x2fb   : > { %2704 = vst [vmem:[%s4878_s13 + $0xe8] sm:$0xff] %v2668_v24  ;;  %v2956_v45 = vmul.f32 %v2895_v0, %v2668_v24  ;;  %v3033_v19 = vmul.f32 %v2668_v24, %v2668_v24 }
 0x2fc   : > { %v1997_v15 = vpop.f32.mrf.mxu2  ;;  %v2309_v47 = vpop.f32.mrf.mxu3 }
 0x2fd   : > { %v2991_v12 = vadd.f32 %v2990_v31, %v2956_v45  ;;  %v3069_v44 = vmul.f32 %v3033_v19, %v2895_v0  ;;  %v2045_v43 = vadd.f32 %v1997_v15, %v1869_v57  ;;  %v1824_v23 = vpop.f32.mrf.mxu1 }
 0x2fe   : > { %v1870_v25 = vadd.f32 %v1824_v23, %v4797_v46 }
 0x2ff   : > { %v3104_v50 = vadd.f32 %v3103_v48, %v3069_v44  ;;  %v2357_v36 = vadd.f32 %v2309_v47, %v2045_v43  ;;  %v2624_v33 = vpop.f32.mrf.mxu0  ;;  %v2920_v44 = vpop.permute.xlu1 %2919 }
 0x301   : > { %v2669_v5 = vadd.f32 %v2621_v27, %v2357_v36 }
 0x303   : > { %2705 = vst [vmem:[%s4878_s13 + $0xf0] sm:$0xff] %v2669_v5  ;;  %v2957_v38 = vmul.f32 %v2900_v17, %v2669_v5  ;;  %v3034_v11 = vmul.f32 %v2669_v5, %v2669_v5 }
 0x304   : > { %v2000_v18 = vpop.f32.mrf.mxu2  ;;  %v2312_v56 = vpop.f32.mrf.mxu3 }
 0x305   : > { %v2992_v8 = vadd.f32 %v2991_v12, %v2957_v38  ;;  %v3070_v26 = vmul.f32 %v3034_v11, %v2900_v17  ;;  %v2046_v60 = vadd.f32 %v2000_v18, %v1870_v25  ;;  %v1827_v62 = vpop.f32.mrf.mxu1  ;;  %v2925_v18 = vpop.permute.xlu2 %2924 }
 0x306   : > { %v1871_v61 = vadd.f32 %v1827_v62, %v4811_v41 }
 0x307   : > { %v3105_v55 = vadd.f32 %v3104_v50, %v3070_v26  ;;  %v2358_v6 = vadd.f32 %v2312_v56, %v2046_v60  ;;  %v2627_v42 = vpop.f32.mrf.mxu0 }
 0x309   : > { %v2670_v7 = vadd.f32 %v2624_v33, %v2358_v6 }
 0x30b   : > { %2706 = vst [vmem:[%s4878_s13 + $0xf8] sm:$0xff] %v2670_v7  ;;  %v2958_v46 = vmul.f32 %v2905_v53, %v2670_v7  ;;  %v3035_v40 = vmul.f32 %v2670_v7, %v2670_v7 }
 0x30c   : > { %v2003_v34 = vpop.f32.mrf.mxu2  ;;  %v2315_v16 = vpop.f32.mrf.mxu3 }
 0x30d   : > { %v2993_v22 = vadd.f32 %v2992_v8, %v2958_v46  ;;  %v3071_v21 = vmul.f32 %v3035_v40, %v2905_v53  ;;  %v2047_v51 = vadd.f32 %v2003_v34, %v1871_v61  ;;  %v1830_v4 = vpop.f32.mrf.mxu1 }
 0x30e   : > { %v1872_v1 = vadd.f32 %v1830_v4, %v4825_v30 }
 0x30f   : > { %v3106_v13 = vadd.f32 %v3105_v55, %v3071_v21  ;;  %v2359_v52 = vadd.f32 %v2315_v16, %v2047_v51  ;;  %v2630_v58 = vpop.f32.mrf.mxu0 }
 0x311   : > { %v2671_v14 = vadd.f32 %v2627_v42, %v2359_v52 }
 0x313   : > { %2707 = vst [vmem:[%s4878_s13 + $0x100] sm:$0xff] %v2671_v14  ;;  %v2959_v41 = vmul.f32 %v2910_v54, %v2671_v14  ;;  %v3036_v63 = vmul.f32 %v2671_v14, %v2671_v14 }
 0x314   : > { %v2006_v28 = vpop.f32.mrf.mxu2  ;;  %v2318_v9 = vpop.f32.mrf.mxu3 }
 0x315   : > { %v2994_v3 = vadd.f32 %v2993_v22, %v2959_v41  ;;  %v3072_v10 = vmul.f32 %v3036_v63, %v2910_v54  ;;  %v2048_v32 = vadd.f32 %v2006_v28, %v1872_v1  ;;  %v1833_v2 = vpop.f32.mrf.mxu1 }
 0x316   : > { %v1873_v29 = vadd.f32 %v1833_v2, %v4839_v49 }
 0x317   : > { %v3107_v59 = vadd.f32 %v3106_v13, %v3072_v10  ;;  %v2360_v31 = vadd.f32 %v2318_v9, %v2048_v32  ;;  %v2633_v35 = vpop.f32.mrf.mxu0 }
 0x319   : > { %v2672_v20 = vadd.f32 %v2630_v58, %v2360_v31 }
 0x31b   : > { %2708 = vst [vmem:[%s4878_s13 + $0x108] sm:$0xff] %v2672_v20  ;;  %v2960_v48 = vmul.f32 %v2915_v37, %v2672_v20  ;;  %v3037_v30 = vmul.f32 %v2672_v20, %v2672_v20 }
 0x31c   : > { %v2009_v27 = vpop.f32.mrf.mxu2  ;;  %v2321_v24 = vpop.f32.mrf.mxu3 }
 0x31d   : > { %v2995_v0 = vadd.f32 %v2994_v3, %v2960_v48  ;;  %v3073_v57 = vmul.f32 %v3037_v30, %v2915_v37  ;;  %v2049_v45 = vadd.f32 %v2009_v27, %v1873_v29  ;;  %v1836_v47 = vpop.f32.mrf.mxu1 }
 0x31e   : > { %v1874_v43 = vadd.f32 %v1836_v47, %v4853_v39 }
 0x31f   : > { %v3108_v19 = vadd.f32 %v3107_v59, %v3073_v57  ;;  %v2361_v15 = vadd.f32 %v2321_v24, %v2049_v45  ;;  %v2636_v25 = vpop.f32.mrf.mxu0 }
 0x321   : > { %v2673_v12 = vadd.f32 %v2633_v35, %v2361_v15 }
 0x323   : > { %2709 = vst [vmem:[%s4878_s13 + $0x110] sm:$0xff] %v2673_v12  ;;  %v2961_v49 = vmul.f32 %v2920_v44, %v2673_v12  ;;  %v3038_v23 = vmul.f32 %v2673_v12, %v2673_v12 }
 0x324   : > { %v2012_v50 = vpop.f32.mrf.mxu2  ;;  %v2324_v36 = vpop.f32.mrf.mxu3 }
 0x325   : > { %v2996_v33 = vadd.f32 %v2995_v0, %v2961_v49  ;;  %v3074_v5 = vmul.f32 %v3038_v23, %v2920_v44  ;;  %v2050_v17 = vadd.f32 %v2012_v50, %v1874_v43 }
 0x327   : > { %v3109_v38 = vadd.f32 %v3108_v19, %v3074_v5  ;;  %v2362_v39 = vadd.f32 %v2324_v36, %v2050_v17 }
 0x329   : > { %v2674_v11 = vadd.f32 %v2636_v25, %v2362_v39 }
 0x32b   : > { %2710 = vst [vmem:[%s4878_s13 + $0x118] sm:$0xff] %v2674_v11  ;;  %v2962_v56 = vmul.f32 %v2925_v18, %v2674_v11  ;;  %v3039_v8 = vmul.f32 %v2674_v11, %v2674_v11 }
 0x32c   : > { %3728 = shalt.err (!%p3725_p3)
}
 0x32d   : > { %s3798_s13 = smov 128   ;;  %s3799_s5 = smov 8   ;;  %v2997_v26 = vadd.f32 %v2996_v33, %v2962_v56  ;;  %v3075_v60 = vmul.f32 %v3039_v8, %v2925_v18  ;;  %vm3117_vm7 = vcmask 1040384  }
 0x32e   : > { %3608 = dma.vmem_to_hbm [thread:$0]  (%p3863_p5), %s3139_s10, 4608, %s3141_s11, %s3121_s12, %s3798_s13, %s3798_s13, %s3799_s5  }
 0x32f   : > { %v2998_v62 = vrot.slane %v2997_v26, 4  ;;  %v3110_v55 = vadd.f32 %v3109_v38, %v3075_v60  ;;  %s3254_s20 = sshll.u32 %s4858_s9, 1  ;;  %s3599_s6 = sshll.u32 %s3846_s19, 1 }
 0x330   : > { %s3153_s14 = scalar_lea.hbm %s5226_s4, %s3599_s6  ;;  %s201_s10 = scalar_lea.vmem [#allocation4], %s3254_s20 }
 0x331   : > { %v2999_v6 = vadd.f32 %v2998_v62, %v2997_v26  ;;  %v3111_v42 = vrot.slane %v3110_v55, 4  ;;  %s3155_s11 = sshll.u32 %s201_s10, 4  ;;  %s3157_s12 = sshll.u32 %s3153_s14, 4  ;;  %s3156_s11 = int_to_ptr.vmem [resolvable:$true] %s3155_s11  ;;  %s3158_s12 = int_to_ptr.hbm [resolvable:$true] %s3157_s12 }
 0x332   : > { %s3126_s19 = scalar_lea.sflag [#allocation5], %s4858_s9  ;;  %s3743_s22 = sshra.s32 %s3158_s12, 4  ;;  %s3744_s22 = int_to_ptr.hbm [resolvable:$true] %s3743_s22 }
 0x333   : > { %v3000_v7 = vrot.slane %v2999_v6, 2  ;;  %v3112_v53 = vadd.f32 %v3111_v42, %v3110_v55  ;;  %s3745_s23 = scalar_lea.hbm %s3744_s22, 2  ;;  %s3749_s29 = scalar_lea.hbm %s5226_s4, 4 }
 0x334   : > { %p3746_p4 = scmp.ne.s32.totalorder %s3744_s22, %s3745_s23  ;;  %p3750_p9 = scmp.lt.s32.totalorder %s3744_s22, %s5226_s4 }
 0x335   : > { %v3001_v61 = vadd.f32 %v3000_v7, %v2999_v6  ;;  %v3113_v46 = vrot.slane %v3112_v53, 2  ;;  %p3751_p10 = scmp.lt.s32.totalorder %s3749_s29, %s3745_s23 }
 0x336   : > { %p3747_p7 = pnand %p3746_p4, %p3863_p5 }
 0x337   : > { %v3002_v40 = vrot.slane %v3001_v61, 1  ;;  %v3114_v34 = vadd.f32 %v3113_v46, %v3112_v53  ;;  %p3752_p11 = por %p3751_p10, %p3750_p9 }
 0x338   : > { %p3748_p8 = pneg %p3747_p7 }
 0x339   : > { %v3115_v16 = vrot.slane %v3114_v34, 1  ;;  %v3003_v22 = vadd.f32 %v3002_v40, %v3001_v61 }
 0x33a   : > { %p3753_p12 = pnand %p3752_p11, %p3748_p8 }
 0x33b   : > { %v3116_v21 = vadd.f32 %v3115_v16, %v3114_v34 }
 0x33d   : > { %v3118_v51 = vsel %vm3117_vm7, %v3003_v22, %v3116_v21 }
 0x33e   : > { %3119 = vst [vmem:[%s201_s10] sm:$0x3] %v3118_v51 }
 0x33f   : > { %3756 = shalt.err (!%p3753_p12)
}
 0x340   : > { %3609 = dma.vmem_to_hbm [thread:$0]  (%p3863_p5), %s3156_s11, 32, %s3158_s12, %s3126_s19  }
 0x341 PF: > { %p3619_p13 = scmp.ge.s32.totalorder %s3795_s18, 2  ;;  %s3169_s9 = sand.u32 1, %s3783_s15  }
 0x342   : > { %s3170_s5 = scalar_lea.sflag [#allocation3], %s3169_s9 }
 0x343   : > { %p3613_p0 = pnand %p3619_p13, %p3867_p6 }
 0x345   : > { %p3614_p1 = pneg %p3613_p0 }
 0x347   : > { %3774 = dma.done.wait (%p3614_p1), %s3170_s5, 4608  }
 0x348   : > { %3776 = vsyncadd (%p3614_p1), %s3170_s5, 4294962688  ;;  %s3180_s20 = scalar_lea.sflag [#allocation5], %s3169_s9 }
 0x349   : > { %3778 = dma.done.wait (%p3614_p1), %s3180_s20, 32  }
 0x34a   : > { %3780 = vsyncadd (%p3614_p1), %s3180_s20, 4294967264  ;;  %p18_p5 = scmp.ge.s32.totalorder %s3850_s21, 4   ;;  %s5251_s15 = smov %s3787_s16 }
 0x34b   : > { %s5252_s16 = smov %s3791_s17  ;;  %s5253_s17 = smov %s3861_s24 }
 0x34c   : > { %s5254_s18 = smov %s3850_s21  ;;  %20 = sbr.rel (!%p18_p5) target bundleno = 5 (0x5), region = 92 }
 0x351   :  { %3186 = vsyncpa [#allocation3], 1 }
 0x352   :  { %3188 = vsyncpa [#allocation3 + $0x1], 1 }
 0x353   :  { %3189 = vsyncpa [#allocation5], 1 }
 0x354   :  { %3191 = vsyncpa [#allocation5 + $0x1], 1 }

</bundles_post_ra>
